<compile_context>
chip_gen: v5e
topology: v5e:2x2
jax: 0.10.0
libtpu: 0.0.40
codegen_flags: <defaults>
</compile_context>

<pallas_src>
import jax
import jax.numpy as jnp
from jax.experimental import pallas as pl
from jax.experimental.pallas import tpu as pltpu


# ----------------------------------------------------------------------------
# Gaussian-kernel attention + aggregation, tiled over destination nodes.
# ----------------------------------------------------------------------------
def _gausconv_kernel(sigma_ref, fdst_ref, bdiag_ref, sterm_ref, rn_ref, adj_ref,
                     bias_ref, out_ref):
    # sigma_ref : (K,)        SMEM  (scalar prefetch)
    # fdst_ref  : (T, K*F)    VMEM  bf16  projected feats of this dst tile
    # bdiag_ref : (K*N, K*F)  VMEM  bf16  block-diag source feats (resident)
    # sterm_ref : (K, N)      VMEM  f32   ||feat_k[u]||^2 - 2 mu_k.feat_k[u]   (resident)
    # rn_ref    : (T, K)      VMEM  f32   ||feat_k[v] + mu_k||^2 for this dst tile
    # adj_ref   : (T, N)      VMEM  int8  adj[dst, src] in {0, 1}
    # bias_ref  : (1, K*F)    VMEM  f32
    # out_ref   : (T, K*F)    VMEM  f32
    K, N = sterm_ref.shape

    fdst = fdst_ref[...]                          # (T, K*F)   bf16
    bdiag = bdiag_ref[...]                        # (K*N, K*F) bf16
    adj = adj_ref[...].astype(jnp.float32)        # (T, N) 0/1 mask, converted once
    sterm = sterm_ref[...]                        # (K, N)
    rn = rn_ref[...]                              # (T, K)

    # All K cross terms feat_k[v].feat_k[u] in ONE bf16 MXU matmul (K*F=128-deep):
    #   cross_all[t, k*N + u] = sum_f fdst[t, k*F+f] * bdiag[k*N+u, k*F+f]
    cross_all = jax.lax.dot_general(
        fdst, bdiag, dimension_numbers=(((1,), (1,)), ((), ())),
        preferred_element_type=jnp.float32)       # (T, K*N) f32

    att_cols = []
    for k in range(K):                            # K is small & static -> unrolled
        cross = cross_all[:, k * N:(k + 1) * N]   # (T, N), vreg-aligned lane slice
        # ||feat[u] - feat[v] - mu_k||^2  =  rn[v,k] + sterm[k,u] - 2*feat_k[v].feat_k[u]
        nsq = jnp.maximum(rn[:, k:k + 1] + sterm[k:k + 1, :] - 2.0 * cross, 0.0)
        score = jnp.exp(-jnp.sqrt(nsq) * sigma_ref[k])       # (T, N), in (0, 1]
        # DGL edge_softmax exponentiates its input; masked non-edges -> 0 so they drop
        # out of both numerator and denominator (scores <= 1 -> no max shift needed).
        w = jnp.exp(score) * adj                             # (T, N)
        den = jnp.sum(w, axis=-1, keepdims=True)             # (T, 1)  XLU reduce
        den = jnp.where(den > 0.0, den, 1.0)                 # zero-in-degree guard
        att_cols.append(w * pl.reciprocal(den, approx=True)) # normalized attention

    # Fused aggregation for all K kernels: (T, K*N) @ (K*N, K*F) block-diag, bf16 MXU,
    # 1024-deep contraction, one lane-dense (T, 128) result -> single unmasked store.
    att_all = jnp.concatenate(att_cols, axis=-1).astype(jnp.bfloat16)
    agg = jnp.dot(att_all, bdiag, preferred_element_type=jnp.float32)   # (T, K*F)
    out_ref[...] = (agg + bias_ref[...]).astype(out_ref.dtype)


def gausconv_forward(x, W, adj, mu, sigma, bias, *, tile=64):
    """GAUSConv forward.  x:(N,Din) f32, W:(Din,K*F) f32, adj:(N,N) int8 0/1 with
    adj[dst,src]=1 for edge src->dst, mu/bias:(K,F) f32, sigma:(K,) f32.
    Returns (N, K, F) f32."""
    N, Din = x.shape
    K, F = mu.shape
    KF = K * F
    assert W.shape == (Din, KF)
    assert adj.shape == (N, N)
    tile = min(tile, N)
    assert N % tile == 0, "N must be a multiple of the dst tile size"

    # --- projection + grid-invariant precompute (plain XLA, fused by jit) -----------
    featf = jnp.dot(x, W, precision=jax.lax.Precision.HIGHEST)   # (N, K*F) f32
    feat_bf = featf.astype(jnp.bfloat16)          # bf16 MXU operand form (also dst tiles)
    featq = feat_bf.astype(jnp.float32)           # same quantized values in f32, so the
    f3 = featq.reshape(N, K, F)                   # rn/sterm/cross cancellation is exact
    # per-source term    ||feat_k[u]||^2 - 2*mu_k.feat_k[u]        -> (K, N) f32
    sterm = (jnp.sum(f3 * f3, axis=-1)
             - 2.0 * jnp.einsum("nkf,kf->nk", f3, mu)).T
    # per-destination term  ||feat_k[v] + mu_k||^2                  -> (N, K) f32
    rn = jnp.sum((f3 + mu[None, :, :]) ** 2, axis=-1)
    # block-diagonal source matrix  B[k*N+u, k*F+f] = feat_k[u, f]  -> (K*N, K*F) bf16
    bdiag = jnp.einsum("nkf,kl->knlf", f3, jnp.eye(K, dtype=jnp.float32))
    bdiag = bdiag.reshape(K * N, KF).astype(jnp.bfloat16)   # exact: values already bf16
    bias_flat = bias.reshape(1, KF)

    out2d = pl.pallas_call(
        _gausconv_kernel,
        out_shape=jax.ShapeDtypeStruct((N, KF), jnp.float32),
        grid_spec=pltpu.PrefetchScalarGridSpec(
            num_scalar_prefetch=1,                               # sigma -> SMEM
            grid=(N // tile,),
            in_specs=[
                pl.BlockSpec((tile, KF), lambda i, s: (i, 0)),   # dst-tile feats (bf16)
                pl.BlockSpec((K * N, KF), lambda i, s: (0, 0)),  # block-diag, resident
                pl.BlockSpec((K, N), lambda i, s: (0, 0)),       # src term, resident
                pl.BlockSpec((tile, K), lambda i, s: (i, 0)),    # dst term tile
                pl.BlockSpec((tile, N), lambda i, s: (i, 0)),    # adj tile (int8)
                pl.BlockSpec((1, KF), lambda i, s: (0, 0)),      # bias, resident
            ],
            out_specs=pl.BlockSpec((tile, KF), lambda i, s: (i, 0)),
        ),
        compiler_params=pltpu.CompilerParams(
            dimension_semantics=("parallel",),      # shard dst tiles across TCs (v7x)
            vmem_limit_bytes=32 * 1024 * 1024,      # safe on v5e/v6e/v7x at these sizes
        ),
    )(sigma, feat_bf, bdiag, sterm, rn, adj, bias_flat)

    return out2d.reshape(N, K, F)


# ----------------------------------------------------------------------------
# Pure-JAX f32 reference mirroring the PyTorch/DGL forward (for validation only).
# ----------------------------------------------------------------------------
def gausconv_reference(x, W, adj, mu, sigma, bias):
    N = x.shape[0]
    K, F = mu.shape
    feat = jnp.dot(x, W, precision=jax.lax.Precision.HIGHEST).reshape(N, K, F)
    # diff[v, u] = feat[u] - feat[v]   (edge u -> v: src minus dst)
    diff = feat[None, :, :, :] - feat[:, None, :, :]
    norm = jnp.sqrt(jnp.sum((diff - mu[None, None]) ** 2, axis=-1))   # (v, u, K)
    score = jnp.exp(-norm * sigma[None, None, :])                     # (v, u, K)
    mask = (adj > 0).astype(jnp.float32)[:, :, None]
    # DGL edge_softmax over incoming edges of each dst node v (it exponentiates).
    e = jnp.exp(score) * mask
    den = jnp.sum(e, axis=1, keepdims=True)
    att = e / jnp.where(den > 0.0, den, 1.0)
    out = jnp.einsum("vuk,ukf->vkf", att, feat,
                     precision=jax.lax.Precision.HIGHEST) + bias[None]
    return out


if __name__ == "__main__":
    # Small deterministic problem: N nodes, Din input feats, K gaussian kernels,
    # F output feats per kernel (K*F = 128 -> lane-dense output rows).
    N, D_in, K, F = 256, 64, 4, 32

    key = jax.random.PRNGKey(0)
    k_x, k_w, k_b, k_mu, k_sig, k_adj = jax.random.split(key, 6)

    x = jax.random.normal(k_x, (N, D_in), dtype=jnp.float32)

    # Parameters (deterministic re-implementation of reset_parameters()).
    gain = jnp.sqrt(2.0)                                    # calculate_gain('relu')
    fc_std = gain * jnp.sqrt(2.0 / (D_in + K * F))          # xavier_normal_
    W = fc_std * jax.random.normal(k_w, (D_in, K * F), dtype=jnp.float32)
    sigma = jax.random.uniform(k_sig, (K,), dtype=jnp.float32,
                               minval=0.0, maxval=1.0)      # uniform_(0, 1)
    mu_bound = jnp.sqrt(6.0 / (K * F + F))                  # xavier_uniform_ on (1, K, F)
    mu = jax.random.uniform(k_mu, (K, F), dtype=jnp.float32,
                            minval=-mu_bound, maxval=mu_bound)
    # reset_parameters() zeros the bias; use a small nonzero one here so the
    # bias-add path is actually exercised by the check.
    bias = 0.1 * jax.random.normal(k_b, (K, F), dtype=jnp.float32)

    # Dense 0/1 adjacency (int8) with self-loops, adj[dst, src]; self-loops guarantee
    # in-degree >= 1 (the module's allow_zero_in_degree contract).
    adj = jax.random.bernoulli(k_adj, 0.1, (N, N))
    adj = jnp.logical_or(adj, jnp.eye(N, dtype=jnp.bool_)).astype(jnp.int8)

    fwd = jax.jit(gausconv_forward, static_argnames=("tile",))
    out = fwd(x, W, adj, mu, sigma, bias, tile=64)
    out = jax.block_until_ready(out)

    ref = gausconv_reference(x, W, adj, mu, sigma, bias)
    assert out.shape == (N, K, F)
    err = float(jnp.max(jnp.abs(out - ref)))
    # bf16 projected feats / bf16 MXU operands + approx reciprocal vs HIGHEST reference.
    assert jnp.allclose(out, ref, rtol=1e-2, atol=2e-2), f"max abs err = {err}"

    print("KERNEL_OK")
</pallas_src>

<mosaic_0001>
module attributes {stable_mosaic.version = 11 : i64} {
  func.func @_gausconv_kernel(%arg0: i32, %arg1: memref<4xf32, #tpu.memory_space<smem>>, %arg2: memref<64x128xbf16, #tpu.memory_space<vmem>>, %arg3: memref<1024x128xbf16, #tpu.memory_space<vmem>>, %arg4: memref<4x256xf32, #tpu.memory_space<vmem>>, %arg5: memref<64x4xf32, #tpu.memory_space<vmem>>, %arg6: memref<64x256xi8, #tpu.memory_space<vmem>>, %arg7: memref<1x128xf32, #tpu.memory_space<vmem>>, %arg8: memref<64x128xf32, #tpu.memory_space<vmem>>) attributes {dimension_semantics = [#tpu.dimension_semantics<parallel>], iteration_bounds = array<i64: 4>, scalar_prefetch = 1 : i64, scratch_operands = 0 : i64, tpu.core_type = #tpu.core_type<tc>, window_params = [{transform_indices = @transform_0, window_bounds = array<i64: 64, 128>}, {pipeline_mode = #tpu.pipeline_mode<synchronous>, transform_indices = @transform_1, window_bounds = array<i64: 1024, 128>}, {pipeline_mode = #tpu.pipeline_mode<synchronous>, transform_indices = @transform_2, window_bounds = array<i64: 4, 256>}, {transform_indices = @transform_3, window_bounds = array<i64: 64, 4>}, {transform_indices = @transform_4, window_bounds = array<i64: 64, 256>}, {pipeline_mode = #tpu.pipeline_mode<synchronous>, transform_indices = @transform_5, window_bounds = array<i64: 1, 128>}, {transform_indices = @transform_6, window_bounds = array<i64: 64, 128>}]} {
    %c0 = arith.constant 0 : index
    %c0_0 = arith.constant 0 : index
    %0 = vector.load %arg2[%c0, %c0_0] : memref<64x128xbf16, #tpu.memory_space<vmem>>, vector<64x128xbf16>
    %c0_1 = arith.constant 0 : index
    %c0_2 = arith.constant 0 : index
    %1 = vector.load %arg3[%c0_1, %c0_2] : memref<1024x128xbf16, #tpu.memory_space<vmem>>, vector<1024x128xbf16>
    %c0_3 = arith.constant 0 : index
    %c0_4 = arith.constant 0 : index
    %2 = vector.load %arg6[%c0_3, %c0_4] : memref<64x256xi8, #tpu.memory_space<vmem>>, vector<64x256xi8>
    %3 = arith.sitofp %2 : vector<64x256xi8> to vector<64x256xf32>
    %c0_5 = arith.constant 0 : index
    %c0_6 = arith.constant 0 : index
    %4 = vector.load %arg4[%c0_5, %c0_6] : memref<4x256xf32, #tpu.memory_space<vmem>>, vector<4x256xf32>
    %c0_7 = arith.constant 0 : index
    %c0_8 = arith.constant 0 : index
    %5 = vector.load %arg5[%c0_7, %c0_8] : memref<64x4xf32, #tpu.memory_space<vmem>>, vector<64x4xf32>
    %cst = arith.constant dense<0.000000e+00> : vector<64x1024xf32>
    %6 = tpu.matmul %0, %1, %cst {dimension_numbers = #tpu.dot_dimension_numbers<[1], [1], [0], [0], [0, 0, 1, 0], [], []>} : vector<64x128xbf16>, vector<1024x128xbf16>, vector<64x1024xf32> -> vector<64x1024xf32>
    %7 = vector.extract_strided_slice %6 {offsets = [0, 0], sizes = [64, 256], strides = [1, 1]} : vector<64x1024xf32> to vector<64x256xf32>
    %8 = vector.extract_strided_slice %5 {offsets = [0, 0], sizes = [64, 1], strides = [1, 1]} : vector<64x4xf32> to vector<64x1xf32>
    %9 = vector.extract_strided_slice %4 {offsets = [0, 0], sizes = [1, 256], strides = [1, 1]} : vector<4x256xf32> to vector<1x256xf32>
    %10 = vector.broadcast %8 : vector<64x1xf32> to vector<64x256xf32>
    %11 = vector.broadcast %9 : vector<1x256xf32> to vector<64x256xf32>
    %12 = arith.addf %10, %11 : vector<64x256xf32>
    %cst_9 = arith.constant 2.000000e+00 : f32
    %13 = vector.broadcast %cst_9 : f32 to vector<64x256xf32>
    %14 = arith.mulf %13, %7 : vector<64x256xf32>
    %15 = arith.subf %12, %14 : vector<64x256xf32>
    %cst_10 = arith.constant 0.000000e+00 : f32
    %16 = vector.broadcast %cst_10 : f32 to vector<64x256xf32>
    %17 = arith.maximumf %15, %16 : vector<64x256xf32>
    %18 = math.sqrt %17 : vector<64x256xf32>
    %cst_11 = arith.constant 0.000000e+00 : f32
    %19 = vector.broadcast %cst_11 : f32 to vector<64x256xf32>
    %20 = arith.subf %19, %18 : vector<64x256xf32>
    %c0_12 = arith.constant 0 : index
    %21 = memref.load %arg1[%c0_12] : memref<4xf32, #tpu.memory_space<smem>>
    %22 = vector.broadcast %21 : f32 to vector<64x256xf32>
    %23 = arith.mulf %20, %22 : vector<64x256xf32>
    %24 = math.exp %23 : vector<64x256xf32>
    %25 = math.exp %24 : vector<64x256xf32>
    %26 = arith.mulf %25, %3 : vector<64x256xf32>
    %cst_13 = arith.constant dense<0.000000e+00> : vector<64xf32>
    %27 = vector.multi_reduction <add>, %26, %cst_13 [1] : vector<64x256xf32> to vector<64xf32>
    %28 = vector.shape_cast %27 : vector<64xf32> to vector<64x1xf32>
    %cst_14 = arith.constant 0.000000e+00 : f32
    %29 = vector.broadcast %cst_14 : f32 to vector<64x1xf32>
    %30 = arith.cmpf ogt, %28, %29 : vector<64x1xf32>
    %cst_15 = arith.constant 1.000000e+00 : f32
    %31 = vector.broadcast %cst_15 : f32 to vector<64x1xf32>
    %32 = arith.select %30, %28, %31 : vector<64x1xi1>, vector<64x1xf32>
    %33 = tpu.reciprocal %32 {approx = true} : vector<64x1xf32> -> vector<64x1xf32>
    %34 = vector.broadcast %33 : vector<64x1xf32> to vector<64x256xf32>
    %35 = arith.mulf %26, %34 : vector<64x256xf32>
    %36 = vector.extract_strided_slice %6 {offsets = [0, 256], sizes = [64, 256], strides = [1, 1]} : vector<64x1024xf32> to vector<64x256xf32>
    %37 = vector.extract_strided_slice %5 {offsets = [0, 1], sizes = [64, 1], strides = [1, 1]} : vector<64x4xf32> to vector<64x1xf32>
    %38 = vector.extract_strided_slice %4 {offsets = [1, 0], sizes = [1, 256], strides = [1, 1]} : vector<4x256xf32> to vector<1x256xf32>
    %39 = vector.broadcast %37 : vector<64x1xf32> to vector<64x256xf32>
    %40 = vector.broadcast %38 : vector<1x256xf32> to vector<64x256xf32>
    %41 = arith.addf %39, %40 : vector<64x256xf32>
    %cst_16 = arith.constant 2.000000e+00 : f32
    %42 = vector.broadcast %cst_16 : f32 to vector<64x256xf32>
    %43 = arith.mulf %42, %36 : vector<64x256xf32>
    %44 = arith.subf %41, %43 : vector<64x256xf32>
    %cst_17 = arith.constant 0.000000e+00 : f32
    %45 = vector.broadcast %cst_17 : f32 to vector<64x256xf32>
    %46 = arith.maximumf %44, %45 : vector<64x256xf32>
    %47 = math.sqrt %46 : vector<64x256xf32>
    %cst_18 = arith.constant 0.000000e+00 : f32
    %48 = vector.broadcast %cst_18 : f32 to vector<64x256xf32>
    %49 = arith.subf %48, %47 : vector<64x256xf32>
    %c1 = arith.constant 1 : index
    %50 = memref.load %arg1[%c1] : memref<4xf32, #tpu.memory_space<smem>>
    %51 = vector.broadcast %50 : f32 to vector<64x256xf32>
    %52 = arith.mulf %49, %51 : vector<64x256xf32>
    %53 = math.exp %52 : vector<64x256xf32>
    %54 = math.exp %53 : vector<64x256xf32>
    %55 = arith.mulf %54, %3 : vector<64x256xf32>
    %cst_19 = arith.constant dense<0.000000e+00> : vector<64xf32>
    %56 = vector.multi_reduction <add>, %55, %cst_19 [1] : vector<64x256xf32> to vector<64xf32>
    %57 = vector.shape_cast %56 : vector<64xf32> to vector<64x1xf32>
    %cst_20 = arith.constant 0.000000e+00 : f32
    %58 = vector.broadcast %cst_20 : f32 to vector<64x1xf32>
    %59 = arith.cmpf ogt, %57, %58 : vector<64x1xf32>
    %cst_21 = arith.constant 1.000000e+00 : f32
    %60 = vector.broadcast %cst_21 : f32 to vector<64x1xf32>
    %61 = arith.select %59, %57, %60 : vector<64x1xi1>, vector<64x1xf32>
    %62 = tpu.reciprocal %61 {approx = true} : vector<64x1xf32> -> vector<64x1xf32>
    %63 = vector.broadcast %62 : vector<64x1xf32> to vector<64x256xf32>
    %64 = arith.mulf %55, %63 : vector<64x256xf32>
    %65 = vector.extract_strided_slice %6 {offsets = [0, 512], sizes = [64, 256], strides = [1, 1]} : vector<64x1024xf32> to vector<64x256xf32>
    %66 = vector.extract_strided_slice %5 {offsets = [0, 2], sizes = [64, 1], strides = [1, 1]} : vector<64x4xf32> to vector<64x1xf32>
    %67 = vector.extract_strided_slice %4 {offsets = [2, 0], sizes = [1, 256], strides = [1, 1]} : vector<4x256xf32> to vector<1x256xf32>
    %68 = vector.broadcast %66 : vector<64x1xf32> to vector<64x256xf32>
    %69 = vector.broadcast %67 : vector<1x256xf32> to vector<64x256xf32>
    %70 = arith.addf %68, %69 : vector<64x256xf32>
    %cst_22 = arith.constant 2.000000e+00 : f32
    %71 = vector.broadcast %cst_22 : f32 to vector<64x256xf32>
    %72 = arith.mulf %71, %65 : vector<64x256xf32>
    %73 = arith.subf %70, %72 : vector<64x256xf32>
    %cst_23 = arith.constant 0.000000e+00 : f32
    %74 = vector.broadcast %cst_23 : f32 to vector<64x256xf32>
    %75 = arith.maximumf %73, %74 : vector<64x256xf32>
    %76 = math.sqrt %75 : vector<64x256xf32>
    %cst_24 = arith.constant 0.000000e+00 : f32
    %77 = vector.broadcast %cst_24 : f32 to vector<64x256xf32>
    %78 = arith.subf %77, %76 : vector<64x256xf32>
    %c2 = arith.constant 2 : index
    %79 = memref.load %arg1[%c2] : memref<4xf32, #tpu.memory_space<smem>>
    %80 = vector.broadcast %79 : f32 to vector<64x256xf32>
    %81 = arith.mulf %78, %80 : vector<64x256xf32>
    %82 = math.exp %81 : vector<64x256xf32>
    %83 = math.exp %82 : vector<64x256xf32>
    %84 = arith.mulf %83, %3 : vector<64x256xf32>
    %cst_25 = arith.constant dense<0.000000e+00> : vector<64xf32>
    %85 = vector.multi_reduction <add>, %84, %cst_25 [1] : vector<64x256xf32> to vector<64xf32>
    %86 = vector.shape_cast %85 : vector<64xf32> to vector<64x1xf32>
    %cst_26 = arith.constant 0.000000e+00 : f32
    %87 = vector.broadcast %cst_26 : f32 to vector<64x1xf32>
    %88 = arith.cmpf ogt, %86, %87 : vector<64x1xf32>
    %cst_27 = arith.constant 1.000000e+00 : f32
    %89 = vector.broadcast %cst_27 : f32 to vector<64x1xf32>
    %90 = arith.select %88, %86, %89 : vector<64x1xi1>, vector<64x1xf32>
    %91 = tpu.reciprocal %90 {approx = true} : vector<64x1xf32> -> vector<64x1xf32>
    %92 = vector.broadcast %91 : vector<64x1xf32> to vector<64x256xf32>
    %93 = arith.mulf %84, %92 : vector<64x256xf32>
    %94 = vector.extract_strided_slice %6 {offsets = [0, 768], sizes = [64, 256], strides = [1, 1]} : vector<64x1024xf32> to vector<64x256xf32>
    %95 = vector.extract_strided_slice %5 {offsets = [0, 3], sizes = [64, 1], strides = [1, 1]} : vector<64x4xf32> to vector<64x1xf32>
    %96 = vector.extract_strided_slice %4 {offsets = [3, 0], sizes = [1, 256], strides = [1, 1]} : vector<4x256xf32> to vector<1x256xf32>
    %97 = vector.broadcast %95 : vector<64x1xf32> to vector<64x256xf32>
    %98 = vector.broadcast %96 : vector<1x256xf32> to vector<64x256xf32>
    %99 = arith.addf %97, %98 : vector<64x256xf32>
    %cst_28 = arith.constant 2.000000e+00 : f32
    %100 = vector.broadcast %cst_28 : f32 to vector<64x256xf32>
    %101 = arith.mulf %100, %94 : vector<64x256xf32>
    %102 = arith.subf %99, %101 : vector<64x256xf32>
    %cst_29 = arith.constant 0.000000e+00 : f32
    %103 = vector.broadcast %cst_29 : f32 to vector<64x256xf32>
    %104 = arith.maximumf %102, %103 : vector<64x256xf32>
    %105 = math.sqrt %104 : vector<64x256xf32>
    %cst_30 = arith.constant 0.000000e+00 : f32
    %106 = vector.broadcast %cst_30 : f32 to vector<64x256xf32>
    %107 = arith.subf %106, %105 : vector<64x256xf32>
    %c3 = arith.constant 3 : index
    %108 = memref.load %arg1[%c3] : memref<4xf32, #tpu.memory_space<smem>>
    %109 = vector.broadcast %108 : f32 to vector<64x256xf32>
    %110 = arith.mulf %107, %109 : vector<64x256xf32>
    %111 = math.exp %110 : vector<64x256xf32>
    %112 = math.exp %111 : vector<64x256xf32>
    %113 = arith.mulf %112, %3 : vector<64x256xf32>
    %cst_31 = arith.constant dense<0.000000e+00> : vector<64xf32>
    %114 = vector.multi_reduction <add>, %113, %cst_31 [1] : vector<64x256xf32> to vector<64xf32>
    %115 = vector.shape_cast %114 : vector<64xf32> to vector<64x1xf32>
    %cst_32 = arith.constant 0.000000e+00 : f32
    %116 = vector.broadcast %cst_32 : f32 to vector<64x1xf32>
    %117 = arith.cmpf ogt, %115, %116 : vector<64x1xf32>
    %cst_33 = arith.constant 1.000000e+00 : f32
    %118 = vector.broadcast %cst_33 : f32 to vector<64x1xf32>
    %119 = arith.select %117, %115, %118 : vector<64x1xi1>, vector<64x1xf32>
    %120 = tpu.reciprocal %119 {approx = true} : vector<64x1xf32> -> vector<64x1xf32>
    %121 = vector.broadcast %120 : vector<64x1xf32> to vector<64x256xf32>
    %122 = arith.mulf %113, %121 : vector<64x256xf32>
    %123 = tpu.concatenate %35, %64, %93, %122 in 1 : vector<64x256xf32>, vector<64x256xf32>, vector<64x256xf32>, vector<64x256xf32> -> vector<64x1024xf32>
    %124 = arith.truncf %123 : vector<64x1024xf32> to vector<64x1024xbf16>
    %cst_34 = arith.constant dense<0.000000e+00> : vector<64x128xf32>
    %125 = tpu.matmul %124, %1, %cst_34 {dimension_numbers = #tpu.dot_dimension_numbers<[1], [0], [0], [1], [0, 0, 1, 1], [], []>} : vector<64x1024xbf16>, vector<1024x128xbf16>, vector<64x128xf32> -> vector<64x128xf32>
    %c0_35 = arith.constant 0 : index
    %c0_36 = arith.constant 0 : index
    %126 = vector.load %arg7[%c0_35, %c0_36] : memref<1x128xf32, #tpu.memory_space<vmem>>, vector<1x128xf32>
    %127 = vector.broadcast %126 : vector<1x128xf32> to vector<64x128xf32>
    %128 = arith.addf %125, %127 : vector<64x128xf32>
    %c0_37 = arith.constant 0 : index
    %c0_38 = arith.constant 0 : index
    %129 = vector.load %arg8[%c0_37, %c0_38] : memref<64x128xf32, #tpu.memory_space<vmem>>, vector<64x128xf32>
    tpu.vector_store %arg8[%c0_37, %c0_38], %128 {strides = array<i32>} : memref<64x128xf32, #tpu.memory_space<vmem>>, vector<64x128xf32>,
    return
  }
  func.func @transform_0(%arg0: i32, %arg1: memref<4xf32, #tpu.memory_space<smem>>) -> (i32, i32) {
    %c0_i32 = arith.constant 0 : i32
    %c0_i32_0 = arith.constant 0 : i32
    return %arg0, %c0_i32 : i32, i32
  }
  func.func @transform_1(%arg0: i32, %arg1: memref<4xf32, #tpu.memory_space<smem>>) -> (i32, i32) {
    %c0_i32 = arith.constant 0 : i32
    %c0_i32_0 = arith.constant 0 : i32
    %c0_i32_1 = arith.constant 0 : i32
    return %c0_i32, %c0_i32_0 : i32, i32
  }
  func.func @transform_2(%arg0: i32, %arg1: memref<4xf32, #tpu.memory_space<smem>>) -> (i32, i32) {
    %c0_i32 = arith.constant 0 : i32
    %c0_i32_0 = arith.constant 0 : i32
    %c0_i32_1 = arith.constant 0 : i32
    return %c0_i32, %c0_i32_0 : i32, i32
  }
  func.func @transform_3(%arg0: i32, %arg1: memref<4xf32, #tpu.memory_space<smem>>) -> (i32, i32) {
    %c0_i32 = arith.constant 0 : i32
    %c0_i32_0 = arith.constant 0 : i32
    return %arg0, %c0_i32 : i32, i32
  }
  func.func @transform_4(%arg0: i32, %arg1: memref<4xf32, #tpu.memory_space<smem>>) -> (i32, i32) {
    %c0_i32 = arith.constant 0 : i32
    %c0_i32_0 = arith.constant 0 : i32
    return %arg0, %c0_i32 : i32, i32
  }
  func.func @transform_5(%arg0: i32, %arg1: memref<4xf32, #tpu.memory_space<smem>>) -> (i32, i32) {
    %c0_i32 = arith.constant 0 : i32
    %c0_i32_0 = arith.constant 0 : i32
    %c0_i32_1 = arith.constant 0 : i32
    return %c0_i32, %c0_i32_0 : i32, i32
  }
  func.func @transform_6(%arg0: i32, %arg1: memref<4xf32, #tpu.memory_space<smem>>) -> (i32, i32) {
    %c0_i32 = arith.constant 0 : i32
    %c0_i32_0 = arith.constant 0 : i32
    return %arg0, %c0_i32 : i32, i32
  }
}

</mosaic_0001>

<bundles_post_ra>
// kernel: gausconv_forward.1
= control target key start
LH: loop header
LB: loop body
LE: loop exit
PB: predicated region body
PF: predicated region fallthrough
CT: control target
= control target key end

     0   :  { %s4254_s27 = smov [#allocation3]   ;;  %s6880_s0 = inlined_call_operand.vmem [shape: f32[4], index: 0, kind: input, shape index: {}]   ;;  %s6881_s1 = inlined_call_operand.vmem [shape: bf16[256,128], index: 1, kind: input, shape index: {}]   ;;  %s6882_s2 = inlined_call_operand.vmem [shape: bf16[1024,128], index: 2, kind: input, shape index: {}]   ;;  %s6883_s3 = inlined_call_operand.vmem [shape: f32[4,256], index: 3, kind: input, shape index: {}]   ;;  %s6884_s4 = inlined_call_operand.vmem [shape: f32[256,4], index: 4, kind: input, shape index: {}]   ;;  %s6885_s5 = inlined_call_operand.vmem [shape: s8[256,256], index: 5, kind: input, shape index: {}]   ;;  %s6886_s6 = inlined_call_operand.vmem [shape: f32[1,128], index: 6, kind: input, shape index: {}]   ;;  %s6887_s7 = inlined_call_operand.vmem [shape: f32[256,128], index: 7, kind: output, shape index: {}]  }
   0x1   :  { %s13_s26 = sshll.u32 %s6880_s0, 4  ;;  %s14_s26 = int_to_ptr.vmem [resolvable:$true] %s13_s26 }
   0x2   :  { %16 = dma.vmem_to_smem %s14_s26, 16, %s4254_s27, [#allocation2] }
   0x3   :  { %4248 = dma.done.wait [#allocation2], 16 }
   0x4   :  { %4249 = vsyncadd [#allocation2], 4294967280 }
   0x5   :  { %19 = sfence }
   0x6   :  { %s4302_s28 = smov 0  }
   0x7 LB: > { %s3385_s29 = sadd.s32 4294967295, %s4252_s28   ;;  %p3389_p0 = scmp.ge.s32.totalorder %s4252_s28, 1  ;;  %s4252_s28 = sphi %s4302_s28, %s25_s28  }
   0x8   : > { %p245_p1 = scmp.lt.s32.totalorder %s4252_s28, 5 }
   0xa   : > { %p246_p2 = pnand %p3389_p0, %p245_p1 }
   0xc   : > { %249 = sbr.rel (%p246_p2) target bundleno = 914 (0x392), region = 44 }
  0x11   : > { %v4313_v0 = vld [vmem:[%s6882_s2 + $0x38] sm:$0xff]  ;;  %v4337_v4 = vld [vmem:[%s6882_s2 + $0x30] sm:$0xff]  ;;  %v4361_v8 = vld [vmem:[%s6882_s2 + $0x28] sm:$0xff]  ;;  %s3390_s8 = sshll.u32 %s3385_s29, 3  ;;  %v6888_v20 = vmov 1   ;;  %v4256_v22 = vmov 0  }
  0x12   : > { %v4318_v1 = vld [vmem:[%s6882_s2 + $0x78] sm:$0xff]  ;;  %900 = vmatpush.bf16.xpose.msra.mxu0 %v4313_v0  ;;  %v4342_v5 = vld [vmem:[%s6882_s2 + $0x70] sm:$0xff]  ;;  %v4366_v9 = vld [vmem:[%s6882_s2 + $0x68] sm:$0xff]  ;;  %p287_p3 = scmp.lt.s32.totalorder %s3390_s8, 31  ;;  %3758 = vset.pattern.permute.xlu0 %v6888_v20  ;;  %s3394_s9 = sshll.u32 %s3385_s29, 1 }
  0x13   : > { %v4323_v2 = vld [vmem:[%s6882_s2 + $0xb8] sm:$0xff]  ;;  %929 = vmatpush.bf16.xpose.msra.mxu1 %v4318_v1  ;;  %v4347_v6 = vld [vmem:[%s6882_s2 + $0xb0] sm:$0xff]  ;;  %v4371_v10 = vld [vmem:[%s6882_s2 + $0xa8] sm:$0xff]  ;;  %3760 = vset.pattern.permute.xlu2 %v6888_v20  ;;  %p299_p4 = scmp.lt.s32.totalorder %s3394_s9, 7  ;;  %s4913_s29 = sld [smem:[#allocation3]] }
  0x14   : > { %v4328_v3 = vld [vmem:[%s6882_s2 + $0xf8] sm:$0xff]  ;;  %958 = vmatpush.bf16.xpose.msra.mxu2 %v4323_v2  ;;  %v4352_v7 = vld [vmem:[%s6882_s2 + $0xf0] sm:$0xff]  ;;  %v4376_v11 = vld [vmem:[%s6882_s2 + $0xe8] sm:$0xff]  ;;  %s7369_s8 = smov (!%p287_p3, %s3390_s8), 31  ;;  %3759 = vset.pattern.permute.xlu1 %v4256_v22  ;;  %s5096_s14 = sld [smem:[#allocation3 + $0x1]] }
  0x15   : > { %987 = vmatpush.bf16.xpose.msra.mxu3 %v4328_v3  ;;  %v4387_v12 = vld [vmem:[%s6882_s2 + $0x20] sm:$0xff]  ;;  %v4413_v16 = vld [vmem:[%s6882_s2 + $0x18] sm:$0xff]  ;;  %s3393_s21 = sshll.u32 %s7369_s8, 3  ;;  %v4452_v23 = vld [vmem:[%s6882_s2 + $0x10] sm:$0xff]  ;;  %s3391_s13 = sshll.u32 %s7369_s8, 2 }
  0x16   : > { %v4392_v13 = vld [vmem:[%s6882_s2 + $0x60] sm:$0xff]  ;;  %v4418_v17 = vld [vmem:[%s6882_s2 + $0x58] sm:$0xff]  ;;  %s4436_s0 = scalar_lea.vmem %s6884_s4, %s3393_s21  ;;  %v4457_v24 = vld [vmem:[%s6882_s2 + $0x50] sm:$0xff]  ;;  %s4553_s25 = scalar_lea.vmem %s6881_s1, %s3391_s13 }
  0x17   : > { %v4397_v14 = vld [vmem:[%s6882_s2 + $0xa0] sm:$0xff]  ;;  %v4424_v18 = vld [vmem:[%s6882_s2 + $0x98] sm:$0xff]  ;;  %v4463_v25 = vld [vmem:[%s6882_s2 + $0x90] sm:$0xff]  ;;  %s7371_s9 = smov (!%p299_p4, %s3394_s9), 7  ;;  %s6188_s17 = sld [smem:[#allocation3 + $0x2]] }
  0x18   : > { %v4402_v15 = vld [vmem:[%s6882_s2 + $0xe0] sm:$0xff]  ;;  %v4429_v19 = vld [vmem:[%s6882_s2 + $0xd8] sm:$0xff]  ;;  %v4468_v26 = vld [vmem:[%s6882_s2 + $0xd0] sm:$0xff]  ;;  %s3676_s10 = sshll.u32 %s7371_s9, 4 }
  0x19   : > { %v4444_v21 = vld [vmem:[%s4436_s0] sm:$0xff]  ;;  %v4477_v27 = vld [vmem:[%s6882_s2 + $0x8] sm:$0xff]  ;;  %v4504_v32 = vld [vmem:[%s4436_s0 + $0x10] sm:$0xff]  ;;  %s4972_s13 = scalar_lea.vmem %s6885_s5, %s3676_s10 }
  0x1a   : > { %901 = vmatpush.bf16.xpose.msra.mxu0 %v4337_v4  ;;  %1614 = vperm.xlu0 %3758, %v4444_v21   ;;  %v4482_v28 = vld [vmem:[%s6882_s2 + $0x48] sm:$0xff]  ;;  %v4510_v33 = vld [vmem:[%s6882_s2] sm:$0xff]  ;;  %v4531_v37 = vld [vmem:[%s6882_s2 + $0x1b8] sm:$0xff] }
  0x1b   : > { %930 = vmatpush.bf16.xpose.msra.mxu1 %v4342_v5  ;;  %1134 = vperm.xlu1 %3759, %v4444_v21   ;;  %v4487_v29 = vld [vmem:[%s6882_s2 + $0x88] sm:$0xff]  ;;  %v4515_v34 = vld [vmem:[%s6882_s2 + $0x40] sm:$0xff]  ;;  %v4536_v38 = vld [vmem:[%s6882_s2 + $0x1f8] sm:$0xff] }
  0x1c   : > { %959 = vmatpush.bf16.xpose.msra.mxu2 %v4347_v6  ;;  %v4492_v30 = vld [vmem:[%s6882_s2 + $0xc8] sm:$0xff]  ;;  %1622 = vperm.xlu2 %3760, %v4504_v32   ;;  %v4520_v35 = vld [vmem:[%s6882_s2 + $0x80] sm:$0xff]  ;;  %v4541_v39 = vld [vmem:[%s6882_s2 + $0x138] sm:$0xff] }
  0x1d   : > { %988 = vmatpush.bf16.xpose.msra.mxu3 %v4352_v7  ;;  %v4497_v31 = vld [vmem:[%s4436_s0 + $0x8] sm:$0xff]  ;;  %v4525_v36 = vld [vmem:[%s6882_s2 + $0xc0] sm:$0xff]  ;;  %v4546_v40 = vld [vmem:[%s6882_s2 + $0x178] sm:$0xff] }
  0x1e   : > { %v4558_v41 = vld [vmem:[%s4436_s0 + $0x18] sm:$0xff]  ;;  %v4563_v42 = vld [vmem:[%s4553_s25] sm:$0xff]  ;;  %v4574_v43 = vld [vmem:[%s6882_s2 + $0x1b0] sm:$0xff] }
  0x1f   : > { %v4579_v44 = vld [vmem:[%s6882_s2 + $0x1f0] sm:$0xff]  ;;  %v4598_v47 = vld [vmem:[%s4436_s0 + $0x28] sm:$0xff]  ;;  %v4635_v53 = vld [vmem:[%s6882_s2 + $0x1a0] sm:$0xff] }
  0x20   : > { %v4586_v45 = vld [vmem:[%s6882_s2 + $0x130] sm:$0xff]  ;;  %v4608_v48 = vld [vmem:[%s6882_s2 + $0x1a8] sm:$0xff]  ;;  %v4640_v54 = vld [vmem:[%s6882_s2 + $0x1e0] sm:$0xff] }
  0x21   : > { %v4591_v46 = vld [vmem:[%s6882_s2 + $0x170] sm:$0xff]  ;;  %v4613_v49 = vld [vmem:[%s6882_s2 + $0x1e8] sm:$0xff]  ;;  %v4647_v55 = vld [vmem:[%s6882_s2 + $0x120] sm:$0xff] }
  0x22   : > { %902 = vmatpush.bf16.xpose.msra.mxu0 %v4361_v8  ;;  %1618 = vperm.xlu0 %3758, %v4497_v31   ;;  %v4618_v50 = vld [vmem:[%s6882_s2 + $0x128] sm:$0xff]  ;;  %v4652_v56 = vld [vmem:[%s6882_s2 + $0x160] sm:$0xff]  ;;  %v490_v57 = vld [vmem:[%s4436_s0 + $0x30] sm:$0xff] }
  0x23   : > { %931 = vmatpush.bf16.xpose.msra.mxu1 %v4366_v9  ;;  %1139 = vperm.xlu1 %3759, %v4497_v31   ;;  %v4623_v51 = vld [vmem:[%s6882_s2 + $0x168] sm:$0xff]  ;;  %v4660_v58 = vld [vmem:[%s4436_s0 + $0x20] sm:$0xff]  ;;  %v4668_v59 = vld [vmem:[%s6882_s2 + $0x198] sm:$0xff] }
  0x24   : > { %960 = vmatpush.bf16.xpose.msra.mxu2 %v4371_v10  ;;  %1626 = vperm.xlu2 %3760, %v4558_v41   ;;  %v4628_v52 = vld [vmem:[%s4553_s25 + $0x8] sm:$0xff]  ;;  %7081 = vst [vmem:[#allocation5_spill] sm:$0xff] %v4668_v59  ;;  %v4673_v60 = vld [vmem:[%s6882_s2 + $0x1d8] sm:$0xff]  ;;  %v4689_v63 = vld [vmem:[%s4553_s25 + $0x10] sm:$0xff] }
  0x25   : > { %989 = vmatpush.bf16.xpose.msra.mxu3 %v4376_v11  ;;  %7082 = vst [vmem:[#allocation6_spill] sm:$0xff] %v4673_v60  ;;  %v4678_v61 = vld [vmem:[%s6882_s2 + $0x118] sm:$0xff] }
  0x26   : > { %7083 = vst [vmem:[#allocation7_spill] sm:$0xff] %v4678_v61  ;;  %v4683_v62 = vld [vmem:[%s6882_s2 + $0x158] sm:$0xff] }
  0x27   : > { %7084 = vst [vmem:[#allocation8_spill] sm:$0xff] %v4683_v62 }
  0x2a   : > { %903 = vmatpush.bf16.xpose.msra.mxu0 %v4387_v12  ;;  %3761 = vset.pattern.permute.xlu0 %v4256_v22 }
  0x2b   : > { %932 = vmatpush.bf16.xpose.msra.mxu1 %v4392_v13  ;;  %1149 = vperm.xlu1 %3759, %v4558_v41  }
  0x2c   : > { %961 = vmatpush.bf16.xpose.msra.mxu2 %v4397_v14  ;;  %1144 = vperm.xlu0 %3761, %v4504_v32  }
  0x2d   : > { %990 = vmatpush.bf16.xpose.msra.mxu3 %v4402_v15  ;;  %1630 = vperm.xlu2 %3760, %v4660_v58  }
  0x32   : > { %904 = vmatpush.bf16.xpose.msra.mxu0 %v4413_v16 }
  0x33   : > { %933 = vmatpush.bf16.xpose.msra.mxu1 %v4418_v17  ;;  %3762 = vset.pattern.permute.xlu1 %v6888_v20  ;;  %v4703_v20 = vld [vmem:[%s6882_s2 + $0x1d0] sm:$0xff] }
  0x34   : > { %962 = vmatpush.bf16.xpose.msra.mxu2 %v4424_v18  ;;  %1159 = vperm.xlu0 %3761, %v4598_v47   ;;  %7086 = vst [vmem:[#allocation10_spill] sm:$0xff] %v4703_v20 }
  0x35   : > { %991 = vmatpush.bf16.xpose.msra.mxu3 %v4429_v19  ;;  %1634 = vperm.xlu1 %3762, %v4598_v47  }
  0x36   : > { %3763 = vset.pattern.permute.xlu2 %v4256_v22 }
  0x37   : > { %1154 = vperm.xlu2 %3763, %v4660_v58  }
  0x3a   : > { %905 = vmatpush.bf16.xpose.msra.mxu0 %v4452_v23 }
  0x3b   : > { %934 = vmatpush.bf16.xpose.msra.mxu1 %v4457_v24 }
  0x3c   : > { %963 = vmatpush.bf16.xpose.msra.mxu2 %v4463_v25  ;;  %1164 = vperm.xlu0 %3761, %v490_v57  }
  0x3d   : > { %992 = vmatpush.bf16.xpose.msra.mxu3 %v4468_v26  ;;  %1638 = vperm.xlu1 %3762, %v490_v57   ;;  %v4698_v57 = vld [vmem:[%s6882_s2 + $0x190] sm:$0xff] }
  0x3e   : > { %7085 = vst [vmem:[#allocation9_spill] sm:$0xff] %v4698_v57 }
  0x42   : > { %906 = vmatpush.bf16.xpose.msra.mxu0 %v4477_v27 }
  0x43   : > { %935 = vmatpush.bf16.xpose.msra.mxu1 %v4482_v28 }
  0x44   : > { %964 = vmatpush.bf16.xpose.msra.mxu2 %v4487_v29 }
  0x45   : > { %993 = vmatpush.bf16.xpose.msra.mxu3 %v4492_v30  ;;  %3765 = vset.pattern.permute.xlu1 %v4256_v22  ;;  %v4710_v22 = vld [vmem:[%s6882_s2 + $0x110] sm:$0xff] }
  0x46   : > { %7087 = vst [vmem:[#allocation11_spill] sm:$0xff] %v4710_v22 }
  0x4a   : > { %907 = vmatpush.bf16.xpose.msra.mxu0 %v4510_v33 }
  0x4b   : > { %936 = vmatpush.bf16.xpose.msra.mxu1 %v4515_v34 }
  0x4c   : > { %965 = vmatpush.bf16.xpose.msra.mxu2 %v4520_v35 }
  0x4d   : > { %994 = vmatpush.bf16.xpose.msra.mxu3 %v4525_v36 }
  0x51   : > { %908 = vmatmul.bf16.vlgmr.msra.gmra.mxu0 %v4563_v42 }
  0x52   : > { %1016 = vmatpush.bf16.xpose.msrb.mxu0 %v4541_v39  ;;  %937 = vmatmul.bf16.vlgmr.msra.gmra.mxu1 %v4563_v42 }
  0x53   : > { %1045 = vmatpush.bf16.xpose.msrb.mxu1 %v4546_v40  ;;  %966 = vmatmul.bf16.vlgmr.msra.gmra.mxu2 %v4563_v42 }
  0x54   : > { %1074 = vmatpush.bf16.xpose.msrb.mxu2 %v4531_v37  ;;  %995 = vmatmul.bf16.vlgmr.msra.gmra.mxu3 %v4563_v42 }
  0x55   : > { %1103 = vmatpush.bf16.xpose.msrb.mxu3 %v4536_v38 }
  0x5a   : > { %1017 = vmatpush.bf16.xpose.msrb.mxu0 %v4586_v45 }
  0x5b   : > { %1046 = vmatpush.bf16.xpose.msrb.mxu1 %v4591_v46 }
  0x5c   : > { %1075 = vmatpush.bf16.xpose.msrb.mxu2 %v4574_v43 }
  0x5d   : > { %1104 = vmatpush.bf16.xpose.msrb.mxu3 %v4579_v44 }
  0x61   : > { %913 = vmatmul.bf16.gmra.mxu0 %v4628_v52 }
  0x62   : > { %1018 = vmatpush.bf16.xpose.msrb.mxu0 %v4618_v50  ;;  %942 = vmatmul.bf16.gmra.mxu1 %v4628_v52 }
  0x63   : > { %1047 = vmatpush.bf16.xpose.msrb.mxu1 %v4623_v51  ;;  %971 = vmatmul.bf16.gmra.mxu2 %v4628_v52 }
  0x64   : > { %1076 = vmatpush.bf16.xpose.msrb.mxu2 %v4608_v48  ;;  %1000 = vmatmul.bf16.gmra.mxu3 %v4628_v52 }
  0x65   : > { %1105 = vmatpush.bf16.xpose.msrb.mxu3 %v4613_v49 }
  0x6a   : > { %1019 = vmatpush.bf16.xpose.msrb.mxu0 %v4647_v55 }
  0x6b   : > { %1048 = vmatpush.bf16.xpose.msrb.mxu1 %v4652_v56 }
  0x6c   : > { %1077 = vmatpush.bf16.xpose.msrb.mxu2 %v4635_v53 }
  0x6d   : > { %1106 = vmatpush.bf16.xpose.msrb.mxu3 %v4640_v54 }
  0x71   : > { %918 = vmatmul.bf16.gmra.mxu0 %v4689_v63 }
  0x72   : > { %1020 = vmatpush.bf16.xpose.msrb.mxu0 %v4678_v61  ;;  %947 = vmatmul.bf16.gmra.mxu1 %v4689_v63  ;;  %v7089_v61 = vmov 1  }
  0x73   : > { %1049 = vmatpush.bf16.xpose.msrb.mxu1 %v4683_v62  ;;  %v4715_v62 = vld [vmem:[%s6882_s2 + $0x150] sm:$0xff]  ;;  %976 = vmatmul.bf16.gmra.mxu2 %v4689_v63 }
  0x74   : > { %1078 = vmatpush.bf16.xpose.msrb.mxu2 %v4668_v59  ;;  %7088 = vst [vmem:[#allocation12_spill] sm:$0xff] %v4715_v62  ;;  %1005 = vmatmul.bf16.gmra.mxu3 %v4689_v63  ;;  %v4732_v59 = vld [vmem:[%s6882_s2 + $0x1c8] sm:$0xff] }
  0x75   : > { %1107 = vmatpush.bf16.xpose.msrb.mxu3 %v4673_v60  ;;  %3764 = vset.pattern.permute.xlu2 %v7089_v61  ;;  %v4727_v60 = vld [vmem:[%s6882_s2 + $0x188] sm:$0xff]  ;;  %v4747_v61 = vld [vmem:[%s4553_s25 + $0x18] sm:$0xff]  ;;  %s6863_s25 = scalar_lea.vmem %s6887_s7, %s3393_s21 }
  0x7a   : > { %1021 = vmatpush.bf16.xpose.msrb.mxu0 %v4710_v22  ;;  %v4754_v22 = vld [vmem:[%s6882_s2 + $0x180] sm:$0xff] }
  0x7b   : > { %1050 = vmatpush.bf16.xpose.msrb.mxu1 %v4715_v62  ;;  %v4742_v62 = vld [vmem:[%s6882_s2 + $0x148] sm:$0xff] }
  0x7c   : > { %1079 = vmatpush.bf16.xpose.msrb.mxu2 %v4698_v57  ;;  %7091 = vst [vmem:[#allocation14_spill] sm:$0xff] %v4742_v62  ;;  %v4759_v57 = vld [vmem:[%s6882_s2 + $0x1c0] sm:$0xff] }
  0x7d   : > { %1108 = vmatpush.bf16.xpose.msrb.mxu3 %v4703_v20  ;;  %v4737_v20 = vld [vmem:[%s6882_s2 + $0x108] sm:$0xff] }
  0x7e   : > { %7090 = vst [vmem:[#allocation13_spill] sm:$0xff] %v4737_v20 }
  0x81   : > { %923 = vmatmul.bf16.gmra.mxu0 %v4747_v61 }
  0x82   : > { %1022 = vmatpush.bf16.xpose.msrb.mxu0 %v4737_v20  ;;  %952 = vmatmul.bf16.gmra.mxu1 %v4747_v61  ;;  %v4766_v20 = vld [vmem:[%s6882_s2 + $0x100] sm:$0xff] }
  0x83   : > { %1051 = vmatpush.bf16.xpose.msrb.mxu1 %v4742_v62  ;;  %v4771_v62 = vld [vmem:[%s6882_s2 + $0x140] sm:$0xff]  ;;  %981 = vmatmul.bf16.gmra.mxu2 %v4747_v61 }
  0x84   : > { %1080 = vmatpush.bf16.xpose.msrb.mxu2 %v4727_v60  ;;  %1010 = vmatmul.bf16.gmra.mxu3 %v4747_v61 }
  0x85   : > { %1109 = vmatpush.bf16.xpose.msrb.mxu3 %v4732_v59 }
  0x8a   : > { %1023 = vmatpush.bf16.xpose.msrb.mxu0 %v4766_v20 }
  0x8b   : > { %1052 = vmatpush.bf16.xpose.msrb.mxu1 %v4771_v62 }
  0x8c   : > { %1081 = vmatpush.bf16.xpose.msrb.mxu2 %v4754_v22 }
  0x8d   : > { %1110 = vmatpush.bf16.xpose.msrb.mxu3 %v4759_v57 }
  0x91   : > { %1024 = vmatmul.bf16.vlgmr.msrb.gmra.mxu0 %v4563_v42 }
  0x92   : > { %3065 = vmatpush.bf16.msra.mxu0 %v4313_v0  ;;  %1053 = vmatmul.bf16.vlgmr.msrb.gmra.mxu1 %v4563_v42  ;;  %v491_v0 = vld [vmem:[%s4436_s0 + $0x38] sm:$0xff] }
  0x93   : > { %3094 = vmatpush.bf16.msra.mxu1 %v4318_v1  ;;  %1082 = vmatmul.bf16.vlgmr.msrb.gmra.mxu2 %v4563_v42  ;;  %v6899_v1 = vmov 2  }
  0x94   : > { %3123 = vmatpush.bf16.msra.mxu2 %v4323_v2  ;;  %1111 = vmatmul.bf16.vlgmr.msrb.gmra.mxu3 %v4563_v42  ;;  %v4258_v2 = vmov 3  }
  0x95   : > { %3152 = vmatpush.bf16.msra.mxu3 %v4328_v3  ;;  %1169 = vperm.xlu1 %3765, %v491_v0   ;;  %v1615_v3 = vpop.permute.xlu0 %1614 }
  0x96   : > { %3066 = vmatpush.bf16.msra.mxu0 %v4337_v4  ;;  %1642 = vperm.xlu2 %3764, %v491_v0   ;;  %v7092_v4 = vld [vmem:[#allocation5_spill] sm:$0xff] }
  0x97   : > { %3095 = vmatpush.bf16.msra.mxu1 %v4342_v5  ;;  %3771 = vset.pattern.permute.xlu0 %v6899_v1  ;;  %v7093_v5 = vld [vmem:[#allocation6_spill] sm:$0xff] }
  0x98   : > { %3124 = vmatpush.bf16.msra.mxu2 %v4347_v6  ;;  %2094 = vperm.xlu0 %3771, %v4504_v32   ;;  %v7094_v6 = vld [vmem:[#allocation7_spill] sm:$0xff] }
  0x99   : > { %3153 = vmatpush.bf16.msra.mxu3 %v4352_v7  ;;  %v7095_v7 = vld [vmem:[#allocation8_spill] sm:$0xff] }
  0x9a   : > { %3067 = vmatpush.bf16.msra.mxu0 %v4361_v8  ;;  %v7096_v8 = vld [vmem:[#allocation9_spill] sm:$0xff] }
  0x9b   : > { %3096 = vmatpush.bf16.msra.mxu1 %v4366_v9  ;;  %v7097_v9 = vld [vmem:[#allocation10_spill] sm:$0xff] }
  0x9c   : > { %3125 = vmatpush.bf16.msra.mxu2 %v4371_v10  ;;  %v4874_v10 = vld [vmem:[%s6883_s3] sm:$0xff] }
  0x9d   : > { %3154 = vmatpush.bf16.msra.mxu3 %v4376_v11  ;;  %3767 = vset.pattern.permute.xlu1 %v6899_v1  ;;  %v1619_v11 = vpop.permute.xlu0 %1618 }
  0x9e   : > { %3068 = vmatpush.bf16.msra.mxu0 %v4387_v12  ;;  %3766 = vset.pattern.permute.xlu2 %v4258_v2  ;;  %v1135_v12 = vpop.permute.xlu1 %1134 }
  0x9f   : > { %3097 = vmatpush.bf16.msra.mxu1 %v4392_v13  ;;  %2086 = vperm.xlu1 %3767, %v4444_v21   ;;  %v7098_v13 = vld [vmem:[#allocation11_spill] sm:$0xff] }
  0xa0   : > { %3126 = vmatpush.bf16.msra.mxu2 %v4397_v14  ;;  %2558 = vperm.xlu2 %3766, %v4444_v21   ;;  %v1173_v14 = vperm.slane %v4874_v10, 0 }
  0xa1   : > { %3155 = vmatpush.bf16.msra.mxu3 %v4402_v15  ;;  %2102 = vperm.xlu0 %3771, %v4660_v58   ;;  %v1174_v15 = vperm.slane %v4874_v10, 4 }
  0xa2   : > { %3069 = vmatpush.bf16.msra.mxu0 %v4413_v16  ;;  %1058 = vmatmul.bf16.gmra.mxu1 %v4628_v52  ;;  %v7099_v16 = vld [vmem:[#allocation12_spill] sm:$0xff] }
  0xa3   : > { %3098 = vmatpush.bf16.msra.mxu1 %v4418_v17  ;;  %1029 = vmatmul.bf16.gmra.mxu0 %v4628_v52  ;;  %v1623_v17 = vpop.permute.xlu2 %1622  ;;  %v4890_v21 = vperm.slane %v1174_v15, 0 }
  0xa4   : > { %3127 = vmatpush.bf16.msra.mxu2 %v4424_v18  ;;  %1116 = vmatmul.bf16.gmra.mxu3 %v4628_v52  ;;  %v7100_v18 = vld [vmem:[#allocation13_spill] sm:$0xff] }
  0xa5   : > { %3156 = vmatpush.bf16.msra.mxu3 %v4429_v19  ;;  %1087 = vmatmul.bf16.gmra.mxu2 %v4628_v52  ;;  %v4888_v19 = vperm.slane %v1173_v14, 0  ;;  %7102 = vst [vmem:[#allocation6_spill] sm:$0xff] %v4890_v21 }
  0xa6   : > { %3070 = vmatpush.bf16.msra.mxu0 %v4452_v23  ;;  %v7103_v23 = vld [vmem:[#allocation14_spill] sm:$0xff] }
  0xa7   : > { %3099 = vmatpush.bf16.msra.mxu1 %v4457_v24  ;;  %3769 = vset.pattern.permute.xlu1 %v4258_v2  ;;  %7101 = vst [vmem:[#allocation5_spill] sm:$0xff] %v4888_v19  ;;  %v1645_v24 = vperm.slane %v4874_v10, 1 }
  0xa8   : > { %3128 = vmatpush.bf16.msra.mxu2 %v4463_v25  ;;  %3768 = vset.pattern.permute.xlu2 %v6899_v1  ;;  %v1646_v25 = vperm.slane %v4874_v10, 5 }
  0xa9   : > { %3157 = vmatpush.bf16.msra.mxu3 %v4468_v26  ;;  %2566 = vperm.xlu1 %3769, %v4504_v32   ;;  %v1145_v26 = vpop.permute.xlu0 %1144 }
  0xaa   : > { %3071 = vmatpush.bf16.msra.mxu0 %v4477_v27  ;;  %2090 = vperm.xlu2 %3768, %v4497_v31   ;;  %v1179_v27 = vadd.f32 %v4888_v19, %v1135_v12  ;;  %v4941_v0 = vadd.f32 %v4890_v21, %v1145_v26 }
  0xab   : > { %3100 = vmatpush.bf16.msra.mxu1 %v4482_v28  ;;  %3774 = vset.pattern.permute.xlu0 %v4258_v2  ;;  %v1180_v28 = vadd.f32 %v4890_v21, %v1135_v12 }
  0xac   : > { %3129 = vmatpush.bf16.msra.mxu2 %v4487_v29  ;;  %2562 = vperm.xlu0 %3774, %v4497_v31   ;;  %v1140_v29 = vpop.permute.xlu1 %1139 }
  0xad   : > { %3158 = vmatpush.bf16.msra.mxu3 %v4492_v30 }
  0xae   : > { %3072 = vmatpush.bf16.msra.mxu0 %v4510_v33 }
  0xaf   : > { %3101 = vmatpush.bf16.msra.mxu1 %v4515_v34  ;;  %v4899_v34 = vperm.slane %v1645_v24, 1  ;;  %v4975_v24 = vstv %s4913_s29 }
  0xb0   : > { %3130 = vmatpush.bf16.msra.mxu2 %v4520_v35  ;;  %v4901_v35 = vperm.slane %v1646_v25, 1  ;;  %7104 = vst [vmem:[#allocation7_spill] sm:$0xff] %v4975_v24 }
  0xb1   : > { %3159 = vmatpush.bf16.msra.mxu3 %v4525_v36  ;;  %3772 = vset.pattern.permute.xlu1 %v6899_v1  ;;  %v1160_v42 = vpop.permute.xlu0 %1159 }
  0xb2   : > { %3181 = vmatpush.bf16.msrb.mxu0 %v4541_v39  ;;  %3770 = vset.pattern.permute.xlu2 %v4258_v2 }
  0xb3   : > { %3210 = vmatpush.bf16.msrb.mxu1 %v4546_v40  ;;  %2098 = vperm.xlu1 %3772, %v4558_v41   ;;  %v1651_v40 = vadd.f32 %v4899_v34, %v1615_v3 }
  0xb4   : > { %3239 = vmatpush.bf16.msrb.mxu2 %v4531_v37  ;;  %2570 = vperm.xlu2 %3770, %v4558_v41   ;;  %v1652_v41 = vadd.f32 %v4901_v35, %v1615_v3 }
  0xb5   : > { %3268 = vmatpush.bf16.msrb.mxu3 %v4536_v38  ;;  %1034 = vmatmul.bf16.gmra.mxu0 %v4689_v63 }
  0xb6   : > { %3182 = vmatpush.bf16.msrb.mxu0 %v4586_v45  ;;  %1063 = vmatmul.bf16.gmra.mxu1 %v4689_v63 }
  0xb7   : > { %3211 = vmatpush.bf16.msrb.mxu1 %v4591_v46  ;;  %1092 = vmatmul.bf16.gmra.mxu2 %v4689_v63 }
  0xb8   : > { %3240 = vmatpush.bf16.msrb.mxu2 %v4574_v43  ;;  %1121 = vmatmul.bf16.gmra.mxu3 %v4689_v63  ;;  %v4934_v63 = vadd.f32 %v4888_v19, %v1145_v26 }
  0xb9   : > { %3269 = vmatpush.bf16.msrb.mxu3 %v4579_v44  ;;  %v1165_v26 = vpop.permute.xlu0 %1164 }
  0xba   : > { %3183 = vmatpush.bf16.msrb.mxu0 %v4618_v50 }
  0xbb   : > { %3212 = vmatpush.bf16.msrb.mxu1 %v4623_v51  ;;  %3773 = vset.pattern.permute.xlu1 %v4258_v2  ;;  %v1181_v51 = vadd.f32 %v4888_v19, %v1140_v29 }
  0xbc   : > { %3241 = vmatpush.bf16.msrb.mxu2 %v4608_v48  ;;  %2574 = vperm.xlu2 %3770, %v4660_v58  }
  0xbd   : > { %3270 = vmatpush.bf16.msrb.mxu3 %v4613_v49  ;;  %2578 = vperm.xlu1 %3773, %v4598_v47  }
  0xbe   : > { %3184 = vmatpush.bf16.msrb.mxu0 %v4647_v55  ;;  %v4920_v55 = vadd.f32 %v4899_v34, %v1619_v11 }
  0xbf   : > { %3213 = vmatpush.bf16.msrb.mxu1 %v4652_v56  ;;  %v4923_v56 = vadd.f32 %v4901_v35, %v1619_v11 }
  0xc0   : > { %3242 = vmatpush.bf16.msrb.mxu2 %v4635_v53  ;;  %v1150_v53 = vpop.permute.xlu1 %1149 }
  0xc1   : > { %3271 = vmatpush.bf16.msrb.mxu3 %v4640_v54  ;;  %v1182_v54 = vadd.f32 %v4890_v21, %v1140_v29  ;;  %v4947_v3 = vadd.f32 %v4890_v21, %v1150_v53 }
  0xc2   : > { %3185 = vmatpush.bf16.msrb.mxu0 %v7094_v6 }
  0xc3   : > { %3214 = vmatpush.bf16.msrb.mxu1 %v7095_v7 }
  0xc4   : > { %3243 = vmatpush.bf16.msrb.mxu2 %v7092_v4  ;;  %3775 = vset.pattern.permute.xlu2 %v6899_v1 }
  0xc5   : > { %3272 = vmatpush.bf16.msrb.mxu3 %v7093_v5  ;;  %2106 = vperm.xlu2 %3775, %v4598_v47  }
  0xc6   : > { %3777 = vset.pattern.permute.xlu1 %v6899_v1  ;;  %1039 = vmatmul.bf16.gmra.mxu0 %v4747_v61 }
  0xc7   : > { %1068 = vmatmul.bf16.gmra.mxu1 %v4747_v61  ;;  %1097 = vmatmul.bf16.gmra.mxu2 %v4747_v61 }
  0xc8   : > { %3244 = vmatpush.bf16.msrb.mxu2 %v7096_v8  ;;  %1126 = vmatmul.bf16.gmra.mxu3 %v4747_v61 }
  0xc9   : > { %3273 = vmatpush.bf16.msrb.mxu3 %v7097_v9  ;;  %3186 = vmatpush.bf16.msrb.mxu0 %v7098_v13 }
  0xca   : > { %3215 = vmatpush.bf16.msrb.mxu1 %v7099_v16 }
  0xcc   : > { %3245 = vmatpush.bf16.msrb.mxu2 %v4727_v60  ;;  %v4929_v60 = vadd.f32 %v4901_v35, %v1623_v17 }
  0xcd   : > { %3274 = vmatpush.bf16.msrb.mxu3 %v4732_v59  ;;  %3776 = vset.pattern.permute.xlu2 %v4258_v2  ;;  %v4926_v59 = vadd.f32 %v4899_v34, %v1623_v17  ;;  %v4944_v2 = vadd.f32 %v4888_v19, %v1150_v53 }
  0xce   : > { %3187 = vmatpush.bf16.msrb.mxu0 %v7100_v18  ;;  %3216 = vmatpush.bf16.msrb.mxu1 %v7103_v23  ;;  %v909_v30 = vpop.f32.mrf.mxu0 }
  0xcf   : > { %v938_v31 = vpop.f32.mrf.mxu1  ;;  %v1195_v32 = vmul.f32 2.0, %v909_v30 }
  0xd0   : > { %3246 = vmatpush.bf16.msrb.mxu2 %v4754_v22  ;;  %v1196_v33 = vmul.f32 2.0, %v938_v31  ;;  %v4983_v31 = vadd.f32 %v4888_v19, %v1160_v42 }
  0xd1   : > { %3275 = vmatpush.bf16.msrb.mxu3 %v4759_v57  ;;  %v1211_v36 = vsub.f32 %v1179_v27, %v1195_v32 }
  0xd2   : > { %3188 = vmatpush.bf16.msrb.mxu0 %v4766_v20  ;;  %3217 = vmatpush.bf16.msrb.mxu1 %v4771_v62  ;;  %v1627_v20 = vpop.permute.xlu2 %1626  ;;  %v1212_v37 = vsub.f32 %v1180_v28, %v1196_v33 }
  0xd3   : > { %v4905_v38 = vmax.f32 %v1211_v36, 0.0  ;;  %v4956_v7 = vadd.f32 %v4899_v34, %v1627_v20  ;;  %v4961_v11 = vadd.f32 %v4901_v35, %v1627_v20  ;;  %v4990_v36 = vadd.f32 %v4890_v21, %v1160_v42 }
  0xd4   : > { %v4907_v39 = vmax.f32 %v1212_v37, 0.0  ;;  %v4993_v37 = vld [vmem:[%s4972_s13] sm:$0xff] }
  0xd5   : > { %3780 = vrsqrt.f32 %v4905_v38  ;;  %v1253_v27 = vand.u32 2147483648, %v4905_v38  ;;  %vm1250_vm0 = vcmp.eq.f32.partialorder %v4905_v38, inf  ;;  %vm1252_vm1 = vcmp.eq.f32.partialorder %v4905_v38, 0.0 }
  0xd6   : > { %v967_v43 = vpop.f32.mrf.mxu2  ;;  %3782 = vrsqrt.f32 %v4907_v39  ;;  %v911_v47 = vpop.f32.mrf.mxu0  ;;  %v1265_v28 = vand.u32 2147483648, %v4907_v39  ;;  %vm1262_vm2 = vcmp.eq.f32.partialorder %v4907_v39, inf  ;;  %vm1264_vm3 = vcmp.eq.f32.partialorder %v4907_v39, 0.0 }
  0xd7   : > { %v996_v44 = vpop.f32.mrf.mxu3  ;;  %v1667_v45 = vmul.f32 2.0, %v967_v43  ;;  %v940_v48 = vpop.f32.mrf.mxu1  ;;  %v1197_v52 = vmul.f32 2.0, %v911_v47 }
  0xd8   : > { %v1668_v46 = vmul.f32 2.0, %v996_v44  ;;  %v1198_v58 = vmul.f32 2.0, %v940_v48  ;;  %v5000_v44 = vadd.f32 %v4888_v19, %v1165_v26  ;;  %v5010_v48 = vld [vmem:[%s4972_s13 + $0x8] sm:$0xff] }
  0xd9   : > { %v1683_v49 = vsub.f32 %v1651_v40, %v1667_v45  ;;  %v1213_v6 = vsub.f32 %v1181_v51, %v1197_v52  ;;  %v5003_v45 = vadd.f32 %v4890_v21, %v1165_v26  ;;  %v451_v52 = vunpack.c.0.s8 %v4993_v37 }
  0xda   : > { %v1684_v50 = vsub.f32 %v1652_v41, %v1668_v46  ;;  %v1631_v57 = vpop.permute.xlu2 %1630  ;;  %v1214_v9 = vsub.f32 %v1182_v54, %v1198_v58 }
  0xdb   : > { %v4931_v62 = vmax.f32 %v1683_v49, 0.0  ;;  %v4936_v22 = vpop.eup %3780  ;;  %v4964_v14 = vadd.f32 %v4899_v34, %v1631_v57  ;;  %v4967_v23 = vadd.f32 %v4901_v35, %v1631_v57  ;;  %v4980_v29 = vmax.f32 %v1213_v6, 0.0 }
  0xdc   : > { %v4938_v61 = vmax.f32 %v1684_v50, 0.0  ;;  %v4950_v4 = vpop.eup %3782  ;;  %v1244_v5 = vmul.f32 %v4936_v22, %v4905_v38  ;;  %v4986_v33 = vmax.f32 %v1214_v9, 0.0 }
  0xdd   : > { %3784 = vrsqrt.f32 %v4931_v62  ;;  %v1256_v8 = vmul.f32 %v4950_v4, %v4907_v39  ;;  %v1725_v50 = vand.u32 2147483648, %v4931_v62  ;;  %vm1722_vm4 = vcmp.eq.f32.partialorder %v4931_v62, inf }
  0xde   : > { %v969_v12 = vpop.f32.mrf.mxu2  ;;  %v914_v17 = vpop.f32.mrf.mxu0  ;;  %3786 = vrsqrt.f32 %v4938_v61  ;;  %v1245_v32 = vmul.f32 %v4936_v22, %v1244_v5  ;;  %vm1724_vm5 = vcmp.eq.f32.partialorder %v4931_v62, 0.0  ;;  %vm1734_vm6 = vcmp.eq.f32.partialorder %v4938_v61, inf }
  0xdf   : > { %v998_v13 = vpop.f32.mrf.mxu3  ;;  %v1669_v15 = vmul.f32 2.0, %v969_v12  ;;  %v943_v18 = vpop.f32.mrf.mxu1  ;;  %v1199_v25 = vmul.f32 2.0, %v914_v17  ;;  %v1257_v40 = vmul.f32 %v4950_v4, %v1256_v8  ;;  %3788 = vrsqrt.f32 %v4980_v29 }
  0xe0   : > { %v1670_v16 = vmul.f32 2.0, %v998_v13  ;;  %v1200_v30 = vmul.f32 2.0, %v943_v18  ;;  %v1246_v46 = vmul.f32 0.5, %v1245_v32  ;;  %3790 = vrsqrt.f32 %v4986_v33 }
  0xe1   : > { %v1685_v20 = vsub.f32 %v4920_v55, %v1669_v15  ;;  %v1215_v47 = vsub.f32 %v4934_v63, %v1199_v25  ;;  %v1258_v49 = vmul.f32 0.5, %v1257_v40  ;;  %v452_v12 = vunpack.c.0.s8 %v5010_v48 }
  0xe2   : > { %v1686_v43 = vsub.f32 %v4923_v56, %v1670_v16  ;;  %v1216_v51 = vsub.f32 %v4941_v0, %v1200_v30  ;;  %v1247_v53 = vsub.f32 1.5, %v1246_v46  ;;  %vm1736_vm7 = vcmp.eq.f32.partialorder %v4938_v61, 0.0 }
  0xe3   : > { %v4996_v41 = vpop.eup %3784  ;;  %v5022_v55 = vmax.f32 %v1685_v20, 0.0  ;;  %v1259_v63 = vsub.f32 1.5, %v1258_v49  ;;  %v5028_v13 = vmax.f32 %v1215_v47, 0.0  ;;  %vm1274_vm12 = vcmp.eq.f32.partialorder %v4980_v29, inf }
  0xe4   : > { %v1716_v42 = vmul.f32 %v4996_v41, %v4931_v62  ;;  %v5019_v54 = vpop.eup %3786  ;;  %v5025_v5 = vmax.f32 %v1686_v43, 0.0  ;;  %v1248_v17 = vmul.f32 %v4936_v22, %v1247_v53  ;;  %v5033_v25 = vmax.f32 %v1216_v51, 0.0 }
  0xe5   : > { %7105 = vst [vmem:[#allocation8_spill] sm:$0xff] %v5028_v13  ;;  %v1728_v18 = vmul.f32 %v5019_v54, %v4938_v61  ;;  %v1260_v30 = vmul.f32 %v4950_v4, %v1259_v63  ;;  %3792 = vrsqrt.f32 %v5022_v55  ;;  %v5040_v43 = vpop.eup %3788  ;;  %vm1746_vm8 = vcmp.eq.f32.partialorder %v5022_v55, inf }
  0xe6   : > { %v972_v56 = vpop.f32.mrf.mxu2  ;;  %v1717_v57 = vmul.f32 %v4996_v41, %v1716_v42  ;;  %v916_v8 = vpop.f32.mrf.mxu0  ;;  %7106 = vst [vmem:[#allocation9_spill] sm:$0xff] %v5033_v25  ;;  %v1249_v20 = vmul.f32 %v1248_v17, %v4905_v38  ;;  %3794 = vrsqrt.f32 %v5025_v5  ;;  %vm1748_vm9 = vcmp.eq.f32.partialorder %v5022_v55, 0.0 }
  0xe7   : > { %v1001_v58 = vpop.f32.mrf.mxu3  ;;  %v1671_v6 = vmul.f32 2.0, %v972_v56  ;;  %v945_v9 = vpop.f32.mrf.mxu1  ;;  %v1201_v15 = vmul.f32 2.0, %v916_v8  ;;  %v1261_v42 = vmul.f32 %v1260_v30, %v4907_v39  ;;  %3796 = vrsqrt.f32 %v5028_v13 }
  0xe8   : > { %v1672_v0 = vmul.f32 2.0, %v1001_v58  ;;  %v1202_v16 = vmul.f32 2.0, %v945_v9  ;;  %v1718_v40 = vmul.f32 0.5, %v1717_v57  ;;  %v1251_v47 = vsel %vm1250_vm0, %v4905_v38, %v1249_v20 }
  0xe9   : > { %v1687_v26 = vsub.f32 %v4926_v59, %v1671_v6  ;;  %v1217_v22 = vsub.f32 %v4944_v2, %v1201_v15  ;;  %v5046_v59 = vpop.eup %3790  ;;  %3798 = vrsqrt.f32 %v5033_v25  ;;  %v1254_v2 = vsel %vm1252_vm1, %v1253_v27, %v1251_v47 }
  0xea   : > { %v1688_v32 = vsub.f32 %v4929_v60, %v1672_v0  ;;  %v1218_v46 = vsub.f32 %v4947_v3, %v1202_v16  ;;  %v5051_v60 = vcvt.s32.f32 %v451_v52  ;;  %v1263_v3 = vsel %vm1262_vm2, %v4907_v39, %v1261_v42 }
  0xeb   : > { %v5049_v4 = vmax.f32 %v1687_v26, 0.0  ;;  %v1729_v49 = vmul.f32 %v5019_v54, %v1728_v18  ;;  %v1266_v56 = vsel %vm1264_vm3, %v1265_v28, %v1263_v3  ;;  %v1435_v58 = vsub.f32 0.0, %v1254_v2  ;;  %v5077_v9 = vpop.eup %3792  ;;  %v1155_v28 = vpop.permute.xlu2 %1154 }
  0xec   : > { %7107 = vst [vmem:[#allocation10_spill] sm:$0xff] %v5051_v60  ;;  %v5066_v51 = vmax.f32 %v1688_v32, 0.0  ;;  %v1719_v38 = vsub.f32 1.5, %v1718_v40  ;;  %v5072_v27 = vmax.f32 %v1217_v22, 0.0  ;;  %v5074_v63 = vmax.f32 %v1218_v46, 0.0  ;;  %v5080_v17 = vpop.eup %3794 }
  0xed   : > { %3800 = vrsqrt.f32 %v5049_v4  ;;  %v1436_v39 = vsub.f32 0.0, %v1266_v56  ;;  %v1453_v30 = vmul.f32 %v4975_v24, %v1435_v58  ;;  %v1187_v32 = vadd.f32 %v4888_v19, %v1155_v28  ;;  %v5086_v20 = vpop.eup %3796 }
  0xee   : > { %v974_v52 = vpop.f32.mrf.mxu2  ;;  %7108 = vst [vmem:[#allocation11_spill] sm:$0xff] %v5072_v27  ;;  %v919_v0 = vpop.f32.mrf.mxu0  ;;  %v1188_v22 = vadd.f32 %v4890_v21, %v1155_v28  ;;  %v1720_v46 = vmul.f32 %v4996_v41, %v1719_v38  ;;  %v1730_v42 = vmul.f32 0.5, %v1729_v49  ;;  %3802 = vrsqrt.f32 %v5066_v51 }
  0xef   : > { %v1003_v53 = vpop.f32.mrf.mxu3  ;;  %7109 = vst [vmem:[#allocation12_spill] sm:$0xff] %v5074_v63  ;;  %v1673_v57 = vmul.f32 2.0, %v974_v52  ;;  %v948_v8 = vpop.f32.mrf.mxu1  ;;  %v1203_v15 = vmul.f32 2.0, %v919_v0  ;;  %v1454_v40 = vmul.f32 %v4975_v24, %v1436_v39  ;;  %3804 = vrsqrt.f32 %v5072_v27 }
  0xf0   : > { %v1674_v6 = vmul.f32 2.0, %v1003_v53  ;;  %v1204_v16 = vmul.f32 2.0, %v948_v8  ;;  %v5091_v47 = vpop.eup %3798  ;;  %v1721_v53 = vmul.f32 %v1720_v46, %v4931_v62  ;;  %3806 = vrsqrt.f32 %v5074_v63 }
  0xf1   : > { %v1689_v18 = vsub.f32 %v4956_v7, %v1673_v57  ;;  %v1219_v2 = vsub.f32 %v1187_v32, %v1203_v15  ;;  %v1471_v3 = vmul.f32 1.442695, %v1454_v40  ;;  %v5106_v49 = vcvt.s32.f32 %v452_v12 }
  0xf2   : > { %v1690_v26 = vsub.f32 %v4961_v11, %v1674_v6  ;;  %v1469_v11 = vmul.f32 1.442695, %v1453_v30  ;;  %v1220_v52 = vsub.f32 %v1188_v22, %v1204_v16  ;;  %v1731_v56 = vsub.f32 1.5, %v1730_v42 }
  0xf3   : > { %v5094_v7 = vmax.f32 %v1689_v18, 0.0  ;;  %7110 = vst [vmem:[#allocation13_spill] sm:$0xff] %v5106_v49  ;;  %v5108_v58 = vpop.eup %3800  ;;  %v5111_v6 = vmax.f32 %v1219_v2, 0.0  ;;  %v1723_v0 = vsel %vm1722_vm4, %v4931_v62, %v1721_v53  ;;  %v1737_v8 = vand.u32 2147483648, %v4938_v61 }
  0xf4   : > { %v5102_v41 = vmax.f32 %v1690_v26, 0.0  ;;  %v5117_v28 = vmax.f32 %v1220_v52, 0.0  ;;  %v1726_v30 = vsel %vm1724_vm5, %v1725_v50, %v1723_v0  ;;  %v5123_v32 = vpop.eup %3802  ;;  %v1732_v46 = vmul.f32 %v5019_v54, %v1731_v56 }
  0xf5   : > { %3808 = vrsqrt.f32 %v5094_v7  ;;  %7111 = vst [vmem:[#allocation14_spill] sm:$0xff] %v5111_v6  ;;  %v5129_v42 = vpop.eup %3804  ;;  %v1907_v62 = vsub.f32 0.0, %v1726_v30  ;;  %vm1758_vm10 = vcmp.eq.f32.partialorder %v5025_v5, inf  ;;  %vm1760_vm11 = vcmp.eq.f32.partialorder %v5025_v5, 0.0 }
  0xf6   : > { %v977_v38 = vpop.f32.mrf.mxu2  ;;  %v921_v39 = vpop.f32.mrf.mxu0  ;;  %3810 = vpow2.f32 %v1469_v11  ;;  %7112 = vst [vmem:[#allocation15_spill] sm:$0xff] %v5117_v28  ;;  %vm1276_vm13 = vcmp.eq.f32.partialorder %v4980_v29, 0.0  ;;  %vm1286_vm14 = vcmp.eq.f32.partialorder %v4986_v33, inf  ;;  %vm1288_vm15 = vcmp.eq.f32.partialorder %v4986_v33, 0.0 }
  0xf7   : > { %v1006_v57 = vpop.f32.mrf.mxu3  ;;  %v1675_v15 = vmul.f32 2.0, %v977_v38  ;;  %v950_v12 = vpop.f32.mrf.mxu1  ;;  %v1205_v18 = vmul.f32 2.0, %v921_v39  ;;  %3812 = vpow2.f32 %v1471_v3  ;;  %v5154_v38 = vmul.f32 %v5040_v43, %v4980_v29 }
  0xf8   : > { %v1676_v16 = vmul.f32 2.0, %v1006_v57  ;;  %v1206_v26 = vmul.f32 2.0, %v950_v12  ;;  %3814 = vrsqrt.f32 %v5102_v41  ;;  %v5134_v50 = vpop.eup %3806  ;;  %vm1770_vm0 = vcmp.eq.f32.partialorder %v5049_v4, inf }
  0xf9   : > { %v1691_v40 = vsub.f32 %v4964_v14, %v1675_v15  ;;  %v1221_v11 = vsub.f32 %v4983_v31, %v1205_v18  ;;  %3816 = vrsqrt.f32 %v5111_v6  ;;  %7113 = vst [vmem:[#allocation16_spill] sm:$0xff] %v5134_v50  ;;  %v1733_v14 = vmul.f32 %v1732_v46, %v4938_v61  ;;  %v1635_v18 = vpop.permute.xlu1 %1634 }
  0xfa   : > { %v1692_v22 = vsub.f32 %v4967_v23, %v1676_v16  ;;  %v1222_v2 = vsub.f32 %v4990_v36, %v1206_v26  ;;  %v5142_v23 = vstv %s5096_s14  ;;  %3818 = vrsqrt.f32 %v5117_v28 }
  0xfb   : > { %v5136_v3 = vmax.f32 %v1691_v40, 0.0  ;;  %v5144_v54 = vpop.eup %3808  ;;  %v5146_v53 = vmax.f32 %v1221_v11, 0.0  ;;  %v1925_v36 = vmul.f32 %v5142_v23, %v1907_v62  ;;  %v1735_v57 = vsel %vm1734_vm6, %v4938_v61, %v1733_v14 }
  0xfc   : > { %v5138_v52 = vmax.f32 %v1692_v22, 0.0  ;;  %v5148_v31 = vmax.f32 %v1222_v2, 0.0  ;;  %v3811_v56 = vpop.eup %3810  ;;  %v5163_v15 = vmul.f32 %v5046_v59, %v4986_v33  ;;  %v1738_v12 = vsel %vm1736_vm7, %v1737_v8, %v1735_v57 }
  0xfd   : > { %7114 = vst [vmem:[#allocation17_spill] sm:$0xff] %v5136_v3  ;;  %3820 = vrsqrt.f32 %v5136_v3  ;;  %v3813_v0 = vpop.eup %3812  ;;  %v1501_v39 = vmul.f32 1.442695, %v3811_v56  ;;  %v1941_v46 = vmul.f32 1.442695, %v1925_v36  ;;  %v1661_v61 = vadd.f32 %v4899_v34, %v1635_v18 }
  0xfe   : > { %7115 = vst [vmem:[#allocation18_spill] sm:$0xff] %v5138_v52  ;;  %3822 = vrsqrt.f32 %v5138_v52  ;;  %v979_v16 = vpop.f32.mrf.mxu2  ;;  %v5166_v26 = vpop.eup %3814  ;;  %v1503_v22 = vmul.f32 1.442695, %v3813_v0  ;;  %v1908_v57 = vsub.f32 0.0, %v1738_v12  ;;  %v1662_v1 = vadd.f32 %v4901_v35, %v1635_v18 }
  0xff   : > { %7116 = vst [vmem:[#allocation19_spill] sm:$0xff] %v5146_v53  ;;  %3824 = vrsqrt.f32 %v5146_v53  ;;  %v924_v30 = vpop.f32.mrf.mxu0  ;;  %v953_v40 = vpop.f32.mrf.mxu1  ;;  %v1677_v2 = vmul.f32 2.0, %v979_v16  ;;  %v1740_v36 = vmul.f32 %v5077_v9, %v5022_v55  ;;  %v1752_v16 = vmul.f32 %v5080_v17, %v5025_v5 }
 0x100   : > { %7117 = vst [vmem:[#allocation20_spill] sm:$0xff] %v5148_v31  ;;  %v5170_v11 = vpop.eup %3816  ;;  %3826 = vrsqrt.f32 %v5148_v31  ;;  %v1008_v62 = vpop.f32.mrf.mxu3  ;;  %v1207_v14 = vmul.f32 2.0, %v924_v30  ;;  %v1208_v56 = vmul.f32 2.0, %v953_v40  ;;  %v1926_v12 = vmul.f32 %v5142_v23, %v1908_v57 }
 0x101   : > { %7118 = vst [vmem:[#allocation21_spill] sm:$0xff] %v5170_v11  ;;  %v1678_v8 = vmul.f32 2.0, %v1008_v62  ;;  %3828 = vpow2.f32 %v1501_v39  ;;  %v5174_v21 = vpop.eup %3818  ;;  %v5186_v39 = vmul.f32 %v5086_v20, %v5028_v13  ;;  %v5201_v30 = vmul.f32 %v5123_v32, %v5066_v51 }
 0x102   : > { %7119 = vst [vmem:[#allocation22_spill] sm:$0xff] %v5174_v21  ;;  %v1223_v0 = vsub.f32 %v5000_v44, %v1207_v14  ;;  %v1224_v19 = vsub.f32 %v5003_v45, %v1208_v56  ;;  %3830 = vpow2.f32 %v1503_v22  ;;  %v5193_v44 = vmul.f32 %v5091_v47, %v5033_v25  ;;  %v1643_v22 = vpop.permute.xlu2 %1642 }
 0x103   : > { %v5180_v24 = vpop.eup %3820  ;;  %3832 = vpow2.f32 %v1941_v46  ;;  %v5197_v45 = vmul.f32 %v5108_v58, %v5049_v4  ;;  %v1693_v40 = vsub.f32 %v1661_v61, %v1677_v2  ;;  %v5207_v46 = vmul.f32 %v5129_v42, %v5072_v27 }
 0x104   : > { %7120 = vst [vmem:[#allocation23_spill] sm:$0xff] %v5180_v24  ;;  %v5189_v18 = vpop.eup %3822  ;;  %v5209_v14 = vmax.f32 %v1223_v0, 0.0  ;;  %v1943_v56 = vmul.f32 1.442695, %v1926_v12  ;;  %v1694_v57 = vsub.f32 %v1662_v1, %v1678_v8  ;;  %v5215_v13 = vmul.f32 %v5134_v50, %v5074_v63 }
 0x105   : > { %7121 = vst [vmem:[#allocation24_spill] sm:$0xff] %v5189_v18  ;;  %v5203_v62 = vpop.eup %3824  ;;  %v5219_v61 = vmul.f32 %v5144_v54, %v5094_v7  ;;  %v5223_v2 = vmul.f32 %v5166_v26, %v5102_v41  ;;  %v5225_v27 = vmax.f32 %v1224_v19, 0.0  ;;  %v5229_v1 = vmul.f32 %v5180_v24, %v5136_v3 }
 0x106   : > { %7122 = vst [vmem:[#allocation25_spill] sm:$0xff] %v5203_v62  ;;  %v5211_v25 = vpop.eup %3826  ;;  %v5233_v8 = vmul.f32 %v5170_v11, %v5111_v6  ;;  %v5237_v12 = vmul.f32 %v5174_v21, %v5117_v28  ;;  %v5240_v63 = vadd.f32 %v4899_v34, %v1643_v22  ;;  %v5244_v19 = vmul.f32 %v5189_v18, %v5138_v52 }
 0x107   : > { %7123 = vst [vmem:[#allocation26_spill] sm:$0xff] %v5209_v14  ;;  %v3829_v0 = vpop.eup %3828  ;;  %3834 = vpow2.f32 %v1943_v56  ;;  %v5249_v24 = vmax.f32 %v1693_v40, 0.0  ;;  %v5255_v21 = vmax.f32 %v1694_v57, 0.0  ;;  %v1741_v40 = vmul.f32 %v5077_v9, %v1740_v36  ;;  %v926_v36 = vpop.f32.mrf.mxu0 }
 0x108   : > { %7124 = vst [vmem:[#allocation27_spill] sm:$0xff] %v5211_v25  ;;  %v3831_v50 = vpop.eup %3830  ;;  %v5247_v3 = vmul.f32 %v3829_v0, %v5051_v60  ;;  %3836 = vrsqrt.f32 %v5209_v14  ;;  %v1011_v52 = vpop.f32.mrf.mxu3  ;;  %v453_v0 = vunpack.c.1.s8 %v4993_v37  ;;  %v5265_v56 = vmul.f32 %v5203_v62, %v5146_v53 }
 0x109   : > { %7125 = vst [vmem:[#allocation28_spill] sm:$0xff] %v5215_v13  ;;  %v982_v13 = vpop.f32.mrf.mxu2  ;;  %v3833_v6 = vpop.eup %3832  ;;  %v5253_v28 = vmul.f32 %v3831_v50, %v5106_v49  ;;  %3838 = vrsqrt.f32 %v5225_v27  ;;  %v454_v57 = vunpack.c.1.s8 %v5010_v48  ;;  %v5277_v11 = vmul.f32 2.0, %v1011_v52 }
 0x10a   : > { %7126 = vst [vmem:[#allocation29_spill] sm:$0xff] %v5225_v27  ;;  %v1973_v18 = vmul.f32 1.442695, %v3833_v6  ;;  %v5275_v6 = vmul.f32 2.0, %v982_v13  ;;  %v5279_v53 = vmul.f32 2.0, %v926_v36  ;;  %v955_v62 = vpop.f32.mrf.mxu1  ;;  %v5286_v13 = vcvt.s32.f32 %v453_v0 }
 0x10b   : > { %7127 = vst [vmem:[#allocation30_spill] sm:$0xff] %v5233_v8  ;;  %v1549_v50 = vadd.f32 %v5253_v28, %v5247_v3  ;;  %v1742_v8 = vmul.f32 0.5, %v1741_v40  ;;  %vm1772_vm1 = vcmp.eq.f32.partialorder %v5049_v4, 0.0  ;;  %vm1782_vm2 = vcmp.eq.f32.partialorder %v5066_v51, inf }
 0x10c   : > { %7128 = vst [vmem:[#allocation31_spill] sm:$0xff] %v5237_v12  ;;  %v5258_v12 = vadd.f32 %v4901_v35, %v1643_v22  ;;  %v1753_v22 = vmul.f32 %v5080_v17, %v1752_v16  ;;  %3840 = vpow2.f32 %v1973_v18  ;;  %v5291_v18 = vcvt.s32.f32 %v454_v57 }
 0x10d   : > { %7129 = vst [vmem:[#allocation32_spill] sm:$0xff] %v5244_v19  ;;  %v5273_v19 = vmul.f32 %v5211_v25, %v5148_v31  ;;  %1550 = vadd.xlane.f32.xlu0 %v1549_v50  ;;  %v3835_v16 = vpop.eup %3834  ;;  %3842 = vrsqrt.f32 %v5249_v24  ;;  %v1743_v52 = vsub.f32 1.5, %v1742_v8  ;;  %v1749_v8 = vand.u32 2147483648, %v5022_v55 }
 0x10e   : > { %7130 = vst [vmem:[#allocation33_spill] sm:$0xff] %v5247_v3  ;;  %v1269_v3 = vmul.f32 %v5040_v43, %v5154_v38  ;;  %v5288_v31 = vpop.eup %3836  ;;  %v1975_v40 = vmul.f32 1.442695, %v3835_v16  ;;  %3844 = vrsqrt.f32 %v5255_v21  ;;  %v1761_v25 = vand.u32 2147483648, %v5025_v5 }
 0x10f   : > { %7131 = vst [vmem:[#allocation34_spill] sm:$0xff] %v5253_v28  ;;  %v1754_v28 = vmul.f32 0.5, %v1753_v22  ;;  %v5293_v22 = vpop.eup %3838  ;;  %v1744_v38 = vmul.f32 %v5077_v9, %v1743_v52  ;;  %v1281_v9 = vmul.f32 %v5046_v59, %v5163_v15  ;;  %vm1784_vm3 = vcmp.eq.f32.partialorder %v5066_v51, 0.0 }
 0x110   : > { %7132 = vst [vmem:[#allocation35_spill] sm:$0xff] %v5265_v56  ;;  %v5283_v56 = vmul.f32 2.0, %v955_v62  ;;  %v1270_v62 = vmul.f32 0.5, %v1269_v3  ;;  %3846 = vpow2.f32 %v1975_v40  ;;  %v5307_v3 = vmul.f32 %v5288_v31, %v5209_v14 }
 0x111   : > { %7133 = vst [vmem:[#allocation36_spill] sm:$0xff] %v5273_v19  ;;  %v1755_v50 = vsub.f32 1.5, %v1754_v28  ;;  %v984_v0 = vpop.f32.mrf.mxu2  ;;  %v1745_v57 = vmul.f32 %v1744_v38, %v5022_v55  ;;  %v5311_v52 = vmul.f32 %v5293_v22, %v5225_v27  ;;  %v1013_v38 = vpop.f32.mrf.mxu3 }
 0x112   : > { %7134 = vst [vmem:[#allocation37_spill] sm:$0xff] %v5286_v13  ;;  %v1271_v36 = vsub.f32 1.5, %v1270_v62  ;;  %v3841_v16 = vpop.eup %3840  ;;  %v1681_v40 = vmul.f32 2.0, %v984_v0  ;;  %v1282_v62 = vmul.f32 0.5, %v1281_v9 }
 0x113   : > { %7135 = vst [vmem:[#allocation38_spill] sm:$0xff] %v5288_v31  ;;  %v1756_v28 = vmul.f32 %v5080_v17, %v1755_v50  ;;  %v5314_v19 = vpop.eup %3842  ;;  %v1747_v17 = vsel %vm1746_vm8, %v5022_v55, %v1745_v57  ;;  %v1682_v31 = vmul.f32 2.0, %v1013_v38  ;;  %v5328_v27 = vmul.f32 %v3841_v16, %v5051_v60 }
 0x114   : > { %7136 = vst [vmem:[#allocation39_spill] sm:$0xff] %v5291_v18  ;;  %v1272_v50 = vmul.f32 %v5040_v43, %v1271_v36  ;;  %v5321_v14 = vpop.eup %3844  ;;  %v1750_v0 = vsel %vm1748_vm9, %v1749_v8, %v1747_v17  ;;  %v1697_v9 = vsub.f32 %v5240_v63, %v1681_v40  ;;  %v1277_v8 = vand.u32 2147483648, %v4980_v29 }
 0x115   : > { %7137 = vst [vmem:[#allocation40_spill] sm:$0xff] %v5293_v22  ;;  %v1757_v15 = vmul.f32 %v1756_v28, %v5025_v5  ;;  %v1909_v28 = vsub.f32 0.0, %v1750_v0  ;;  %v1283_v38 = vsub.f32 1.5, %v1282_v62  ;;  %v1698_v0 = vsub.f32 %v5258_v12, %v1682_v31 }
 0x116   : > { %7138 = vst [vmem:[#allocation41_spill] sm:$0xff] %v5328_v27  ;;  %v1273_v43 = vmul.f32 %v1272_v50, %v4980_v29  ;;  %v3847_v36 = vpop.eup %3846  ;;  %v1289_v31 = vand.u32 2147483648, %v4986_v33  ;;  %vm1794_vm8 = vcmp.eq.f32.partialorder %v5094_v7, inf  ;;  %vm1796_vm9 = vcmp.eq.f32.partialorder %v5094_v7, 0.0 }
 0x117   : > { %v1759_v57 = vsel %vm1758_vm10, %v5025_v5, %v1757_v15  ;;  %v5339_v17 = vmul.f32 %v3847_v36, %v5106_v49  ;;  %v1927_v60 = vmul.f32 %v5142_v23, %v1909_v28  ;;  %v1284_v22 = vmul.f32 %v5046_v59, %v1283_v38 }
 0x118   : > { %v1762_v55 = vsel %vm1760_vm11, %v1761_v25, %v1759_v57  ;;  %v1275_v15 = vsel %vm1274_vm12, %v4980_v29, %v1273_v43  ;;  %v1765_v5 = vmul.f32 %v5108_v58, %v5197_v45  ;;  %v5350_v57 = vmax.f32 %v1697_v9, 0.0  ;;  %v7141_v45 = vld [vmem:[#allocation7_spill] sm:$0xff]  ;;  %v1639_v43 = vpop.permute.xlu1 %1638 }
 0x119   : > { %7139 = vst [vmem:[#allocation42_spill] sm:$0xff] %v5339_v17  ;;  %v1910_v16 = vsub.f32 0.0, %v1762_v55  ;;  %v1278_v50 = vsel %vm1276_vm13, %v1277_v8, %v1275_v15  ;;  %v2021_v25 = vadd.f32 %v5339_v17, %v5328_v27  ;;  %v1945_v40 = vmul.f32 1.442695, %v1927_v60 }
 0x11a   : > { %v1437_v62 = vsub.f32 0.0, %v1278_v50  ;;  %7140 = vst [vmem:[#allocation43_spill] sm:$0xff] %v5350_v57  ;;  %v1285_v28 = vmul.f32 %v1284_v22, %v4986_v33  ;;  %v2589_v29 = vperm.slane %v4874_v10, 3  ;;  %v5357_v36 = vmax.f32 %v1698_v0, 0.0  ;;  %v2559_v50 = vpop.permute.xlu2 %2558 }
 0x11b   : > { %v1928_v63 = vmul.f32 %v5142_v23, %v1910_v16  ;;  %2022 = vadd.xlane.f32.xlu2 %v2021_v25  ;;  %3848 = vpow2.f32 %v1945_v40  ;;  %v1766_v9 = vmul.f32 0.5, %v1765_v5  ;;  %v1663_v8 = vadd.f32 %v4899_v34, %v1639_v43  ;;  %v1083_v25 = vpop.f32.mrf.mxu2 }
 0x11c   : > { %v1455_v12 = vmul.f32 %v7141_v45, %v1437_v62  ;;  %7142 = vst [vmem:[#allocation7_spill] sm:$0xff] %v5357_v36  ;;  %v1287_v60 = vsel %vm1286_vm14, %v4986_v33, %v1285_v28  ;;  %v2590_v16 = vperm.slane %v4874_v10, 7  ;;  %v5364_v15 = vperm.slane %v2589_v29, 3  ;;  %v1112_v28 = vpop.f32.mrf.mxu3 }
 0x11d   : > { %v1947_v59 = vmul.f32 1.442695, %v1928_v63  ;;  %v1290_v22 = vsel %vm1288_vm15, %v1289_v31, %v1287_v60  ;;  %v5368_v0 = vmul.f32 %v5314_v19, %v5249_v24  ;;  %v5372_v33 = vmul.f32 %v5321_v14, %v5255_v21 }
 0x11e   : > { %v1473_v55 = vmul.f32 1.442695, %v1455_v12  ;;  %v1438_v38 = vsub.f32 0.0, %v1290_v22  ;;  %7143 = vst [vmem:[#allocation44_spill] sm:$0xff] %v5364_v15  ;;  %v1664_v5 = vadd.f32 %v4901_v35, %v1639_v43  ;;  %v1695_v10 = vsub.f32 %v1663_v8, %v5275_v6  ;;  %v1025_v35 = vpop.f32.mrf.mxu0 }
 0x11f   : > { %3850 = vpow2.f32 %v1947_v59  ;;  %v5378_v63 = vperm.slane %v2590_v16, 3  ;;  %v2611_v62 = vmul.f32 2.0, %v1083_v25  ;;  %v2595_v29 = vadd.f32 %v5364_v15, %v2559_v50 }
 0x120   : > { %3852 = vrsqrt.f32 %v5350_v57  ;;  %v1456_v34 = vmul.f32 %v7141_v45, %v1438_v38  ;;  %v1767_v59 = vsub.f32 1.5, %v1766_v9  ;;  %v2612_v43 = vmul.f32 2.0, %v1112_v28  ;;  %v1054_v28 = vpop.f32.mrf.mxu1 }
 0x121   : > { %3854 = vpow2.f32 %v1473_v55  ;;  %7144 = vst [vmem:[#allocation45_spill] sm:$0xff] %v5378_v63  ;;  %v3849_v40 = vpop.eup %3848  ;;  %v2596_v60 = vadd.f32 %v5378_v63, %v2559_v50  ;;  %v5383_v55 = vmul.f32 2.0, %v1025_v35  ;;  %v1696_v6 = vsub.f32 %v1664_v5, %v5277_v11 }
 0x122   : > { %3856 = vrsqrt.f32 %v5357_v36  ;;  %v1977_v31 = vmul.f32 1.442695, %v3849_v40  ;;  %v1475_v12 = vmul.f32 1.442695, %v1456_v34  ;;  %v1768_v8 = vmul.f32 %v5108_v58, %v1767_v59 }
 0x123   : > { %v5390_v16 = vmax.f32 %v1695_v10, 0.0  ;;  %v1777_v34 = vmul.f32 %v5123_v32, %v5201_v30  ;;  %v2627_v50 = vsub.f32 %v2595_v29, %v2611_v62  ;;  %v1773_v11 = vand.u32 2147483648, %v5049_v4 }
 0x124   : > { %3858 = vpow2.f32 %v1977_v31  ;;  %v1769_v40 = vmul.f32 %v1768_v8, %v5049_v4  ;;  %v2628_v59 = vsub.f32 %v2596_v60, %v2612_v43  ;;  %v5402_v35 = vmul.f32 2.0, %v1054_v28 }
 0x125   : > { %v3851_v22 = vpop.eup %3850  ;;  %3860 = vpow2.f32 %v1475_v12  ;;  %v1778_v31 = vmul.f32 0.5, %v1777_v34  ;;  %v5404_v30 = vmax.f32 %v1696_v6, 0.0  ;;  %v1293_v43 = vmul.f32 %v5086_v20, %v5186_v39 }
 0x126   : > { %v5388_v38 = vpop.eup %3852  ;;  %v1979_v9 = vmul.f32 1.442695, %v3851_v22  ;;  %v1771_v62 = vsel %vm1770_vm0, %v5049_v4, %v1769_v40  ;;  %v5415_v60 = vmax.f32 %v2627_v50, 0.0  ;;  %v1305_v50 = vmul.f32 %v5091_v47, %v5193_v44 }
 0x127   : > { %7145 = vst [vmem:[#allocation46_spill] sm:$0xff] %v5388_v38  ;;  %v3855_v25 = vpop.eup %3854  ;;  %v5400_v10 = vmul.f32 %v5388_v38, %v5350_v57  ;;  %v1774_v12 = vsel %vm1772_vm1, %v1773_v11, %v1771_v62  ;;  %v1779_v22 = vsub.f32 1.5, %v1778_v31  ;;  %vm1806_vm10 = vcmp.eq.f32.partialorder %v5102_v41, inf }
 0x128   : > { %v5396_v5 = vpop.eup %3856  ;;  %3862 = vpow2.f32 %v1979_v9  ;;  %v1505_v58 = vmul.f32 1.442695, %v3855_v25  ;;  %7148 = vst [vmem:[#allocation49_spill] sm:$0xff] %v5404_v30  ;;  %v1911_v6 = vsub.f32 0.0, %v1774_v12  ;;  %v5418_v9 = vmax.f32 %v2628_v59, 0.0 }
 0x129   : > { %7146 = vst [vmem:[#allocation47_spill] sm:$0xff] %v5396_v5  ;;  %3864 = vrsqrt.f32 %v5390_v16  ;;  %v1780_v34 = vmul.f32 %v5123_v32, %v1779_v22  ;;  %v1294_v25 = vmul.f32 0.5, %v1293_v43  ;;  %v1785_v59 = vand.u32 2147483648, %v5066_v51 }
 0x12a   : > { %7147 = vst [vmem:[#allocation48_spill] sm:$0xff] %v5400_v10  ;;  %v3859_v8 = vpop.eup %3858  ;;  %3866 = vpow2.f32 %v1505_v58  ;;  %v1929_v39 = vmul.f32 %v5142_v23, %v1911_v6  ;;  %v1306_v12 = vmul.f32 0.5, %v1305_v50  ;;  %vm1808_vm11 = vcmp.eq.f32.partialorder %v5102_v41, 0.0 }
 0x12b   : > { %7149 = vst [vmem:[#allocation50_spill] sm:$0xff] %v5415_v60  ;;  %v3861_v4 = vpop.eup %3860  ;;  %v5422_v40 = vmul.f32 %v3859_v8, %v5286_v13  ;;  %3868 = vrsqrt.f32 %v5404_v30  ;;  %v1781_v58 = vmul.f32 %v1780_v34, %v5066_v51  ;;  %v1295_v31 = vsub.f32 1.5, %v1294_v25 }
 0x12c   : > { %7150 = vst [vmem:[#allocation51_spill] sm:$0xff] %v5418_v9  ;;  %v1507_v28 = vmul.f32 1.442695, %v3861_v4  ;;  %3870 = vrsqrt.f32 %v5415_v60  ;;  %v1949_v62 = vmul.f32 1.442695, %v1929_v39  ;;  %v456_v8 = vunpack.c.2.s8 %v5010_v48  ;;  %v7153_v39 = vld [vmem:[#allocation8_spill] sm:$0xff] }
 0x12d   : > { %7151 = vst [vmem:[#allocation52_spill] sm:$0xff] %v5422_v40  ;;  %v1783_v22 = vsel %vm1782_vm2, %v5066_v51, %v1781_v58  ;;  %v1296_v44 = vmul.f32 %v5086_v20, %v1295_v31  ;;  %vm1298_vm4 = vcmp.eq.f32.partialorder %v7153_v39, inf  ;;  %vm1300_vm5 = vcmp.eq.f32.partialorder %v7153_v39, 0.0  ;;  %v7155_v20 = vld [vmem:[#allocation9_spill] sm:$0xff] }
 0x12e   : > { %v3863_v11 = vpop.eup %3862  ;;  %3872 = vpow2.f32 %v1507_v28  ;;  %v1786_v34 = vsel %vm1784_vm3, %v1785_v59, %v1783_v22  ;;  %v1301_v51 = vand.u32 2147483648, %v7153_v39  ;;  %vm1310_vm6 = vcmp.eq.f32.partialorder %v7155_v20, inf  ;;  %v4228_v31 = vld [vmem:[%s6883_s3] sm:$0xff] }
 0x12f   : > { %v5431_v32 = vmul.f32 %v3863_v11, %v5291_v18  ;;  %v5439_v43 = vpop.eup %3864  ;;  %3874 = vpow2.f32 %v1949_v62  ;;  %v1912_v4 = vsub.f32 0.0, %v1786_v34  ;;  %v1297_v50 = vmul.f32 %v1296_v44, %v7153_v39 }
 0x130   : > { %v3867_v25 = vpop.eup %3866  ;;  %v1307_v11 = vsub.f32 1.5, %v1306_v12  ;;  %3876 = vrsqrt.f32 %v5418_v9  ;;  %v2117_v62 = vperm.slane %v4228_v31, 2  ;;  %vm1312_vm7 = vcmp.eq.f32.partialorder %v7155_v20, 0.0 }
 0x131   : > { %7152 = vst [vmem:[#allocation53_spill] sm:$0xff] %v5431_v32  ;;  %v2024_v6 = vadd.f32 %v5431_v32, %v5422_v40  ;;  %v5446_v28 = vpop.eup %3868  ;;  %v1930_v48 = vmul.f32 %v5142_v23, %v1912_v4  ;;  %v1299_v58 = vsel %vm1298_vm4, %v7153_v39, %v1297_v50  ;;  %v5461_v22 = vmul.f32 %v3867_v25, %v5286_v13  ;;  %v1027_v40 = vpop.f32.mrf.mxu0 }
 0x132   : > { %7154 = vst [vmem:[#allocation8_spill] sm:$0xff] %v5446_v28  ;;  %v1308_v59 = vmul.f32 %v5091_v47, %v1307_v11  ;;  %v5458_v12 = vpop.eup %3870  ;;  %v1302_v44 = vsel %vm1300_vm5, %v1301_v51, %v1299_v58  ;;  %v1313_v47 = vand.u32 2147483648, %v7155_v20  ;;  %v2091_v11 = vpop.permute.xlu2 %2090  ;;  %v5469_v17 = vperm.slane %v2117_v62, 2 }
 0x133   : > { %2025 = vadd.xlane.f32.xlu1 %v2024_v6  ;;  %7156 = vst [vmem:[#allocation9_spill] sm:$0xff] %v5458_v12  ;;  %v2118_v6 = vperm.slane %v4228_v31, 6  ;;  %v1951_v4 = vmul.f32 1.442695, %v1930_v48  ;;  %v1439_v50 = vsub.f32 0.0, %v1302_v44  ;;  %v1789_v51 = vmul.f32 %v5144_v54, %v5219_v61 }
 0x134   : > { %7157 = vst [vmem:[#allocation54_spill] sm:$0xff] %v5461_v22  ;;  %v3873_v34 = vpop.eup %3872  ;;  %v1309_v39 = vmul.f32 %v1308_v59, %v7155_v20  ;;  %v2141_v59 = vmul.f32 2.0, %v1027_v40  ;;  %v2125_v61 = vadd.f32 %v5469_v17, %v2091_v11  ;;  %v5489_v40 = vmul.f32 %v5396_v5, %v5357_v36 }
 0x135   : > { %v3875_v29 = vpop.eup %3874  ;;  %v5467_v32 = vmul.f32 %v3873_v34, %v5291_v18  ;;  %7159 = vst [vmem:[#allocation56_spill] sm:$0xff] %v5469_v17  ;;  %v5471_v25 = vperm.slane %v2118_v6, 2  ;;  %3878 = vpow2.f32 %v1951_v4  ;;  %v1457_v58 = vmul.f32 %v7141_v45, %v1439_v50  ;;  %v1056_v34 = vpop.f32.mrf.mxu1 }
 0x136   : > { %v1311_v48 = vsel %vm1310_vm6, %v7155_v20, %v1309_v39  ;;  %v5479_v31 = vpop.eup %3876  ;;  %v1981_v62 = vmul.f32 1.442695, %v3875_v29  ;;  %v2142_v49 = vmul.f32 2.0, %v1056_v34  ;;  %7162 = vst [vmem:[#allocation59_spill] sm:$0xff] %v5489_v40  ;;  %v7163_v50 = vunpack.c.2.s8 %v4993_v37 }
 0x137   : > { %7158 = vst [vmem:[#allocation55_spill] sm:$0xff] %v5467_v32  ;;  %v1552_v44 = vadd.f32 %v5467_v32, %v5461_v22  ;;  %v1314_v6 = vsel %vm1312_vm7, %v1313_v47, %v1311_v48  ;;  %v1477_v27 = vmul.f32 1.442695, %v1457_v58  ;;  %v2126_v39 = vadd.f32 %v5471_v25, %v2091_v11 }
 0x138   : > { %7160 = vst [vmem:[#allocation57_spill] sm:$0xff] %v5471_v25  ;;  %v1440_v4 = vsub.f32 0.0, %v1314_v6  ;;  %v5493_v32 = vcvt.s32.f32 %v7163_v50  ;;  %v5495_v29 = vcvt.s32.f32 %v456_v8  ;;  %v1790_v20 = vmul.f32 0.5, %v1789_v51  ;;  %v1085_v50 = vpop.f32.mrf.mxu2 }
 0x139   : > { %7161 = vst [vmem:[#allocation58_spill] sm:$0xff] %v5479_v31  ;;  %1553 = vadd.xlane.f32.xlu2 %v1552_v44  ;;  %v5499_v47 = vmul.f32 %v5439_v43, %v5390_v16  ;;  %v5503_v48 = vmul.f32 %v5446_v28, %v5404_v30  ;;  %3880 = vpow2.f32 %v1477_v27  ;;  %v5508_v58 = vmul.f32 %v5458_v12, %v5415_v60 }
 0x13a   : > { %7164 = vst [vmem:[#allocation60_spill] sm:$0xff] %v5493_v32  ;;  %v1458_v11 = vmul.f32 %v7141_v45, %v1440_v4  ;;  %3882 = vpow2.f32 %v1981_v62  ;;  %v2157_v44 = vsub.f32 %v2125_v61, %v2141_v59  ;;  %v1791_v8 = vsub.f32 1.5, %v1790_v20  ;;  %v5523_v20 = vpop.f32.mrf.mxu3  ;;  %v2571_v13 = vpop.permute.xlu2 %2570 }
 0x13b   : > { %7165 = vst [vmem:[#allocation61_spill] sm:$0xff] %v5495_v29  ;;  %v3879_v6 = vpop.eup %3878  ;;  %v5512_v51 = vmul.f32 %v5479_v31, %v5418_v9  ;;  %v2158_v22 = vsub.f32 %v2126_v39, %v2142_v49  ;;  %v1801_v18 = vmul.f32 %v5166_v26, %v5223_v2  ;;  %v5516_v27 = vmul.f32 2.0, %v1085_v50  ;;  %v7171_v50 = vld [vmem:[#allocation16_spill] sm:$0xff] }
 0x13c   : > { %7166 = vst [vmem:[#allocation62_spill] sm:$0xff] %v5508_v58  ;;  %v1479_v34 = vmul.f32 1.442695, %v1458_v11  ;;  %v1983_v4 = vmul.f32 1.442695, %v3879_v6  ;;  %v1792_v60 = vmul.f32 %v5144_v54, %v1791_v8  ;;  %v1317_v61 = vmul.f32 %v5129_v42, %v5207_v46 }
 0x13d   : > { %7167 = vst [vmem:[#allocation63_spill] sm:$0xff] %v5512_v51  ;;  %v1802_v62 = vmul.f32 0.5, %v1801_v18  ;;  %v5525_v49 = vmax.f32 %v2157_v44, 0.0  ;;  %v5529_v54 = vmax.f32 %v2158_v22, 0.0  ;;  %v1797_v11 = vand.u32 2147483648, %v5094_v7  ;;  %v7170_v44 = vld [vmem:[#allocation28_spill] sm:$0xff] }
 0x13e   : > { %3884 = vpow2.f32 %v1479_v34  ;;  %v1793_v2 = vmul.f32 %v1792_v60, %v5094_v7  ;;  %v1318_v6 = vmul.f32 0.5, %v1317_v61  ;;  %v1329_v60 = vmul.f32 %v7171_v50, %v7170_v44  ;;  %v7173_v44 = vld [vmem:[#allocation11_spill] sm:$0xff] }
 0x13f   : > { %3886 = vpow2.f32 %v1983_v4  ;;  %7168 = vst [vmem:[#allocation64_spill] sm:$0xff] %v5525_v49  ;;  %v3881_v39 = vpop.eup %3880  ;;  %v1803_v8 = vsub.f32 1.5, %v1802_v62  ;;  %v1809_v62 = vand.u32 2147483648, %v5102_v41  ;;  %vm1322_vm12 = vcmp.eq.f32.partialorder %v7173_v44, inf }
 0x140   : > { %7169 = vst [vmem:[#allocation65_spill] sm:$0xff] %v5529_v54  ;;  %v3883_v18 = vpop.eup %3882  ;;  %v1509_v34 = vmul.f32 1.442695, %v3881_v39  ;;  %v1795_v46 = vsel %vm1794_vm8, %v5094_v7, %v1793_v2  ;;  %v1319_v22 = vsub.f32 1.5, %v1318_v6  ;;  %v1330_v39 = vmul.f32 0.5, %v1329_v60  ;;  %v7175_v60 = vld [vmem:[#allocation12_spill] sm:$0xff] }
 0x141   : > { %v1798_v4 = vsel %vm1796_vm9, %v1797_v11, %v1795_v46  ;;  %v1804_v59 = vmul.f32 %v5166_v26, %v1803_v8  ;;  %v5542_v31 = vmul.f32 %v3883_v18, %v5493_v32  ;;  %vm1324_vm13 = vcmp.eq.f32.partialorder %v7173_v44, 0.0 }
 0x142   : > { %3888 = vpow2.f32 %v1509_v34  ;;  %v1913_v61 = vsub.f32 0.0, %v1798_v4  ;;  %v1320_v2 = vmul.f32 %v5129_v42, %v1319_v22  ;;  %v1331_v6 = vsub.f32 1.5, %v1330_v39 }
 0x143   : > { %7172 = vst [vmem:[#allocation28_spill] sm:$0xff] %v5542_v31  ;;  %v1805_v7 = vmul.f32 %v1804_v59, %v5102_v41  ;;  %v1325_v42 = vand.u32 2147483648, %v7173_v44  ;;  %vm1334_vm14 = vcmp.eq.f32.partialorder %v7175_v60, inf  ;;  %vm1336_vm15 = vcmp.eq.f32.partialorder %v7175_v60, 0.0 }
 0x144   : > { %v3885_v9 = vpop.eup %3884  ;;  %v1931_v8 = vmul.f32 %v5142_v23, %v1913_v61  ;;  %v1321_v59 = vmul.f32 %v1320_v2, %v7173_v44  ;;  %v1332_v39 = vmul.f32 %v7171_v50, %v1331_v6  ;;  %v1059_v2 = vpop.f32.mrf.mxu1  ;;  %vm1842_vm4 = vcmp.eq.f32.partialorder %v5249_v24, inf }
 0x145   : > { %v3887_v11 = vpop.eup %3886  ;;  %v1511_v26 = vmul.f32 1.442695, %v3885_v9  ;;  %v1807_v18 = vsel %vm1806_vm10, %v5102_v41, %v1805_v7  ;;  %v1030_v7 = vpop.f32.mrf.mxu0  ;;  %vm1844_vm5 = vcmp.eq.f32.partialorder %v5249_v24, 0.0  ;;  %vm1854_vm6 = vcmp.eq.f32.partialorder %v5255_v21, inf }
 0x146   : > { %v5550_v34 = vmul.f32 %v3887_v11, %v5495_v29  ;;  %v1810_v9 = vsel %vm1808_vm11, %v1809_v62, %v1807_v18  ;;  %v1953_v46 = vmul.f32 1.442695, %v1931_v8  ;;  %v1323_v61 = vsel %vm1322_vm12, %v7173_v44, %v1321_v59  ;;  %v5572_v8 = vpop.f32.mrf.mxu3 }
 0x147   : > { %3890 = vpow2.f32 %v1511_v26  ;;  %v1914_v22 = vsub.f32 0.0, %v1810_v9  ;;  %v1326_v41 = vsel %vm1324_vm13, %v1325_v42, %v1323_v61  ;;  %v1337_v62 = vand.u32 2147483648, %v7175_v60  ;;  %v5570_v26 = vpop.f32.mrf.mxu2  ;;  %v1170_v9 = vpop.permute.xlu1 %1169  ;;  %v7177_v61 = vld [vmem:[#allocation5_spill] sm:$0xff] }
 0x148   : > { %7174 = vst [vmem:[#allocation16_spill] sm:$0xff] %v5550_v34  ;;  %v2027_v4 = vadd.f32 %v5550_v34, %v5542_v31  ;;  %v3889_v11 = vpop.eup %3888  ;;  %3892 = vpow2.f32 %v1953_v46  ;;  %v1333_v50 = vmul.f32 %v1332_v39, %v7175_v60  ;;  %v1441_v6 = vsub.f32 0.0, %v1326_v41  ;;  %v2095_v46 = vpop.permute.xlu0 %2094  ;;  %v7178_v31 = vld [vmem:[#allocation6_spill] sm:$0xff] }
 0x149   : > { %v1932_v18 = vmul.f32 %v5142_v23, %v1914_v22  ;;  %v2143_v59 = vmul.f32 2.0, %v1030_v7  ;;  %v5577_v44 = vmul.f32 %v3889_v11, %v5493_v32  ;;  %v2144_v42 = vmul.f32 2.0, %v1059_v2 }
 0x14a   : > { %2028 = vadd.xlane.f32.xlu1 %v2027_v4  ;;  %v1193_v34 = vadd.f32 %v7177_v61, %v1170_v9  ;;  %v1194_v51 = vadd.f32 %v7178_v31, %v1170_v9  ;;  %v1335_v4 = vsel %vm1334_vm14, %v7175_v60, %v1333_v50  ;;  %v1459_v22 = vmul.f32 %v7141_v45, %v1441_v6 }
 0x14b   : > { %7176 = vst [vmem:[#allocation11_spill] sm:$0xff] %v5577_v44  ;;  %v1955_v12 = vmul.f32 1.442695, %v1932_v18  ;;  %v2127_v39 = vadd.f32 %v5469_v17, %v2095_v46  ;;  %v1338_v11 = vsel %vm1336_vm15, %v1337_v62, %v1335_v4  ;;  %v2128_v31 = vadd.f32 %v5471_v25, %v2095_v46 }
 0x14c   : > { %v1225_v2 = vsub.f32 %v1193_v34, %v5279_v53  ;;  %v1226_v41 = vsub.f32 %v1194_v51, %v5283_v56  ;;  %v1442_v50 = vsub.f32 0.0, %v1338_v11  ;;  %v1481_v9 = vmul.f32 1.442695, %v1459_v22  ;;  %v5602_v46 = vpop.f32.mrf.mxu1 }
 0x14d   : > { %v3891_v7 = vpop.eup %3890  ;;  %3894 = vpow2.f32 %v1955_v12  ;;  %v2159_v60 = vsub.f32 %v2127_v39, %v2143_v59  ;;  %v2160_v62 = vsub.f32 %v2128_v31, %v2144_v42  ;;  %v5600_v34 = vpop.f32.mrf.mxu0  ;;  %v4229_v12 = vld [vmem:[%s4972_s13 + $0x8] sm:$0xff]  ;;  %v2601_v59 = vadd.f32 %v5364_v15, %v2571_v13 }
 0x14e   : > { %v5592_v18 = vmul.f32 %v3891_v7, %v5495_v29  ;;  %v3893_v6 = vpop.eup %3892  ;;  %3896 = vrsqrt.f32 %v5525_v49  ;;  %v5595_v61 = vmax.f32 %v1225_v2, 0.0  ;;  %v1460_v51 = vmul.f32 %v7141_v45, %v1442_v50  ;;  %v1119_v39 = vpop.f32.mrf.mxu3 }
 0x14f   : > { %v1985_v56 = vmul.f32 1.442695, %v3893_v6  ;;  %3898 = vpow2.f32 %v1481_v9  ;;  %v458_v4 = vunpack.c.3.s8 %v4229_v12  ;;  %v5606_v22 = vmax.f32 %v1226_v41, 0.0  ;;  %v1090_v42 = vpop.f32.mrf.mxu2  ;;  %v2087_v31 = vpop.permute.xlu1 %2086 }
 0x150   : > { %7179 = vst [vmem:[#allocation12_spill] sm:$0xff] %v5592_v18  ;;  %v1555_v53 = vadd.f32 %v5592_v18, %v5577_v44  ;;  %3900 = vrsqrt.f32 %v5529_v54  ;;  %v1483_v7 = vmul.f32 1.442695, %v1460_v51  ;;  %v5610_v11 = vmax.f32 %v2159_v60, 0.0  ;;  %v2103_v6 = vpop.permute.xlu0 %2102 }
 0x151   : > { %7180 = vst [vmem:[#allocation5_spill] sm:$0xff] %v5606_v22  ;;  %3902 = vrsqrt.f32 %v5595_v61  ;;  %v2602_v2 = vadd.f32 %v5378_v63, %v2571_v13  ;;  %v5614_v50 = vmul.f32 2.0, %v5523_v20  ;;  %v2617_v9 = vmul.f32 2.0, %v1090_v42  ;;  %v2575_v42 = vpop.permute.xlu2 %2574 }
 0x152   : > { %1556 = vadd.xlane.f32.xlu2 %v1555_v53  ;;  %7181 = vst [vmem:[#allocation6_spill] sm:$0xff] %v5610_v11  ;;  %3904 = vpow2.f32 %v1985_v56  ;;  %v2618_v41 = vmul.f32 2.0, %v1119_v39  ;;  %v5616_v18 = vmax.f32 %v2160_v62, 0.0  ;;  %v2123_v53 = vadd.f32 %v5469_v17, %v2087_v31 }
 0x153   : > { %v3895_v12 = vpop.eup %3894  ;;  %3906 = vpow2.f32 %v1483_v7  ;;  %v2124_v51 = vadd.f32 %v5471_v25, %v2087_v31  ;;  %v7184_v13 = vunpack.c.3.s8 %v4993_v37  ;;  %v2633_v56 = vsub.f32 %v2601_v59, %v2617_v9 }
 0x154   : > { %7182 = vst [vmem:[#allocation66_spill] sm:$0xff] %v5616_v18  ;;  %v5620_v60 = vpop.eup %3896  ;;  %v1987_v20 = vmul.f32 1.442695, %v3895_v12  ;;  %3908 = vrsqrt.f32 %v5606_v22  ;;  %v5627_v29 = vcvt.s32.f32 %v458_v4  ;;  %v2634_v62 = vsub.f32 %v2602_v2, %v2618_v41 }
 0x155   : > { %7183 = vst [vmem:[#allocation67_spill] sm:$0xff] %v5620_v60  ;;  %v5624_v44 = vcvt.s32.f32 %v7184_v13  ;;  %v3899_v39 = vpop.eup %3898  ;;  %3910 = vrsqrt.f32 %v5610_v11  ;;  %v2155_v7 = vsub.f32 %v2123_v53, %v5383_v55  ;;  %v2156_v37 = vsub.f32 %v2124_v51, %v5402_v35  ;;  %v1035_v9 = vpop.f32.mrf.mxu0 }
 0x156   : > { %7186 = vst [vmem:[#allocation69_spill] sm:$0xff] %v5627_v29  ;;  %v5631_v31 = vpop.eup %3900  ;;  %3912 = vpow2.f32 %v1987_v20  ;;  %v1513_v32 = vmul.f32 1.442695, %v3899_v39  ;;  %v2131_v12 = vadd.f32 %v5469_v17, %v2103_v6  ;;  %v5638_v59 = vmax.f32 %v2633_v56, 0.0  ;;  %v1064_v55 = vpop.f32.mrf.mxu1 }
 0x157   : > { %7185 = vst [vmem:[#allocation68_spill] sm:$0xff] %v5624_v44  ;;  %v5635_v13 = vpop.eup %3902  ;;  %3914 = vrsqrt.f32 %v5616_v18  ;;  %v2132_v4 = vadd.f32 %v5471_v25, %v2103_v6  ;;  %v2603_v2 = vadd.f32 %v5364_v15, %v2575_v42  ;;  %v2615_v53 = vmul.f32 2.0, %v5570_v26  ;;  %v1093_v20 = vpop.f32.mrf.mxu2 }
 0x158   : > { %7187 = vst [vmem:[#allocation70_spill] sm:$0xff] %v5631_v31  ;;  %v3905_v41 = vpop.eup %3904  ;;  %3916 = vpow2.f32 %v1513_v32  ;;  %v2604_v35 = vadd.f32 %v5378_v63, %v2575_v42  ;;  %v2147_v51 = vmul.f32 2.0, %v1035_v9  ;;  %v1122_v39 = vpop.f32.mrf.mxu3  ;;  %v5644_v36 = vmax.f32 %v2634_v62, 0.0 }
 0x159   : > { %7188 = vst [vmem:[#allocation71_spill] sm:$0xff] %v5638_v59  ;;  %v3907_v58 = vpop.eup %3906  ;;  %v5646_v56 = vmax.f32 %v2155_v7, 0.0  ;;  %v2148_v57 = vmul.f32 2.0, %v1064_v55  ;;  %v2619_v6 = vmul.f32 2.0, %v1093_v20  ;;  %v2567_v5 = vpop.permute.xlu1 %2566  ;;  %v5650_v10 = vmax.f32 %v2156_v37, 0.0 }
 0x15a   : > { %7189 = vst [vmem:[#allocation72_spill] sm:$0xff] %v5644_v36  ;;  %v5648_v40 = vpop.eup %3908  ;;  %v1515_v38 = vmul.f32 1.442695, %v3907_v58  ;;  %v2163_v32 = vsub.f32 %v2131_v12, %v2147_v51  ;;  %v2620_v26 = vmul.f32 2.0, %v1122_v39  ;;  %v5655_v42 = vmul.f32 %v3905_v41, %v5624_v44  ;;  %v2563_v37 = vpop.permute.xlu0 %2562 }
 0x15b   : > { %7190 = vst [vmem:[#allocation73_spill] sm:$0xff] %v5648_v40  ;;  %v5652_v30 = vpop.eup %3910  ;;  %3918 = vrsqrt.f32 %v5638_v59  ;;  %v2164_v62 = vsub.f32 %v2132_v4, %v2148_v57  ;;  %v2635_v7 = vsub.f32 %v2603_v2, %v2619_v6  ;;  %v2616_v55 = vmul.f32 2.0, %v5572_v8  ;;  %v2107_v39 = vpop.permute.xlu2 %2106  ;;  %v7199_v6 = vld [vmem:[#allocation23_spill] sm:$0xff] }
 0x15c   : > { %7191 = vst [vmem:[#allocation74_spill] sm:$0xff] %v5652_v30  ;;  %v3913_v9 = vpop.eup %3912  ;;  %3920 = vpow2.f32 %v1515_v38  ;;  %v5659_v20 = vmax.f32 %v2163_v32, 0.0  ;;  %v2636_v58 = vsub.f32 %v2604_v35, %v2620_v26  ;;  %v5665_v12 = vmul.f32 %v5620_v60, %v5525_v49 }
 0x15d   : > { %7192 = vst [vmem:[#allocation75_spill] sm:$0xff] %v5655_v42  ;;  %v5661_v28 = vpop.eup %3914  ;;  %v5668_v41 = vmul.f32 %v3913_v9, %v5627_v29  ;;  %3922 = vrsqrt.f32 %v5644_v36  ;;  %v5671_v57 = vmax.f32 %v2164_v62, 0.0  ;;  %v5674_v8 = vmax.f32 %v2635_v7, 0.0  ;;  %v1037_v49 = vpop.f32.mrf.mxu0 }
 0x15e   : > { %7193 = vst [vmem:[#allocation76_spill] sm:$0xff] %v5659_v20  ;;  %v3917_v38 = vpop.eup %3916  ;;  %3924 = vrsqrt.f32 %v5646_v56  ;;  %v2599_v4 = vadd.f32 %v5364_v15, %v2567_v5  ;;  %v2600_v2 = vadd.f32 %v5378_v63, %v2567_v5  ;;  %v2597_v51 = vadd.f32 %v5364_v15, %v2563_v37  ;;  %v1066_v9 = vpop.f32.mrf.mxu1 }
 0x15f   : > { %7194 = vst [vmem:[#allocation77_spill] sm:$0xff] %v5661_v28  ;;  %v2030_v35 = vadd.f32 %v5668_v41, %v5655_v42  ;;  %3926 = vrsqrt.f32 %v5650_v10  ;;  %v5684_v32 = vmul.f32 %v7199_v6, %v5229_v1  ;;  %v5687_v26 = vmax.f32 %v2636_v58, 0.0 }
 0x160   : > { %7195 = vst [vmem:[#allocation78_spill] sm:$0xff] %v5665_v12  ;;  %3928 = vrsqrt.f32 %v5659_v20  ;;  %v2631_v62 = vsub.f32 %v2599_v4, %v2615_v53  ;;  %v2632_v7 = vsub.f32 %v2600_v2, %v2616_v55  ;;  %v2598_v42 = vadd.f32 %v5378_v63, %v2563_v37 }
 0x161   : > { %7196 = vst [vmem:[#allocation79_spill] sm:$0xff] %v5668_v41  ;;  %v5689_v5 = vpop.eup %3918  ;;  %2031 = vadd.xlane.f32.xlu0 %v2030_v35  ;;  %v5692_v41 = vmul.f32 %v3917_v38, %v5624_v44  ;;  %3930 = vrsqrt.f32 %v5671_v57  ;;  %v2629_v1 = vsub.f32 %v2597_v51, %v5516_v27  ;;  %v2099_v60 = vpop.permute.xlu1 %2098  ;;  %v2133_v58 = vadd.f32 %v5469_v17, %v2107_v39 }
 0x162   : > { %7197 = vst [vmem:[#allocation80_spill] sm:$0xff] %v5671_v57  ;;  %v3921_v12 = vpop.eup %3920  ;;  %3932 = vrsqrt.f32 %v5674_v8  ;;  %v5698_v53 = vmax.f32 %v2631_v62, 0.0  ;;  %v5700_v55 = vmax.f32 %v2632_v7, 0.0  ;;  %v2630_v37 = vsub.f32 %v2598_v42, %v5614_v50 }
 0x163   : > { %7198 = vst [vmem:[#allocation81_spill] sm:$0xff] %v5674_v8  ;;  %v5703_v4 = vpop.eup %3922  ;;  %v5706_v38 = vmul.f32 %v3921_v12, %v5627_v29  ;;  %v5709_v2 = vmax.f32 %v2629_v1, 0.0  ;;  %v2134_v27 = vadd.f32 %v5471_v25, %v2107_v39  ;;  %v5716_v51 = vmul.f32 %v5631_v31, %v5529_v54  ;;  %v1095_v39 = vpop.f32.mrf.mxu2 }
 0x164   : > { %7200 = vst [vmem:[#allocation23_spill] sm:$0xff] %v5687_v26  ;;  %v5712_v35 = vpop.eup %3924  ;;  %3934 = vrsqrt.f32 %v5687_v26  ;;  %v2150_v62 = vmul.f32 2.0, %v1066_v9  ;;  %v2149_v7 = vmul.f32 2.0, %v1037_v49  ;;  %v2145_v50 = vmul.f32 2.0, %v5600_v34  ;;  %v1124_v54 = vpop.f32.mrf.mxu3 }
 0x165   : > { %7201 = vst [vmem:[#allocation82_spill] sm:$0xff] %v5689_v5  ;;  %v5719_v44 = vpop.eup %3926  ;;  %v1558_v12 = vadd.f32 %v5706_v38, %v5692_v41  ;;  %3936 = vrsqrt.f32 %v5698_v53  ;;  %v5725_v42 = vmax.f32 %v2630_v37, 0.0  ;;  %v2146_v29 = vmul.f32 2.0, %v5602_v46 }
 0x166   : > { %7202 = vst [vmem:[#allocation83_spill] sm:$0xff] %v5692_v41  ;;  %v5727_v1 = vpop.eup %3928  ;;  %3938 = vrsqrt.f32 %v5700_v55  ;;  %v2166_v49 = vsub.f32 %v2134_v27, %v2150_v62  ;;  %v2165_v9 = vsub.f32 %v2133_v58, %v2149_v7  ;;  %v5735_v34 = vmul.f32 %v5635_v13, %v5595_v61 }
 0x167   : > { %7203 = vst [vmem:[#allocation84_spill] sm:$0xff] %v5703_v4  ;;  %v5731_v31 = vpop.eup %3930  ;;  %1559 = vadd.xlane.f32.xlu1 %v1558_v12  ;;  %3940 = vrsqrt.f32 %v5709_v2  ;;  %v2129_v37 = vadd.f32 %v5469_v17, %v2099_v60  ;;  %v2130_v46 = vadd.f32 %v5471_v25, %v2099_v60  ;;  %v5744_v58 = vmul.f32 %v5648_v40, %v5606_v22  ;;  %v4230_v12 = vld [vmem:[%s4436_s0 + $0x38] sm:$0xff] }
 0x168   : > { %7204 = vst [vmem:[#allocation85_spill] sm:$0xff] %v5706_v38  ;;  %v5740_v38 = vpop.eup %3932  ;;  %v5748_v27 = vmul.f32 %v5652_v30, %v5610_v11  ;;  %v5750_v62 = vmax.f32 %v2166_v49, 0.0  ;;  %v2621_v7 = vmul.f32 2.0, %v1095_v39  ;;  %3942 = vrsqrt.f32 %v5725_v42  ;;  %v5760_v22 = vld [vmem:[%s4972_s13 + $0x18] sm:$0xff] }
 0x169   : > { %7205 = vst [vmem:[#allocation86_spill] sm:$0xff] %v5716_v51  ;;  %v5754_v17 = vmax.f32 %v2165_v9, 0.0  ;;  %v2161_v60 = vsub.f32 %v2129_v37, %v2145_v50  ;;  %v2579_v25 = vpop.permute.xlu1 %2578  ;;  %v2622_v41 = vmul.f32 2.0, %v1124_v54  ;;  %v5757_v51 = vld [vmem:[%s4972_s13 + $0x10] sm:$0xff]  ;;  %v5766_v49 = vmul.f32 %v5661_v28, %v5616_v18 }
 0x16a   : > { %7206 = vst [vmem:[#allocation87_spill] sm:$0xff] %v5727_v1  ;;  %2586 = vperm.xlu2 %3776, %v4230_v12   ;;  %v5762_v40 = vpop.eup %3934  ;;  %v2162_v39 = vsub.f32 %v2130_v46, %v2146_v29  ;;  %v2605_v11 = vadd.f32 %v5364_v15, %v2579_v25  ;;  %v2606_v30 = vadd.f32 %v5378_v63, %v2579_v25  ;;  %3944 = vrsqrt.f32 %v5750_v62 }
 0x16b   : > { %7207 = vst [vmem:[#allocation88_spill] sm:$0xff] %v5731_v31  ;;  %v5770_v9 = vpop.eup %3936  ;;  %v5774_v54 = vmul.f32 %v5689_v5, %v5638_v59  ;;  %v5778_v50 = vmul.f32 %v5703_v4, %v5644_v36  ;;  %v5782_v37 = vmul.f32 %v5712_v35, %v5646_v56  ;;  %v5786_v29 = vmul.f32 %v5719_v44, %v5650_v10  ;;  %v7217_v36 = vld [vmem:[#allocation21_spill] sm:$0xff] }
 0x16c   : > { %7208 = vst [vmem:[#allocation89_spill] sm:$0xff] %v5740_v38  ;;  %v5788_v46 = vpop.eup %3938  ;;  %v2637_v25 = vsub.f32 %v2605_v11, %v2621_v7  ;;  %v459_v63 = vunpack.c.0.s8 %v5757_v51  ;;  %v460_v15 = vunpack.c.0.s8 %v5760_v22  ;;  %3946 = vrsqrt.f32 %v5754_v17 }
 0x16d   : > { %7209 = vst [vmem:[#allocation90_spill] sm:$0xff] %v5748_v27  ;;  %v5793_v18 = vpop.eup %3940  ;;  %v5796_v28 = vmax.f32 %v2161_v60, 0.0  ;;  %v7216_v27 = vld [vmem:[#allocation30_spill] sm:$0xff]  ;;  %v5806_v11 = vmul.f32 %v5731_v31, %v5671_v57  ;;  %v5810_v7 = vmul.f32 %v5740_v38, %v5674_v8  ;;  %v5812_v59 = vmax.f32 %v2162_v39, 0.0  ;;  %v7223_v38 = vld [vmem:[#allocation31_spill] sm:$0xff] }
 0x16e   : > { %7210 = vst [vmem:[#allocation91_spill] sm:$0xff] %v5750_v62  ;;  %v1341_v4 = vmul.f32 %v7217_v36, %v7216_v27  ;;  %v5814_v60 = vpop.eup %3942  ;;  %v5826_v27 = vmul.f32 %v5788_v46, %v5700_v55  ;;  %v5830_v8 = vmul.f32 %v5793_v18, %v5709_v2  ;;  %v5832_v39 = vmax.f32 %v2637_v25, 0.0 }
 0x16f   : > { %7211 = vst [vmem:[#allocation92_spill] sm:$0xff] %v5754_v17  ;;  %3948 = vrsqrt.f32 %v5796_v28  ;;  %v5842_v31 = vcvt.s32.f32 %v460_v15  ;;  %v5848_v25 = vmul.f32 %v5814_v60, %v5725_v42  ;;  %v1849_v5 = vmul.f32 %v5321_v14, %v5372_v33 }
 0x170   : > { %7212 = vst [vmem:[#allocation93_spill] sm:$0xff] %v5762_v40  ;;  %v1342_v57 = vmul.f32 0.5, %v1341_v4  ;;  %3950 = vrsqrt.f32 %v5812_v59  ;;  %vm1856_vm7 = vcmp.eq.f32.partialorder %v5255_v21, 0.0 }
 0x171   : > { %7213 = vst [vmem:[#allocation94_spill] sm:$0xff] %v5766_v49  ;;  %v2638_v49 = vsub.f32 %v2606_v30, %v2622_v41  ;;  %v5818_v30 = vmul.f32 %v5762_v40, %v5687_v26  ;;  %v5822_v41 = vmul.f32 %v5770_v9, %v5698_v53  ;;  %v7224_v26 = vld [vmem:[#allocation22_spill] sm:$0xff]  ;;  %3952 = vrsqrt.f32 %v5832_v39 }
 0x172   : > { %7214 = vst [vmem:[#allocation95_spill] sm:$0xff] %v5774_v54  ;;  %v1353_v40 = vmul.f32 %v7224_v26, %v7223_v38  ;;  %v1343_v4 = vsub.f32 1.5, %v1342_v57  ;;  %v1837_v57 = vmul.f32 %v5314_v19, %v5368_v0  ;;  %v1850_v33 = vmul.f32 0.5, %v1849_v5 }
 0x173   : > { %7215 = vst [vmem:[#allocation96_spill] sm:$0xff] %v5778_v50  ;;  %v5802_v50 = vmul.f32 %v5727_v1, %v5659_v20  ;;  %v5834_v20 = vcvt.s32.f32 %v459_v63  ;;  %v7228_v63 = vld [vmem:[#allocation14_spill] sm:$0xff] }
 0x174   : > { %7219 = vst [vmem:[#allocation21_spill] sm:$0xff] %v5806_v11  ;;  %v5844_v11 = vpop.eup %3944  ;;  %vm1346_vm0 = vcmp.eq.f32.partialorder %v7228_v63, inf  ;;  %v1354_v38 = vmul.f32 0.5, %v1353_v40  ;;  %vm1348_vm1 = vcmp.eq.f32.partialorder %v7228_v63, 0.0  ;;  %v1349_v15 = vand.u32 2147483648, %v7228_v63 }
 0x175   : > { %7218 = vst [vmem:[#allocation30_spill] sm:$0xff] %v5802_v50  ;;  %v4231_v50 = vld [vmem:[%s4436_s0 + $0x30] sm:$0xff]  ;;  %v5865_v40 = vmul.f32 %v5844_v11, %v5750_v62  ;;  %s6041_s0 = sld [smem:[#allocation3 + $0x3]] }
 0x176   : > { %7220 = vst [vmem:[#allocation97_spill] sm:$0xff] %v5810_v7  ;;  %v5840_v7 = vmax.f32 %v2638_v49, 0.0  ;;  %v1344_v49 = vmul.f32 %v7217_v36, %v1343_v4  ;;  %v1355_v1 = vsub.f32 1.5, %v1354_v38  ;;  %2582 = vperm.xlu0 %3774, %v4231_v50   ;;  %v1838_v4 = vmul.f32 0.5, %v1837_v57 }
 0x177   : > { %7221 = vst [vmem:[#allocation98_spill] sm:$0xff] %v5818_v30  ;;  %v7225_v30 = vmov 2  }
 0x178   : > { %7222 = vst [vmem:[#allocation99_spill] sm:$0xff] %v5832_v39  ;;  %3778 = vset.pattern.permute.xlu2 %v7225_v30  ;;  %v5852_v30 = vpop.eup %3946  ;;  %3954 = vrsqrt.f32 %v5840_v7  ;;  %v1345_v36 = vmul.f32 %v1344_v49, %v7228_v63  ;;  %v1356_v38 = vmul.f32 %v7224_v26, %v1355_v1  ;;  %v1839_v57 = vsub.f32 1.5, %v1838_v4 }
 0x179   : > { %7226 = vst [vmem:[#allocation31_spill] sm:$0xff] %v5840_v7  ;;  %2114 = vperm.xlu2 %3778, %v4230_v12   ;;  %v7230_v12 = vld [vmem:[#allocation15_spill] sm:$0xff]  ;;  %v5871_v0 = vmul.f32 %v5852_v30, %v5754_v17  ;;  %v5877_v54 = vpop.eup %3948  ;;  %v1814_v49 = vmul.f32 0.5, %v5684_v32 }
 0x17a   : > { %7227 = vst [vmem:[#allocation22_spill] sm:$0xff] %v5844_v11  ;;  %vm1358_vm2 = vcmp.eq.f32.partialorder %v7230_v12, inf  ;;  %vm1360_vm3 = vcmp.eq.f32.partialorder %v7230_v12, 0.0  ;;  %v1361_v39 = vand.u32 2147483648, %v7230_v12  ;;  %v1347_v62 = vsel %vm1346_vm0, %v7228_v63, %v1345_v36  ;;  %v5884_v17 = vpop.eup %3950 }
 0x17b   : > { %7229 = vst [vmem:[#allocation14_spill] sm:$0xff] %v5852_v30  ;;  %v1350_v26 = vsel %vm1348_vm1, %v1349_v15, %v1347_v62  ;;  %v1357_v1 = vmul.f32 %v1356_v38, %v7230_v12  ;;  %v1845_v36 = vand.u32 2147483648, %v5249_v24  ;;  %v5893_v4 = vpop.eup %3952  ;;  %v1851_v63 = vsub.f32 1.5, %v1850_v33  ;;  %v7235_v33 = vld [vmem:[#allocation24_spill] sm:$0xff] }
 0x17c   : > { %7231 = vst [vmem:[#allocation15_spill] sm:$0xff] %v5865_v40  ;;  %v1443_v11 = vsub.f32 0.0, %v1350_v26  ;;  %v1840_v40 = vmul.f32 %v5314_v19, %v1839_v57  ;;  %v1815_v15 = vsub.f32 1.5, %v1814_v49  ;;  %v1857_v26 = vand.u32 2147483648, %v5255_v21 }
 0x17d   : > { %7232 = vst [vmem:[#allocation100_spill] sm:$0xff] %v5871_v0  ;;  %v1359_v30 = vsel %vm1358_vm2, %v7230_v12, %v1357_v1  ;;  %v1852_v57 = vmul.f32 %v5321_v14, %v1851_v63  ;;  %v7234_v1 = vld [vmem:[#allocation32_spill] sm:$0xff]  ;;  %vm1866_vm0 = vcmp.eq.f32.partialorder %v5390_v16, inf  ;;  %vm1868_vm1 = vcmp.eq.f32.partialorder %v5390_v16, 0.0 }
 0x17e   : > { %v5900_v62 = vpop.eup %3954  ;;  %v1362_v19 = vsel %vm1360_vm3, %v1361_v39, %v1359_v30  ;;  %v1461_v5 = vmul.f32 %v7141_v45, %v1443_v11  ;;  %v1841_v32 = vmul.f32 %v1840_v40, %v5249_v24  ;;  %v1825_v0 = vmul.f32 %v7235_v33, %v7234_v1  ;;  %v7236_v30 = vld [vmem:[#allocation17_spill] sm:$0xff] }
 0x17f   : > { %7233 = vst [vmem:[#allocation101_spill] sm:$0xff] %v5900_v62  ;;  %v1444_v38 = vsub.f32 0.0, %v1362_v19  ;;  %v1816_v39 = vmul.f32 %v7199_v6, %v1815_v15  ;;  %vm1818_vm8 = vcmp.eq.f32.partialorder %v7236_v30, inf  ;;  %v1853_v14 = vmul.f32 %v1852_v57, %v5255_v21  ;;  %v7237_v15 = vld [vmem:[#allocation38_spill] sm:$0xff] }
 0x180   : > { %v1485_v7 = vmul.f32 1.442695, %v1461_v5  ;;  %v1843_v62 = vsel %vm1842_vm4, %v5249_v24, %v1841_v32  ;;  %v1826_v40 = vmul.f32 0.5, %v1825_v0  ;;  %v1821_v19 = vand.u32 2147483648, %v7236_v30  ;;  %2110 = vperm.xlu1 %3777, %v4231_v50  }
 0x181   : > { %v1462_v11 = vmul.f32 %v7141_v45, %v1444_v38  ;;  %v1846_v12 = vsel %vm1844_vm5, %v1845_v36, %v1843_v62  ;;  %v1817_v63 = vmul.f32 %v1816_v39, %v7236_v30  ;;  %v1855_v6 = vsel %vm1854_vm6, %v5255_v21, %v1853_v14 }
 0x182   : > { %3956 = vpow2.f32 %v1485_v7  ;;  %v1917_v49 = vsub.f32 0.0, %v1846_v12  ;;  %v1827_v32 = vsub.f32 1.5, %v1826_v40  ;;  %v1389_v24 = vmul.f32 %v7237_v15, %v5307_v3  ;;  %v7239_v12 = vld [vmem:[#allocation40_spill] sm:$0xff] }
 0x183   : > { %v1487_v5 = vmul.f32 1.442695, %v1462_v11  ;;  %v1858_v36 = vsel %vm1856_vm7, %v1857_v26, %v1855_v6  ;;  %v1819_v0 = vsel %vm1818_vm8, %v7236_v30, %v1817_v63  ;;  %vm1820_vm9 = vcmp.eq.f32.partialorder %v7236_v30, 0.0  ;;  %v7238_v26 = vld [vmem:[#allocation18_spill] sm:$0xff] }
 0x184   : > { %v1935_v7 = vmul.f32 %v5142_v23, %v1917_v49  ;;  %v1918_v50 = vsub.f32 0.0, %v1858_v36  ;;  %v1822_v62 = vsel %vm1820_vm9, %v1821_v19, %v1819_v0  ;;  %v1828_v38 = vmul.f32 %v7235_v33, %v1827_v32 }
 0x185   : > { %3958 = vpow2.f32 %v1487_v5  ;;  %v462_v57 = vunpack.c.1.s8 %v5760_v22  ;;  %v1915_v3 = vsub.f32 0.0, %v1822_v62  ;;  %v1390_v39 = vmul.f32 0.5, %v1389_v24  ;;  %v7241_v62 = vld [vmem:[#allocation26_spill] sm:$0xff] }
 0x186   : > { %v1961_v1 = vmul.f32 1.442695, %v1935_v7  ;;  %v1936_v21 = vmul.f32 %v5142_v23, %v1918_v50  ;;  %v1829_v11 = vmul.f32 %v1828_v38, %v7238_v26  ;;  %vm1830_vm10 = vcmp.eq.f32.partialorder %v7238_v26, inf }
 0x187   : > { %v1401_v14 = vmul.f32 %v7239_v12, %v5311_v52  ;;  %v1833_v40 = vand.u32 2147483648, %v7238_v26  ;;  %v1933_v33 = vmul.f32 %v5142_v23, %v1915_v3  ;;  %v1391_v49 = vsub.f32 1.5, %v1390_v39 }
 0x188   : > { %v3957_v30 = vpop.eup %3956  ;;  %3960 = vpow2.f32 %v1961_v1  ;;  %v1963_v63 = vmul.f32 1.442695, %v1936_v21  ;;  %v1831_v19 = vsel %vm1830_vm10, %v7238_v26, %v1829_v11  ;;  %vm1832_vm11 = vcmp.eq.f32.partialorder %v7238_v26, 0.0 }
 0x189   : > { %v1402_v5 = vmul.f32 0.5, %v1401_v14  ;;  %v1517_v6 = vmul.f32 1.442695, %v3957_v30  ;;  %v1834_v32 = vsel %vm1832_vm11, %v1833_v40, %v1831_v19  ;;  %v1957_v24 = vmul.f32 1.442695, %v1933_v33 }
 0x18a   : > { %v1392_v36 = vmul.f32 %v7237_v15, %v1391_v49  ;;  %v7240_v52 = vunpack.c.1.s8 %v5757_v51  ;;  %v1916_v50 = vsub.f32 0.0, %v1834_v32  ;;  %vm1394_vm12 = vcmp.eq.f32.partialorder %v7241_v62, inf  ;;  %v7242_v49 = vld [vmem:[#allocation29_spill] sm:$0xff] }
 0x18b   : > { %v3959_v7 = vpop.eup %3958  ;;  %v1403_v38 = vsub.f32 1.5, %v1402_v5  ;;  %3962 = vpow2.f32 %v1963_v63  ;;  %v1861_v39 = vmul.f32 %v5439_v43, %v5499_v47  ;;  %vm1396_vm13 = vcmp.eq.f32.partialorder %v7241_v62, 0.0 }
 0x18c   : > { %v5947_v0 = vcvt.s32.f32 %v7240_v52  ;;  %v1519_v1 = vmul.f32 1.442695, %v3959_v7  ;;  %v1393_v3 = vmul.f32 %v1392_v36, %v7241_v62  ;;  %v1934_v21 = vmul.f32 %v5142_v23, %v1916_v50 }
 0x18d   : > { %3964 = vpow2.f32 %v1957_v24  ;;  %v1397_v15 = vand.u32 2147483648, %v7241_v62  ;;  %v1404_v14 = vmul.f32 %v7239_v12, %v1403_v38  ;;  %v1862_v30 = vmul.f32 0.5, %v1861_v39  ;;  %v7243_v38 = vld [vmem:[#allocation8_spill] sm:$0xff] }
 0x18e   : > { %v3961_v26 = vpop.eup %3960  ;;  %3966 = vpow2.f32 %v1517_v6  ;;  %v1395_v11 = vsel %vm1394_vm12, %v7241_v62, %v1393_v3  ;;  %v1959_v33 = vmul.f32 1.442695, %v1934_v21  ;;  %vm1406_vm14 = vcmp.eq.f32.partialorder %v7242_v49, inf }
 0x18f   : > { %3968 = vpow2.f32 %v1519_v1  ;;  %v1993_v40 = vmul.f32 1.442695, %v3961_v26  ;;  %v1398_v47 = vsel %vm1396_vm13, %v1397_v15, %v1395_v11  ;;  %v1405_v63 = vmul.f32 %v1404_v14, %v7242_v49 }
 0x190   : > { %vm1408_vm15 = vcmp.eq.f32.partialorder %v7242_v49, 0.0  ;;  %v1863_v19 = vsub.f32 1.5, %v1862_v30  ;;  %v1409_v5 = vand.u32 2147483648, %v7242_v49  ;;  %v1447_v6 = vsub.f32 0.0, %v1398_v47 }
 0x191   : > { %3970 = vpow2.f32 %v1993_v40  ;;  %v3963_v32 = vpop.eup %3962  ;;  %v1407_v12 = vsel %vm1406_vm14, %v7242_v49, %v1405_v63  ;;  %v1869_v36 = vand.u32 2147483648, %v5390_v16  ;;  %v1873_v1 = vmul.f32 %v7243_v38, %v5503_v48 }
 0x192   : > { %3972 = vpow2.f32 %v1959_v33  ;;  %v1864_v24 = vmul.f32 %v5439_v43, %v1863_v19  ;;  %v1995_v52 = vmul.f32 1.442695, %v3963_v32  ;;  %v1410_v50 = vsel %vm1408_vm15, %v1409_v5, %v1407_v12  ;;  %v7244_v32 = vld [vmem:[#allocation49_spill] sm:$0xff] }
 0x193   : > { %v3965_v7 = vpop.eup %3964  ;;  %v1465_v62 = vmul.f32 %v7141_v45, %v1447_v6  ;;  %v5969_v39 = vcvt.s32.f32 %v462_v57  ;;  %v1448_v21 = vsub.f32 0.0, %v1410_v50  ;;  %v1874_v14 = vmul.f32 0.5, %v1873_v1 }
 0x194   : > { %v3967_v3 = vpop.eup %3966  ;;  %v1865_v15 = vmul.f32 %v1864_v24, %v5390_v16  ;;  %3974 = vpow2.f32 %v1995_v52  ;;  %v1989_v43 = vmul.f32 1.442695, %v3965_v7  ;;  %v463_v30 = vunpack.c.2.s8 %v5757_v51  ;;  %v7246_v52 = vld [vmem:[#allocation25_spill] sm:$0xff] }
 0x195   : > { %v3969_v26 = vpop.eup %3968  ;;  %v1493_v11 = vmul.f32 1.442695, %v1465_v62  ;;  %v464_v40 = vunpack.c.2.s8 %v5760_v22  ;;  %v1466_v33 = vmul.f32 %v7141_v45, %v1448_v21  ;;  %v5980_v49 = vmul.f32 %v3967_v3, %v5834_v20 }
 0x196   : > { %v1867_v48 = vsel %vm1866_vm0, %v5390_v16, %v1865_v15  ;;  %v1875_v63 = vsub.f32 1.5, %v1874_v14  ;;  %v5983_v5 = vmul.f32 %v3969_v26, %v5842_v31  ;;  %vm1878_vm2 = vcmp.eq.f32.partialorder %v7244_v32, inf  ;;  %v7245_v16 = vld [vmem:[#allocation35_spill] sm:$0xff]  ;;  %v7247_v26 = vld [vmem:[#allocation36_spill] sm:$0xff] }
 0x197   : > { %v3971_v57 = vpop.eup %3970  ;;  %3976 = vpow2.f32 %v1493_v11  ;;  %v1870_v47 = vsel %vm1868_vm1, %v1869_v36, %v1867_v48  ;;  %v1495_v6 = vmul.f32 1.442695, %v1466_v33  ;;  %v1365_v50 = vmul.f32 %v7246_v52, %v7245_v16 }
 0x198   : > { %v3973_v19 = vpop.eup %3972  ;;  %v1919_v12 = vsub.f32 0.0, %v1870_v47  ;;  %3978 = vpow2.f32 %v1989_v43  ;;  %v1876_v7 = vmul.f32 %v7243_v38, %v1875_v63  ;;  %v5990_v62 = vmul.f32 %v3971_v57, %v5947_v0  ;;  %v7248_v43 = vld [vmem:[#allocation27_spill] sm:$0xff] }
 0x199   : > { %v1991_v24 = vmul.f32 1.442695, %v3973_v19  ;;  %3980 = vpow2.f32 %v1495_v6  ;;  %v1881_v36 = vand.u32 2147483648, %v7244_v32  ;;  %vm1880_vm3 = vcmp.eq.f32.partialorder %v7244_v32, 0.0 }
 0x19a   : > { %v1937_v1 = vmul.f32 %v5142_v23, %v1919_v12  ;;  %v3975_v3 = vpop.eup %3974  ;;  %v1877_v21 = vmul.f32 %v1876_v7, %v7244_v32  ;;  %v1366_v15 = vmul.f32 0.5, %v1365_v50  ;;  %v1377_v38 = vmul.f32 %v7248_v43, %v7247_v26 }
 0x19b   : > { %v5999_v11 = vmul.f32 %v3975_v3, %v5969_v39  ;;  %v6001_v14 = vcvt.s32.f32 %v463_v30  ;;  %v6003_v33 = vcvt.s32.f32 %v464_v40  ;;  %3982 = vpow2.f32 %v1991_v24 }
 0x19c   : > { %v1965_v48 = vmul.f32 1.442695, %v1937_v1  ;;  %v1879_v47 = vsel %vm1878_vm2, %v7244_v32, %v1877_v21  ;;  %v1367_v63 = vsub.f32 1.5, %v1366_v15  ;;  %v1378_v19 = vmul.f32 0.5, %v1377_v38  ;;  %v7249_v32 = vld [vmem:[#allocation19_spill] sm:$0xff]  ;;  %v7250_v38 = vld [vmem:[#allocation20_spill] sm:$0xff] }
 0x19d   : > { %v3977_v57 = vpop.eup %3976  ;;  %v2036_v6 = vadd.f32 %v5999_v11, %v5990_v62  ;;  %v1882_v7 = vsel %vm1880_vm3, %v1881_v36, %v1879_v47  ;;  %v1561_v30 = vadd.f32 %v5983_v5, %v5980_v49  ;;  %vm1370_vm4 = vcmp.eq.f32.partialorder %v7249_v32, inf }
 0x19e   : > { %v1525_v12 = vmul.f32 1.442695, %v3977_v57  ;;  %3984 = vpow2.f32 %v1965_v48  ;;  %v3979_v16 = vpop.eup %3978  ;;  %v1920_v40 = vsub.f32 0.0, %v1882_v7  ;;  %v1368_v50 = vmul.f32 %v7246_v52, %v1367_v63 }
 0x19f   : > { %v1379_v24 = vsub.f32 1.5, %v1378_v19  ;;  %v3981_v1 = vpop.eup %3980  ;;  %vm1372_vm5 = vcmp.eq.f32.partialorder %v7249_v32, 0.0  ;;  %v1373_v3 = vand.u32 2147483648, %v7249_v32  ;;  %v6020_v52 = vmul.f32 %v3979_v16, %v5834_v20  ;;  %v7251_v16 = vld [vmem:[#allocation48_spill] sm:$0xff] }
 0x1a0   : > { %3986 = vpow2.f32 %v1525_v12  ;;  %v1527_v21 = vmul.f32 1.442695, %v3981_v1  ;;  %v1938_v36 = vmul.f32 %v5142_v23, %v1920_v40  ;;  %v1369_v15 = vmul.f32 %v1368_v50, %v7249_v32  ;;  %1562 = vadd.xlane.f32.xlu0 %v1561_v30  ;;  %v7252_v30 = vld [vmem:[#allocation46_spill] sm:$0xff] }
 0x1a1   : > { %v1380_v26 = vmul.f32 %v7248_v43, %v1379_v24  ;;  %vm1382_vm6 = vcmp.eq.f32.partialorder %v7250_v38, inf  ;;  %vm1384_vm7 = vcmp.eq.f32.partialorder %v7250_v38, 0.0  ;;  %v2685_v48 = vmul.f32 %v5793_v18, %v5830_v8  ;;  %v3983_v57 = vpop.eup %3982 }
 0x1a2   : > { %2037 = vadd.xlane.f32.xlu2 %v2036_v6  ;;  %3988 = vpow2.f32 %v1527_v21  ;;  %v1967_v47 = vmul.f32 1.442695, %v1938_v36  ;;  %v1371_v63 = vsel %vm1370_vm4, %v7249_v32, %v1369_v15  ;;  %v1385_v12 = vand.u32 2147483648, %v7250_v38 }
 0x1a3   : > { %v1381_v19 = vmul.f32 %v1380_v26, %v7250_v38  ;;  %v1374_v43 = vsel %vm1372_vm5, %v1373_v3, %v1371_v63  ;;  %v2686_v7 = vmul.f32 0.5, %v2685_v48  ;;  %v1885_v40 = vmul.f32 %v7252_v30, %v7251_v16  ;;  %v7253_v48 = vld [vmem:[#allocation59_spill] sm:$0xff] }
 0x1a4   : > { %v3985_v6 = vpop.eup %3984  ;;  %3990 = vpow2.f32 %v1967_v47  ;;  %v1445_v24 = vsub.f32 0.0, %v1374_v43  ;;  %v6035_v21 = vmul.f32 %v3983_v57, %v5842_v31  ;;  %v2697_v3 = vmul.f32 %v5814_v60, %v5848_v25  ;;  %v7254_v47 = vld [vmem:[#allocation47_spill] sm:$0xff] }
 0x1a5   : > { %v1997_v50 = vmul.f32 1.442695, %v3985_v6  ;;  %v1383_v8 = vsel %vm1382_vm6, %v7250_v38, %v1381_v19  ;;  %v2687_v32 = vsub.f32 1.5, %v2686_v7  ;;  %v6046_v63 = vmul.f32 %v7254_v47, %v7253_v48 }
 0x1a6   : > { %v3987_v1 = vpop.eup %3986  ;;  %v1386_v36 = vsel %vm1384_vm7, %v1385_v12, %v1383_v8  ;;  %v1463_v26 = vmul.f32 %v7141_v45, %v1445_v24  ;;  %vm2690_vm8 = vcmp.eq.f32.partialorder %v5709_v2, inf  ;;  %v2698_v19 = vmul.f32 0.5, %v2697_v3 }
 0x1a7   : > { %3992 = vpow2.f32 %v1997_v50  ;;  %v1446_v15 = vsub.f32 0.0, %v1386_v36  ;;  %v6049_v57 = vmul.f32 %v3987_v1, %v6001_v14  ;;  %v2688_v38 = vmul.f32 %v5793_v18, %v2687_v32 }
 0x1a8   : > { %v3989_v6 = vpop.eup %3988  ;;  %v1489_v43 = vmul.f32 1.442695, %v1463_v26  ;;  %vm2692_vm9 = vcmp.eq.f32.partialorder %v5709_v2, 0.0  ;;  %v2693_v12 = vand.u32 2147483648, %v5709_v2  ;;  %v2033_v7 = vadd.f32 %v6035_v21, %v6020_v52 }
 0x1a9   : > { %7255 = vst [vmem:[#allocation32_spill] sm:$0xff] %v6049_v57  ;;  %v1464_v25 = vmul.f32 %v7141_v45, %v1446_v15  ;;  %v6059_v16 = vmul.f32 %v3989_v6, %v6003_v33  ;;  %v2689_v50 = vmul.f32 %v2688_v38, %v5709_v2  ;;  %v2699_v18 = vsub.f32 1.5, %v2698_v19 }
 0x1aa   : > { %v3991_v8 = vpop.eup %3990  ;;  %3994 = vpow2.f32 %v1489_v43  ;;  %vm2702_vm10 = vcmp.eq.f32.partialorder %v5725_v42, inf  ;;  %v1886_v1 = vmul.f32 0.5, %v1885_v40  ;;  %2034 = vadd.xlane.f32.xlu1 %v2033_v7  ;;  %vm2704_vm11 = vcmp.eq.f32.partialorder %v5725_v42, 0.0  ;;  %v7257_v43 = vld [vmem:[#allocation43_spill] sm:$0xff] }
 0x1ab   : > { %7256 = vst [vmem:[#allocation24_spill] sm:$0xff] %v6059_v16  ;;  %v1491_v24 = vmul.f32 1.442695, %v1464_v25  ;;  %v1567_v36 = vadd.f32 %v6059_v16, %v6049_v57  ;;  %v1999_v32 = vmul.f32 1.442695, %v3991_v8  ;;  %v2691_v3 = vsel %vm2690_vm8, %v5709_v2, %v2689_v50  ;;  %v7258_v8 = vld [vmem:[#allocation73_spill] sm:$0xff] }
 0x1ac   : > { %v2700_v15 = vmul.f32 %v5814_v60, %v2699_v18  ;;  %v2694_v48 = vsel %vm2692_vm9, %v2693_v12, %v2691_v3  ;;  %v2705_v40 = vand.u32 2147483648, %v5725_v42  ;;  %v6075_v6 = vstv %s6041_s0  ;;  %v7303_v16 = vld [vmem:[#allocation88_spill] sm:$0xff] }
 0x1ad   : > { %v3993_v26 = vpop.eup %3992  ;;  %3996 = vpow2.f32 %v1491_v24  ;;  %1568 = vadd.xlane.f32.xlu0 %v1567_v36  ;;  %v2853_v19 = vsub.f32 0.0, %v2694_v48  ;;  %v1413_v60 = vmul.f32 %v5635_v13, %v5735_v34  ;;  %v1887_v25 = vsub.f32 1.5, %v1886_v1 }
 0x1ae   : > { %3998 = vpow2.f32 %v1999_v32  ;;  %v2701_v38 = vmul.f32 %v2700_v15, %v5725_v42  ;;  %vm1890_vm12 = vcmp.eq.f32.partialorder %v7257_v43, inf  ;;  %vm1892_vm13 = vcmp.eq.f32.partialorder %v7257_v43, 0.0 }
 0x1af   : > { %v6082_v2 = vmul.f32 %v3993_v26, %v6001_v14  ;;  %v2871_v7 = vmul.f32 %v6075_v6, %v2853_v19  ;;  %vm1418_vm14 = vcmp.eq.f32.partialorder %v5595_v61, inf  ;;  %v1414_v18 = vmul.f32 0.5, %v1413_v60 }
 0x1b0   : > { %v2703_v12 = vsel %vm2702_vm10, %v5725_v42, %v2701_v38  ;;  %v3995_v50 = vpop.eup %3994  ;;  %vm1420_vm15 = vcmp.eq.f32.partialorder %v5595_v61, 0.0  ;;  %v1425_v24 = vmul.f32 %v7258_v8, %v5744_v58  ;;  %v1421_v3 = vand.u32 2147483648, %v5595_v61  ;;  %v7259_v38 = vld [vmem:[#allocation5_spill] sm:$0xff] }
 0x1b1   : > { %v2706_v34 = vsel %vm2704_vm11, %v2705_v40, %v2703_v12  ;;  %v1521_v1 = vmul.f32 1.442695, %v3995_v50  ;;  %v2889_v32 = vmul.f32 1.442695, %v2871_v7  ;;  %v1415_v26 = vsub.f32 1.5, %v1414_v18 }
 0x1b2   : > { %v2854_v36 = vsub.f32 0.0, %v2706_v34  ;;  %v1426_v48 = vmul.f32 0.5, %v1425_v24  ;;  %vm1430_vm0 = vcmp.eq.f32.partialorder %v7259_v38, inf  ;;  %v1888_v19 = vmul.f32 %v7252_v30, %v1887_v25 }
 0x1b3   : > { %v3997_v15 = vpop.eup %3996  ;;  %4000 = vpow2.f32 %v1521_v1  ;;  %v1893_v12 = vand.u32 2147483648, %v7257_v43  ;;  %v1416_v7 = vmul.f32 %v5635_v13, %v1415_v26  ;;  %v1898_v30 = vmul.f32 0.5, %v6046_v63  ;;  %v7261_v26 = vld [vmem:[#allocation7_spill] sm:$0xff] }
 0x1b4   : > { %v3999_v42 = vpop.eup %3998  ;;  %v1523_v40 = vmul.f32 1.442695, %v3997_v15  ;;  %v2872_v60 = vmul.f32 %v6075_v6, %v2854_v36  ;;  %4002 = vpow2.f32 %v2889_v32  ;;  %v1427_v50 = vsub.f32 1.5, %v1426_v48 }
 0x1b5   : > { %v6100_v58 = vmul.f32 %v3999_v42, %v6003_v33  ;;  %v1889_v18 = vmul.f32 %v1888_v19, %v7257_v43  ;;  %v1417_v24 = vmul.f32 %v1416_v7, %v5595_v61  ;;  %vm1432_vm1 = vcmp.eq.f32.partialorder %v7259_v38, 0.0 }
 0x1b6   : > { %4004 = vpow2.f32 %v1523_v40  ;;  %v2891_v34 = vmul.f32 1.442695, %v2872_v60  ;;  %v1428_v1 = vmul.f32 %v7258_v8, %v1427_v50  ;;  %v1433_v36 = vand.u32 2147483648, %v7259_v38 }
 0x1b7   : > { %7260 = vst [vmem:[#allocation17_spill] sm:$0xff] %v6100_v58  ;;  %v2039_v25 = vadd.f32 %v6100_v58, %v6082_v2  ;;  %v1891_v13 = vsel %vm1890_vm12, %v7257_v43, %v1889_v18  ;;  %v1899_v32 = vsub.f32 1.5, %v1898_v30  ;;  %v1419_v63 = vsel %vm1418_vm14, %v5595_v61, %v1417_v24 }
 0x1b8   : > { %4006 = vpow2.f32 %v2891_v34  ;;  %v1429_v15 = vmul.f32 %v1428_v1, %v7259_v38  ;;  %v1894_v8 = vsel %vm1892_vm13, %v1893_v12, %v1891_v13  ;;  %vm1902_vm2 = vcmp.eq.f32.partialorder %v7261_v26, inf }
 0x1b9   : > { %2040 = vadd.xlane.f32.xlu2 %v2039_v25  ;;  %v4001_v48 = vpop.eup %4000  ;;  %v1422_v19 = vsel %vm1420_vm15, %v1421_v3, %v1419_v63  ;;  %v1900_v42 = vmul.f32 %v7254_v47, %v1899_v32  ;;  %v1905_v40 = vand.u32 2147483648, %v7261_v26  ;;  %v1921_v60 = vsub.f32 0.0, %v1894_v8 }
 0x1ba   : > { %v4003_v7 = vpop.eup %4002  ;;  %v6126_v50 = vmul.f32 %v4001_v48, %v5947_v0  ;;  %v1431_v43 = vsel %vm1430_vm0, %v7259_v38, %v1429_v15  ;;  %v1449_v12 = vsub.f32 0.0, %v1422_v19  ;;  %v2709_v34 = vmul.f32 %v5770_v9, %v5822_v41 }
 0x1bb   : > { %v2921_v61 = vmul.f32 1.442695, %v4003_v7  ;;  %v1434_v47 = vsel %vm1432_vm1, %v1433_v36, %v1431_v43  ;;  %v1901_v3 = vmul.f32 %v1900_v42, %v7261_v26  ;;  %v1939_v30 = vmul.f32 %v5142_v23, %v1921_v60 }
 0x1bc   : > { %v4005_v18 = vpop.eup %4004  ;;  %v1450_v24 = vsub.f32 0.0, %v1434_v47  ;;  %v1467_v1 = vmul.f32 %v7141_v45, %v1449_v12  ;;  %vm1904_vm3 = vcmp.eq.f32.partialorder %v7261_v26, 0.0  ;;  %v465_v41 = vunpack.c.3.s8 %v5757_v51 }
 0x1bd   : > { %v6138_v25 = vmul.f32 %v4005_v18, %v5969_v39  ;;  %4008 = vpow2.f32 %v2921_v61  ;;  %v1903_v38 = vsel %vm1902_vm2, %v7261_v26, %v1901_v3  ;;  %v1969_v36 = vmul.f32 1.442695, %v1939_v30 }
 0x1be   : > { %v4007_v13 = vpop.eup %4006  ;;  %v1468_v15 = vmul.f32 %v7141_v45, %v1450_v24  ;;  %v1497_v8 = vmul.f32 1.442695, %v1467_v1  ;;  %v6151_v48 = vmul.f32 %v5877_v54, %v5796_v28  ;;  %v1906_v19 = vsel %vm1904_vm3, %v1905_v40, %v1903_v38  ;;  %v7262_v40 = vld [vmem:[#allocation62_spill] sm:$0xff]  ;;  %v7264_v1 = vld [vmem:[#allocation37_spill] sm:$0xff] }
 0x1bf   : > { %v1564_v32 = vadd.f32 %v6138_v25, %v6126_v50  ;;  %v2923_v63 = vmul.f32 1.442695, %v4007_v13  ;;  %4010 = vpow2.f32 %v1969_v36  ;;  %v2710_v42 = vmul.f32 0.5, %v2709_v34  ;;  %v7263_v34 = vld [vmem:[#allocation9_spill] sm:$0xff] }
 0x1c0   : > { %v466_v51 = vunpack.c.3.s8 %v5760_v22  ;;  %v1499_v26 = vmul.f32 1.442695, %v1468_v15  ;;  %v1922_v60 = vsub.f32 0.0, %v1906_v19  ;;  %v6154_v7 = vcvt.s32.f32 %v465_v41 }
 0x1c1   : > { %1565 = vadd.xlane.f32.xlu1 %v1564_v32  ;;  %4012 = vpow2.f32 %v2923_v63  ;;  %v2711_v43 = vsub.f32 1.5, %v2710_v42  ;;  %v2721_v45 = vmul.f32 %v5788_v46, %v5826_v27  ;;  %vm2714_vm4 = vcmp.eq.f32.partialorder %v5698_v53, inf }
 0x1c2   : > { %4014 = vpow2.f32 %v1497_v8  ;;  %v1940_v12 = vmul.f32 %v5142_v23, %v1922_v60  ;;  %v2661_v18 = vmul.f32 %v7263_v34, %v7262_v40  ;;  %vm2716_vm5 = vcmp.eq.f32.partialorder %v5698_v53, 0.0 }
 0x1c3   : > { %4016 = vpow2.f32 %v1499_v26  ;;  %v4009_v61 = vpop.eup %4008  ;;  %v2712_v22 = vmul.f32 %v5770_v9, %v2711_v43  ;;  %v2717_v47 = vand.u32 2147483648, %v5698_v53  ;;  %v2722_v3 = vmul.f32 0.5, %v2721_v45 }
 0x1c4   : > { %v1971_v30 = vmul.f32 1.442695, %v1940_v12  ;;  %vm2726_vm6 = vcmp.eq.f32.partialorder %v5700_v55, inf  ;;  %v2189_v27 = vmul.f32 %v5712_v35, %v5782_v37  ;;  %v2201_v23 = vmul.f32 %v5719_v44, %v5786_v29  ;;  %v7266_v37 = vld [vmem:[#allocation39_spill] sm:$0xff] }
 0x1c5   : > { %v4011_v24 = vpop.eup %4010  ;;  %v6171_v13 = vmul.f32 %v4009_v61, %v7264_v1  ;;  %v2713_v9 = vmul.f32 %v2712_v22, %v5698_v53  ;;  %v2723_v41 = vsub.f32 1.5, %v2722_v3  ;;  %vm2728_vm7 = vcmp.eq.f32.partialorder %v5700_v55, 0.0 }
 0x1c6   : > { %4018 = vpow2.f32 %v1971_v30  ;;  %v2001_v36 = vmul.f32 1.442695, %v4011_v24  ;;  %v2729_v32 = vand.u32 2147483648, %v5700_v55  ;;  %v2190_v63 = vmul.f32 0.5, %v2189_v27 }
 0x1c7   : > { %7265 = vst [vmem:[#allocation38_spill] sm:$0xff] %v6171_v13  ;;  %v4013_v38 = vpop.eup %4012  ;;  %v2715_v29 = vsel %vm2714_vm4, %v5698_v53, %v2713_v9  ;;  %v2724_v19 = vmul.f32 %v5788_v46, %v2723_v41  ;;  %v2202_v42 = vmul.f32 0.5, %v2201_v23  ;;  %v6190_v3 = vcvt.s32.f32 %v466_v51  ;;  %v1551_v53 = vpop.xlane.xlu0 %1550 }
 0x1c8   : > { %v4015_v15 = vpop.eup %4014  ;;  %v6177_v8 = vmul.f32 %v4013_v38, %v7266_v37  ;;  %4020 = vpow2.f32 %v2001_v36  ;;  %v2718_v43 = vsel %vm2716_vm5, %v2717_v47, %v2715_v29  ;;  %v2191_v45 = vsub.f32 1.5, %v2190_v63 }
 0x1c9   : > { %v4017_v26 = vpop.eup %4016  ;;  %v1529_v60 = vmul.f32 1.442695, %v4015_v15  ;;  %v2725_v61 = vmul.f32 %v2724_v19, %v5700_v55  ;;  %v2855_v22 = vsub.f32 0.0, %v2718_v43  ;;  %vm2194_vm8 = vcmp.eq.f32.partialorder %v5646_v56, inf }
 0x1ca   : > { %7267 = vst [vmem:[#allocation18_spill] sm:$0xff] %v6177_v8  ;;  %v2968_v12 = vadd.f32 %v6177_v8, %v6171_v13  ;;  %v1531_v40 = vmul.f32 1.442695, %v4017_v26  ;;  %v2192_v46 = vmul.f32 %v5712_v35, %v2191_v45  ;;  %vm2196_vm9 = vcmp.eq.f32.partialorder %v5646_v56, 0.0  ;;  %v7301_v8 = vld [vmem:[#allocation65_spill] sm:$0xff] }
 0x1cb   : > { %4022 = vpow2.f32 %v1529_v60  ;;  %v2727_v47 = vsel %vm2726_vm6, %v5700_v55, %v2725_v61  ;;  %v2873_v30 = vmul.f32 %v6075_v6, %v2855_v22  ;;  %v2197_v35 = vand.u32 2147483648, %v5646_v56 }
 0x1cc   : > { %2969 = vadd.xlane.f32.xlu0 %v2968_v12  ;;  %4024 = vpow2.f32 %v1531_v40  ;;  %v4019_v27 = vpop.eup %4018  ;;  %v2730_v51 = vsel %vm2728_vm7, %v2729_v32, %v2727_v47  ;;  %v2193_v23 = vmul.f32 %v2192_v46, %v5646_v56  ;;  %v2203_v24 = vsub.f32 1.5, %v2202_v42 }
 0x1cd   : > { %v2003_v9 = vmul.f32 1.442695, %v4019_v27  ;;  %v2856_v41 = vsub.f32 0.0, %v2730_v51  ;;  %v2893_v38 = vmul.f32 1.442695, %v2873_v30  ;;  %v2662_v36 = vmul.f32 0.5, %v2661_v18 }
 0x1ce   : > { %v4021_v63 = vpop.eup %4020  ;;  %vm1573_vm10 = vcmp.gt.f32.partialorder %v1551_v53, 0.0  ;;  %v2195_v15 = vsel %vm2194_vm8, %v5646_v56, %v2193_v23  ;;  %v2204_v29 = vmul.f32 %v5719_v44, %v2203_v24  ;;  %vm2206_vm11 = vcmp.eq.f32.partialorder %v5650_v10, inf }
 0x1cf   : > { %4026 = vpow2.f32 %v2003_v9  ;;  %v2874_v55 = vmul.f32 %v6075_v6, %v2856_v41  ;;  %v2198_v32 = vsel %vm2196_vm9, %v2197_v35, %v2195_v15  ;;  %v2209_v19 = vand.u32 2147483648, %v5650_v10  ;;  %v7270_v35 = vld [vmem:[#allocation50_spill] sm:$0xff]  ;;  %v7271_v9 = vld [vmem:[#allocation63_spill] sm:$0xff] }
 0x1d0   : > { %4028 = vpow2.f32 %v2893_v38  ;;  %v2205_v42 = vmul.f32 %v2204_v29, %v5650_v10  ;;  %vm2208_vm12 = vcmp.eq.f32.partialorder %v5650_v10, 0.0  ;;  %v2379_v26 = vsub.f32 0.0, %v2198_v32  ;;  %v7272_v41 = vld [vmem:[#allocation58_spill] sm:$0xff] }
 0x1d1   : > { %v4023_v18 = vpop.eup %4022  ;;  %v2895_v43 = vmul.f32 1.442695, %v2874_v55  ;;  %v6218_v45 = vstv %s6188_s17  ;;  %v2663_v12 = vsub.f32 1.5, %v2662_v36  ;;  %v1581_v40 = vsel %vm1573_vm10, %v1551_v53, 1.0 }
 0x1d2   : > { %v4025_v60 = vpop.eup %4024  ;;  %v6215_v44 = vmul.f32 %v4023_v18, %v6154_v7  ;;  %v2207_v61 = vsel %vm2206_vm11, %v5650_v10, %v2205_v42  ;;  %v2397_v22 = vmul.f32 %v6218_v45, %v2379_v26  ;;  %v6229_v46 = vmul.f32 %v4021_v63, %v6154_v7  ;;  %v7274_v26 = vld [vmem:[#allocation95_spill] sm:$0xff] }
 0x1d3   : > { %v6221_v56 = vmul.f32 %v4025_v60, %v6190_v3  ;;  %4030 = vpow2.f32 %v2895_v43  ;;  %v2210_v47 = vsel %vm2208_vm12, %v2209_v19, %v2207_v61  ;;  %v2664_v30 = vmul.f32 %v7263_v34, %v2663_v12  ;;  %v7275_v60 = vld [vmem:[#allocation82_spill] sm:$0xff]  ;;  %v7276_v61 = vld [vmem:[#allocation99_spill] sm:$0xff] }
 0x1d4   : > { %7268 = vst [vmem:[#allocation40_spill] sm:$0xff] %v6215_v44  ;;  %v2380_v51 = vsub.f32 0.0, %v2210_v47  ;;  %v2413_v23 = vmul.f32 1.442695, %v2397_v22  ;;  %vm2666_vm13 = vcmp.eq.f32.partialorder %v7270_v35, inf  ;;  %vm2668_vm14 = vcmp.eq.f32.partialorder %v7270_v35, 0.0 }
 0x1d5   : > { %7269 = vst [vmem:[#allocation26_spill] sm:$0xff] %v6221_v56  ;;  %v1570_v27 = vadd.f32 %v6221_v56, %v6215_v44  ;;  %v4027_v53 = vpop.eup %4026  ;;  %v2665_v24 = vmul.f32 %v2664_v30, %v7270_v35  ;;  %v2669_v10 = vand.u32 2147483648, %v7270_v35  ;;  %v2673_v38 = vmul.f32 %v7272_v41, %v7271_v9 }
 0x1d6   : > { %v4029_v36 = vpop.eup %4028  ;;  %v2272_v34 = vmul.f32 %v5884_v17, %v5812_v59  ;;  %v6243_v63 = vmul.f32 %v4027_v53, %v6190_v3  ;;  %v2398_v15 = vmul.f32 %v6218_v45, %v2380_v51  ;;  %4032 = vpow2.f32 %v2413_v23 }
 0x1d7   : > { %1571 = vadd.xlane.f32.xlu2 %v1570_v27  ;;  %4034 = vrcp.f32 %v1581_v40  ;;  %v2925_v29 = vmul.f32 1.442695, %v4029_v36  ;;  %v2667_v55 = vsel %vm2666_vm13, %v7270_v35, %v2665_v24  ;;  %v2674_v32 = vmul.f32 0.5, %v2673_v38  ;;  %v7277_v40 = vld [vmem:[#allocation51_spill] sm:$0xff] }
 0x1d8   : > { %7273 = vst [vmem:[#allocation29_spill] sm:$0xff] %v6243_v63  ;;  %v2042_v19 = vadd.f32 %v6243_v63, %v6229_v46  ;;  %v2415_v18 = vmul.f32 1.442695, %v2398_v15  ;;  %v2670_v42 = vsel %vm2668_vm14, %v2669_v10, %v2667_v55  ;;  %v2733_v43 = vmul.f32 %v7275_v60, %v7274_v26  ;;  %v7278_v26 = vld [vmem:[#allocation60_spill] sm:$0xff] }
 0x1d9   : > { %v4031_v12 = vpop.eup %4030  ;;  %v6253_v22 = vmul.f32 %v5893_v4, %v7276_v61  ;;  %4036 = vpow2.f32 %v2925_v29  ;;  %v2675_v47 = vsub.f32 1.5, %v2674_v32  ;;  %vm2678_vm15 = vcmp.eq.f32.partialorder %v7277_v40, inf }
 0x1da   : > { %2043 = vadd.xlane.f32.xlu1 %v2042_v19  ;;  %v2927_v30 = vmul.f32 1.442695, %v4031_v12  ;;  %4038 = vpow2.f32 %v2415_v18  ;;  %vm2680_vm0 = vcmp.eq.f32.partialorder %v7277_v40, 0.0  ;;  %v2851_v27 = vsub.f32 0.0, %v2670_v42 }
 0x1db   : > { %v2676_v51 = vmul.f32 %v7272_v41, %v2675_v47  ;;  %v2681_v23 = vand.u32 2147483648, %v7277_v40  ;;  %v2261_v35 = vmul.f32 %v5877_v54, %v6151_v48  ;;  %v2734_v53 = vmul.f32 0.5, %v2733_v43 }
 0x1dc   : > { %v4033_v24 = vpop.eup %4032  ;;  %4040 = vpow2.f32 %v2927_v30  ;;  %v2869_v10 = vmul.f32 %v6075_v6, %v2851_v27  ;;  %vm2266_vm1 = vcmp.eq.f32.partialorder %v5796_v28, inf  ;;  %v2273_v9 = vmul.f32 %v5884_v17, %v2272_v34 }
 0x1dd   : > { %v6264_v38 = vpop.eup %4034  ;;  %v2445_v36 = vmul.f32 1.442695, %v4033_v24  ;;  %v2677_v15 = vmul.f32 %v2676_v51, %v7277_v40  ;;  %v2262_v41 = vmul.f32 0.5, %v2261_v35  ;;  %vm2268_vm2 = vcmp.eq.f32.partialorder %v5796_v28, 0.0 }
 0x1de   : > { %v2885_v29 = vmul.f32 1.442695, %v2869_v10  ;;  %v2269_v48 = vand.u32 2147483648, %v5796_v28  ;;  %v2274_v55 = vmul.f32 0.5, %v2273_v9  ;;  %vm2278_vm3 = vcmp.eq.f32.partialorder %v5812_v59, inf  ;;  %v2023_v10 = vpop.xlane.xlu2 %2022 }
 0x1df   : > { %v4037_v32 = vpop.eup %4036  ;;  %4042 = vpow2.f32 %v2445_v36  ;;  %v2679_v34 = vsel %vm2678_vm15, %v7277_v40, %v2677_v15  ;;  %v2263_v19 = vsub.f32 1.5, %v2262_v41  ;;  %v2735_v18 = vsub.f32 1.5, %v2734_v53  ;;  %v7280_v36 = vld [vmem:[#allocation71_spill] sm:$0xff]  ;;  %v7281_v40 = vld [vmem:[#allocation61_spill] sm:$0xff] }
 0x1e0   : > { %v4039_v42 = vpop.eup %4038  ;;  %v6274_v43 = vmul.f32 %v4037_v32, %v7278_v26  ;;  %v2682_v12 = vsel %vm2680_vm0, %v2681_v23, %v2679_v34  ;;  %4044 = vpow2.f32 %v2885_v29  ;;  %v2275_v47 = vsub.f32 1.5, %v2274_v55  ;;  %v7283_v29 = vld [vmem:[#allocation96_spill] sm:$0xff] }
 0x1e1   : > { %v2447_v30 = vmul.f32 1.442695, %v4039_v42  ;;  %v2852_v27 = vsub.f32 0.0, %v2682_v12  ;;  %v2264_v51 = vmul.f32 %v5877_v54, %v2263_v19  ;;  %v2736_v35 = vmul.f32 %v7275_v60, %v2735_v18  ;;  %v7284_v55 = vld [vmem:[#allocation84_spill] sm:$0xff] }
 0x1e2   : > { %7279 = vst [vmem:[#allocation8_spill] sm:$0xff] %v6274_v43  ;;  %v4041_v24 = vpop.eup %4040  ;;  %v2276_v9 = vmul.f32 %v5884_v17, %v2275_v47  ;;  %vm2280_vm4 = vcmp.eq.f32.partialorder %v5812_v59, 0.0  ;;  %v2281_v53 = vand.u32 2147483648, %v5812_v59  ;;  %vm2738_vm5 = vcmp.eq.f32.partialorder %v7280_v36, inf }
 0x1e3   : > { %v6285_v23 = vmul.f32 %v4041_v24, %v7281_v40  ;;  %4046 = vpow2.f32 %v2447_v30  ;;  %v2870_v15 = vmul.f32 %v6075_v6, %v2852_v27  ;;  %v2265_v54 = vmul.f32 %v2264_v51, %v5796_v28 }
 0x1e4   : > { %v2277_v60 = vmul.f32 %v2276_v9, %v5812_v59  ;;  %v2737_v41 = vmul.f32 %v2736_v35, %v7280_v36  ;;  %v2741_v17 = vand.u32 2147483648, %v7280_v36  ;;  %v2745_v32 = vmul.f32 %v7284_v55, %v7283_v29  ;;  %v7285_v9 = vld [vmem:[#allocation10_spill] sm:$0xff] }
 0x1e5   : > { %7282 = vst [vmem:[#allocation49_spill] sm:$0xff] %v6285_v23  ;;  %v4043_v34 = vpop.eup %4042  ;;  %v2971_v19 = vadd.f32 %v6285_v23, %v6274_v43  ;;  %vm2045_vm6 = vcmp.gt.f32.partialorder %v2023_v10, 0.0  ;;  %v2887_v18 = vmul.f32 1.442695, %v2870_v15  ;;  %v2267_v42 = vsel %vm2266_vm1, %v5796_v28, %v2265_v54 }
 0x1e6   : > { %v4045_v12 = vpop.eup %4044  ;;  %v2270_v47 = vsel %vm2268_vm2, %v2269_v48, %v2267_v42  ;;  %v2279_v30 = vsel %vm2278_vm3, %v5812_v59, %v2277_v60  ;;  %v2739_v27 = vsel %vm2738_vm5, %v7280_v36, %v2737_v41  ;;  %vm2740_vm7 = vcmp.eq.f32.partialorder %v7280_v36, 0.0  ;;  %v7287_v36 = vld [vmem:[#allocation78_spill] sm:$0xff] }
 0x1e7   : > { %2972 = vadd.xlane.f32.xlu0 %v2971_v19  ;;  %4048 = vpow2.f32 %v2887_v18  ;;  %v2917_v51 = vmul.f32 1.442695, %v4045_v12  ;;  %v2282_v35 = vsel %vm2280_vm4, %v2281_v53, %v2279_v30  ;;  %v2385_v24 = vsub.f32 0.0, %v2270_v47  ;;  %v7288_v19 = vld [vmem:[#allocation67_spill] sm:$0xff]  ;;  %v7289_v12 = vld [vmem:[#allocation13_spill] sm:$0xff] }
 0x1e8   : > { %v6311_v28 = vmul.f32 %v4043_v34, %v7285_v9  ;;  %v2386_v48 = vsub.f32 0.0, %v2282_v35  ;;  %v2742_v15 = vsel %vm2740_vm7, %v2741_v17, %v2739_v27  ;;  %v2746_v54 = vmul.f32 0.5, %v2745_v32  ;;  %v7291_v34 = vld [vmem:[#allocation31_spill] sm:$0xff]  ;;  %v7292_v47 = vld [vmem:[#allocation101_spill] sm:$0xff] }
 0x1e9   : > { %v4047_v60 = vpop.eup %4046  ;;  %v2053_v29 = vsel %vm2045_vm6, %v2023_v10, 1.0  ;;  %v2403_v41 = vmul.f32 %v6218_v45, %v2385_v24  ;;  %v2857_v42 = vsub.f32 0.0, %v2742_v15  ;;  %v2213_v18 = vmul.f32 %v7288_v19, %v7287_v36  ;;  %v2026_v15 = vpop.xlane.xlu1 %2025  ;;  %v7294_v36 = vld [vmem:[#allocation33_spill] sm:$0xff] }
 0x1ea   : > { %7286 = vst [vmem:[#allocation35_spill] sm:$0xff] %v6311_v28  ;;  %v6318_v23 = vmul.f32 %v4047_v60, %v7289_v12  ;;  %4050 = vpow2.f32 %v2917_v51  ;;  %v2404_v59 = vmul.f32 %v6218_v45, %v2386_v48  ;;  %v2747_v53 = vsub.f32 1.5, %v2746_v54  ;;  %v7293_v48 = vld [vmem:[#allocation72_spill] sm:$0xff] }
 0x1eb   : > { %v6323_v17 = vmul.f32 %v7292_v47, %v7291_v34  ;;  %v2425_v32 = vmul.f32 1.442695, %v2403_v41  ;;  %v2875_v10 = vmul.f32 %v6075_v6, %v2857_v42  ;;  %v2214_v30 = vmul.f32 0.5, %v2213_v18 }
 0x1ec   : > { %7290 = vst [vmem:[#allocation25_spill] sm:$0xff] %v6318_v23  ;;  %v2493_v27 = vadd.f32 %v6318_v23, %v6311_v28  ;;  %4052 = vrcp.f32 %v2053_v29  ;;  %v2427_v35 = vmul.f32 1.442695, %v2404_v59  ;;  %v2748_v24 = vmul.f32 %v7284_v55, %v2747_v53  ;;  %v1554_v55 = vpop.xlane.xlu2 %1553  ;;  %v7295_v59 = vld [vmem:[#allocation86_spill] sm:$0xff] }
 0x1ed   : > { %v4049_v51 = vpop.eup %4048  ;;  %4054 = vpow2.f32 %v2425_v32  ;;  %vm2750_vm8 = vcmp.eq.f32.partialorder %v7293_v48, inf  ;;  %v2753_v54 = vand.u32 2147483648, %v7293_v48  ;;  %v2897_v60 = vmul.f32 1.442695, %v2875_v10  ;;  %v7296_v53 = vld [vmem:[#allocation70_spill] sm:$0xff] }
 0x1ee   : > { %v6333_v41 = vmul.f32 %v6264_v38, %v7294_v36  ;;  %2494 = vadd.xlane.f32.xlu2 %v2493_v27  ;;  %v2919_v42 = vmul.f32 1.442695, %v4049_v51  ;;  %4056 = vpow2.f32 %v2427_v35  ;;  %v2749_v29 = vmul.f32 %v2748_v24, %v7293_v48  ;;  %v7297_v36 = vld [vmem:[#allocation64_spill] sm:$0xff] }
 0x1ef   : > { %4058 = vpow2.f32 %v2897_v60  ;;  %vm2046_vm9 = vcmp.gt.f32.partialorder %v2026_v15, 0.0  ;;  %v2215_v18 = vsub.f32 1.5, %v2214_v30  ;;  %v2225_v32 = vmul.f32 %v7296_v53, %v7295_v59 }
 0x1f0   : > { %v4051_v43 = vpop.eup %4050  ;;  %4060 = vpow2.f32 %v2919_v42  ;;  %v2751_v10 = vsel %vm2750_vm8, %v7293_v48, %v2749_v29  ;;  %vm2752_vm10 = vcmp.eq.f32.partialorder %v7293_v48, 0.0  ;;  %vm2218_vm11 = vcmp.eq.f32.partialorder %v7297_v36, inf }
 0x1f1   : > { %v2754_v27 = vsel %vm2752_vm10, %v2753_v54, %v2751_v10  ;;  %v2216_v35 = vmul.f32 %v7288_v19, %v2215_v18  ;;  %vm2220_vm12 = vcmp.eq.f32.partialorder %v7297_v36, 0.0  ;;  %v2226_v24 = vmul.f32 0.5, %v2225_v32  ;;  %v7299_v54 = vld [vmem:[#allocation30_spill] sm:$0xff]  ;;  %v7300_v10 = vld [vmem:[#allocation87_spill] sm:$0xff] }
 0x1f2   : > { %v6343_v51 = vpop.eup %4052  ;;  %v2858_v30 = vsub.f32 0.0, %v2754_v27  ;;  %v2054_v60 = vsel %vm2046_vm9, %v2026_v15, 1.0  ;;  %vm1574_vm13 = vcmp.gt.f32.partialorder %v1554_v55, 0.0  ;;  %v2221_v59 = vand.u32 2147483648, %v7297_v36 }
 0x1f3   : > { %v4055_v42 = vpop.eup %4054  ;;  %v6347_v29 = vmul.f32 %v4051_v43, %v7285_v9  ;;  %v2217_v48 = vmul.f32 %v2216_v35, %v7297_v36  ;;  %v2227_v23 = vsub.f32 1.5, %v2226_v24  ;;  %v2285_v19 = vmul.f32 %v7300_v10, %v7299_v54 }
 0x1f4   : > { %v4057_v18 = vpop.eup %4056  ;;  %v2457_v28 = vmul.f32 1.442695, %v4055_v42  ;;  %v2876_v32 = vmul.f32 %v6075_v6, %v2858_v30  ;;  %vm2230_vm14 = vcmp.eq.f32.partialorder %v7301_v8, inf  ;;  %v2233_v15 = vand.u32 2147483648, %v7301_v8  ;;  %v7302_v30 = vld [vmem:[#allocation21_spill] sm:$0xff] }
 0x1f5   : > { %7298 = vst [vmem:[#allocation36_spill] sm:$0xff] %v6347_v29  ;;  %v4059_v27 = vpop.eup %4058  ;;  %v2459_v13 = vmul.f32 1.442695, %v4057_v18  ;;  %v2219_v43 = vsel %vm2218_vm11, %v7297_v36, %v2217_v48  ;;  %v2228_v9 = vmul.f32 %v7296_v53, %v2227_v23  ;;  %v2286_v35 = vmul.f32 0.5, %v2285_v19  ;;  %v7305_v48 = vld [vmem:[#allocation34_spill] sm:$0xff]  ;;  %v7306_v19 = vld [vmem:[#allocation97_spill] sm:$0xff] }
 0x1f6   : > { %v4061_v24 = vpop.eup %4060  ;;  %4062 = vpow2.f32 %v2457_v28  ;;  %v2899_v54 = vmul.f32 1.442695, %v2876_v32  ;;  %v2222_v42 = vsel %vm2220_vm12, %v2221_v59, %v2219_v43  ;;  %v2297_v56 = vmul.f32 %v7303_v16, %v7302_v30  ;;  %v7307_v32 = vld [vmem:[#allocation89_spill] sm:$0xff] }
 0x1f7   : > { %v6364_v57 = vmul.f32 %v4061_v24, %v7289_v12  ;;  %4064 = vpow2.f32 %v2459_v13  ;;  %v2229_v18 = vmul.f32 %v2228_v9, %v7301_v8  ;;  %v2381_v44 = vsub.f32 0.0, %v2222_v42 }
 0x1f8   : > { %v6369_v23 = vmul.f32 %v6264_v38, %v7305_v48  ;;  %4066 = vpow2.f32 %v2899_v54  ;;  %vm2232_vm15 = vcmp.eq.f32.partialorder %v7301_v8, 0.0  ;;  %v2287_v28 = vsub.f32 1.5, %v2286_v35  ;;  %v7308_v35 = vld [vmem:[#allocation76_spill] sm:$0xff]  ;;  %v7312_v48 = vld [vmem:[#allocation69_spill] sm:$0xff] }
 0x1f9   : > { %7304 = vst [vmem:[#allocation27_spill] sm:$0xff] %v6364_v57  ;;  %v2965_v53 = vadd.f32 %v6364_v57, %v6347_v29  ;;  %v2929_v36 = vmul.f32 1.442695, %v4059_v27  ;;  %4068 = vrcp.f32 %v2054_v60  ;;  %v1582_v12 = vsel %vm1574_vm13, %v1554_v55, 1.0  ;;  %v7328_v57 = vld [vmem:[#allocation6_spill] sm:$0xff] }
 0x1fa   : > { %v2231_v13 = vsel %vm2230_vm14, %v7301_v8, %v2229_v18  ;;  %v2399_v59 = vmul.f32 %v6218_v45, %v2381_v44  ;;  %v2288_v38 = vmul.f32 %v7300_v10, %v2287_v28  ;;  %v2757_v43 = vmul.f32 %v7307_v32, %v7306_v19  ;;  %v7309_v44 = vld [vmem:[#allocation68_spill] sm:$0xff] }
 0x1fb   : > { %2966 = vadd.xlane.f32.xlu1 %v2965_v53  ;;  %v2234_v9 = vsel %vm2232_vm15, %v2233_v15, %v2231_v13  ;;  %vm2290_vm0 = vcmp.eq.f32.partialorder %v7308_v35, inf  ;;  %v2293_v27 = vand.u32 2147483648, %v7308_v35  ;;  %v2298_v60 = vmul.f32 0.5, %v2297_v56  ;;  %v7311_v18 = vld [vmem:[#allocation80_spill] sm:$0xff] }
 0x1fc   : > { %v4063_v24 = vpop.eup %4062  ;;  %v2382_v55 = vsub.f32 0.0, %v2234_v9  ;;  %v2417_v54 = vmul.f32 1.442695, %v2399_v59  ;;  %v2289_v42 = vmul.f32 %v2288_v38, %v7308_v35  ;;  %vm2292_vm1 = vcmp.eq.f32.partialorder %v7308_v35, 0.0 }
 0x1fd   : > { %v4065_v8 = vpop.eup %4064  ;;  %v6387_v10 = vmul.f32 %v4063_v24, %v7309_v44  ;;  %4070 = vpow2.f32 %v2929_v36  ;;  %v2299_v30 = vsub.f32 1.5, %v2298_v60  ;;  %vm2302_vm2 = vcmp.eq.f32.partialorder %v7311_v18, inf }
 0x1fe   : > { %v4067_v15 = vpop.eup %4066  ;;  %v6391_v28 = vmul.f32 %v4065_v8, %v7312_v48  ;;  %v2400_v56 = vmul.f32 %v6218_v45, %v2382_v55  ;;  %4072 = vpow2.f32 %v2417_v54  ;;  %v2291_v53 = vsel %vm2290_vm0, %v7308_v35, %v2289_v42  ;;  %v7314_v35 = vld [vmem:[#allocation41_spill] sm:$0xff] }
 0x1ff   : > { %7310 = vst [vmem:[#allocation19_spill] sm:$0xff] %v6387_v10  ;;  %v4069_v13 = vpop.eup %4068  ;;  %v2931_v59 = vmul.f32 1.442695, %v4067_v15  ;;  %v2294_v38 = vsel %vm2292_vm1, %v2293_v27, %v2291_v53  ;;  %v2300_v19 = vmul.f32 %v7303_v16, %v2299_v30  ;;  %v2758_v36 = vmul.f32 0.5, %v2757_v43  ;;  %v7315_v43 = vld [vmem:[#allocation98_spill] sm:$0xff]  ;;  %v7316_v27 = vld [vmem:[#allocation93_spill] sm:$0xff] }
 0x200   : > { %7313 = vst [vmem:[#allocation20_spill] sm:$0xff] %v6391_v28  ;;  %v2502_v9 = vadd.f32 %v6391_v28, %v6387_v10  ;;  %v2419_v60 = vmul.f32 1.442695, %v2400_v56  ;;  %v2305_v24 = vand.u32 2147483648, %v7311_v18  ;;  %v2387_v8 = vsub.f32 0.0, %v2294_v38  ;;  %v7317_v56 = vld [vmem:[#allocation42_spill] sm:$0xff] }
 0x201   : > { %4074 = vpow2.f32 %v2931_v59  ;;  %v2301_v55 = vmul.f32 %v2300_v19, %v7311_v18  ;;  %vm2304_vm3 = vcmp.eq.f32.partialorder %v7311_v18, 0.0  ;;  %v2759_v54 = vsub.f32 1.5, %v2758_v36  ;;  %v7319_v10 = vld [vmem:[#allocation90_spill] sm:$0xff] }
 0x202   : > { %v6405_v42 = vmul.f32 %v6343_v51, %v7314_v35  ;;  %2503 = vadd.xlane.f32.xlu0 %v2502_v9  ;;  %4076 = vpow2.f32 %v2419_v60  ;;  %v2405_v16 = vmul.f32 %v6218_v45, %v2387_v8  ;;  %v2769_v30 = vmul.f32 %v7316_v27, %v7315_v43  ;;  %v7318_v60 = vld [vmem:[#allocation81_spill] sm:$0xff] }
 0x203   : > { %v4071_v15 = vpop.eup %4070  ;;  %v6412_v53 = vmul.f32 %v6343_v51, %v7317_v56  ;;  %4078 = vrcp.f32 %v1582_v12  ;;  %v2303_v59 = vsel %vm2302_vm2, %v7311_v18, %v2301_v55  ;;  %v2760_v38 = vmul.f32 %v7307_v32, %v2759_v54  ;;  %v7320_v51 = vld [vmem:[#allocation74_spill] sm:$0xff] }
 0x204   : > { %v4073_v19 = vpop.eup %4072  ;;  %v2306_v36 = vsel %vm2304_vm3, %v2305_v24, %v2303_v59  ;;  %v2429_v9 = vmul.f32 1.442695, %v2405_v16  ;;  %vm2762_vm4 = vcmp.eq.f32.partialorder %v7318_v60, inf  ;;  %v2770_v8 = vmul.f32 0.5, %v2769_v30 }
 0x205   : > { %v2449_v35 = vmul.f32 1.442695, %v4073_v19  ;;  %v2388_v43 = vsub.f32 0.0, %v2306_v36  ;;  %v2761_v28 = vmul.f32 %v2760_v38, %v7318_v60  ;;  %v2237_v56 = vmul.f32 %v7320_v51, %v7319_v10  ;;  %v7323_v38 = vld [vmem:[#allocation52_spill] sm:$0xff] }
 0x206   : > { %v6423_v12 = vmul.f32 %v4071_v15, %v7309_v44  ;;  %4080 = vpow2.f32 %v2429_v9  ;;  %v2765_v18 = vand.u32 2147483648, %v7318_v60  ;;  %v2771_v32 = vsub.f32 1.5, %v2770_v8 }
 0x207   : > { %v4075_v55 = vpop.eup %4074  ;;  %4082 = vpow2.f32 %v2449_v35  ;;  %v2406_v24 = vmul.f32 %v6218_v45, %v2388_v43  ;;  %v2763_v54 = vsel %vm2762_vm4, %v7318_v60, %v2761_v28  ;;  %vm2764_vm5 = vcmp.eq.f32.partialorder %v7318_v60, 0.0  ;;  %v1557_v35 = vpop.xlane.xlu2 %1556  ;;  %v7324_v60 = vld [vmem:[#allocation53_spill] sm:$0xff] }
 0x208   : > { %7321 = vst [vmem:[#allocation48_spill] sm:$0xff] %v6423_v12  ;;  %v4077_v16 = vpop.eup %4076  ;;  %v6430_v30 = vmul.f32 %v4075_v55, %v7312_v48  ;;  %v2766_v10 = vsel %vm2764_vm5, %v2765_v18, %v2763_v54  ;;  %v2772_v44 = vmul.f32 %v7316_v27, %v2771_v32  ;;  %v2238_v15 = vmul.f32 0.5, %v2237_v56  ;;  %v7325_v48 = vld [vmem:[#allocation23_spill] sm:$0xff]  ;;  %v7326_v54 = vld [vmem:[#allocation54_spill] sm:$0xff] }
 0x209   : > { %v4079_v59 = vpop.eup %4078  ;;  %v6434_v19 = vmul.f32 %v4069_v13, %v7323_v38  ;;  %v2451_v36 = vmul.f32 1.442695, %v4077_v16  ;;  %v2431_v9 = vmul.f32 1.442695, %v2406_v24  ;;  %v2859_v8 = vsub.f32 0.0, %v2766_v10 }
 0x20a   : > { %7322 = vst [vmem:[#allocation46_spill] sm:$0xff] %v6430_v30  ;;  %v2974_v28 = vadd.f32 %v6430_v30, %v6423_v12  ;;  %v6439_v43 = vmul.f32 %v4069_v13, %v7324_v60  ;;  %v2773_v55 = vmul.f32 %v2772_v44, %v7325_v48  ;;  %vm2774_vm6 = vcmp.eq.f32.partialorder %v7325_v48, inf }
 0x20b   : > { %4084 = vpow2.f32 %v2451_v36  ;;  %vm2776_vm7 = vcmp.eq.f32.partialorder %v7325_v48, 0.0  ;;  %v2777_v27 = vand.u32 2147483648, %v7325_v48  ;;  %v2877_v56 = vmul.f32 %v6075_v6, %v2859_v8  ;;  %v7327_v36 = vld [vmem:[#allocation55_spill] sm:$0xff] }
 0x20c   : > { %v4081_v18 = vpop.eup %4080  ;;  %2975 = vadd.xlane.f32.xlu2 %v2974_v28  ;;  %4086 = vpow2.f32 %v2431_v9  ;;  %v2775_v32 = vsel %vm2774_vm6, %v7325_v48, %v2773_v55  ;;  %vm1575_vm8 = vcmp.gt.f32.partialorder %v1557_v35, 0.0  ;;  %v2239_v24 = vsub.f32 1.5, %v2238_v15  ;;  %v7329_v15 = vld [vmem:[#allocation94_spill] sm:$0xff]  ;;  %v7330_v28 = vld [vmem:[#allocation77_spill] sm:$0xff] }
 0x20d   : > { %v4083_v13 = vpop.eup %4082  ;;  %v1599_v16 = vmul.f32 %v4079_v59, %v7326_v54  ;;  %v2461_v10 = vmul.f32 1.442695, %v4081_v18  ;;  %v2778_v44 = vsel %vm2776_vm7, %v2777_v27, %v2775_v32  ;;  %v2901_v38 = vmul.f32 1.442695, %v2877_v56  ;;  %v7331_v18 = vld [vmem:[#allocation66_spill] sm:$0xff]  ;;  %v7332_v32 = vld [vmem:[#allocation100_spill] sm:$0xff] }
 0x20e   : > { %v1600_v60 = vmul.f32 %v4079_v59, %v7327_v36  ;;  %v2860_v30 = vsub.f32 0.0, %v2778_v44  ;;  %v2240_v12 = vmul.f32 %v7320_v51, %v2239_v24  ;;  %vm2242_vm9 = vcmp.eq.f32.partialorder %v7328_v57, inf  ;;  %v6461_v59 = vpop.xlane.xlu1 %2028  ;;  %v7333_v24 = vld [vmem:[#allocation14_spill] sm:$0xff] }
 0x20f   : > { %v6451_v8 = vsel %vm1575_vm8, %v1557_v35, 1.0  ;;  %vm2244_vm10 = vcmp.eq.f32.partialorder %v7328_v57, 0.0  ;;  %v2245_v9 = vand.u32 2147483648, %v7328_v57  ;;  %v2249_v48 = vmul.f32 %v7330_v28, %v7329_v15 }
 0x210   : > { %v6458_v55 = vmul.f32 %v4083_v13, %v7264_v1  ;;  %v2878_v27 = vmul.f32 %v6075_v6, %v2860_v30  ;;  %4088 = vpow2.f32 %v2901_v38  ;;  %v2241_v51 = vmul.f32 %v2240_v12, %v7328_v57  ;;  %v6470_v13 = vpop.f32.mrf.mxu2 }
 0x211   : > { %v4085_v56 = vpop.eup %4084  ;;  %4090 = vpow2.f32 %v2461_v10  ;;  %v2250_v35 = vmul.f32 0.5, %v2249_v48  ;;  %vm2254_vm11 = vcmp.eq.f32.partialorder %v7331_v18, inf  ;;  %v2309_v54 = vmul.f32 %v7333_v24, %v7332_v32  ;;  %v6476_v10 = vpop.f32.mrf.mxu3  ;;  %v7335_v32 = vld [vmem:[#allocation22_spill] sm:$0xff] }
 0x212   : > { %v4087_v44 = vpop.eup %4086  ;;  %v6468_v36 = vmul.f32 %v4085_v56, %v7266_v37  ;;  %v2903_v1 = vmul.f32 1.442695, %v2878_v27  ;;  %v2243_v30 = vsel %vm2242_vm9, %v7328_v57, %v2241_v51  ;;  %vm2256_vm12 = vcmp.eq.f32.partialorder %v7331_v18, 0.0  ;;  %v7334_v56 = vld [vmem:[#allocation15_spill] sm:$0xff] }
 0x213   : > { %v2463_v12 = vmul.f32 1.442695, %v4087_v44  ;;  %vm2047_vm13 = vcmp.gt.f32.partialorder %v6461_v59, 0.0  ;;  %v2246_v38 = vsel %vm2244_vm10, %v2245_v9, %v2243_v30  ;;  %v2251_v15 = vsub.f32 1.5, %v2250_v35 }
 0x214   : > { %v2310_v37 = vmul.f32 0.5, %v2309_v54  ;;  %v2496_v48 = vadd.f32 %v6468_v36, %v6458_v55  ;;  %4092 = vpow2.f32 %v2903_v1  ;;  %v2383_v27 = vsub.f32 0.0, %v2246_v38 }
 0x215   : > { %v2321_v51 = vmul.f32 %v7335_v32, %v7334_v56  ;;  %4094 = vpow2.f32 %v2463_v12  ;;  %v2252_v44 = vmul.f32 %v7330_v28, %v2251_v15  ;;  %v3029_v29 = vpack.c.bf16 %v1599_v16, %v6333_v41  ;;  %v7337_v56 = vld [vmem:[#allocation91_spill] sm:$0xff] }
 0x216   : > { %v3030_v63 = vpack.c.bf16 %v1600_v60, %v6369_v23  ;;  %v4089_v58 = vpop.eup %4088  ;;  %2497 = vadd.xlane.f32.xlu1 %v2496_v48  ;;  %v2257_v57 = vand.u32 2147483648, %v7331_v18  ;;  %v2401_v9 = vmul.f32 %v6218_v45, %v2383_v27  ;;  %v3031_v35 = vpack.c.bf16 %v6434_v19, %v6405_v42  ;;  %v7336_v60 = vld [vmem:[#allocation92_spill] sm:$0xff] }
 0x217   : > { %v3032_v54 = vpack.c.bf16 %v6439_v43, %v6412_v53  ;;  %v4091_v1 = vpop.eup %4090  ;;  %v2933_v30 = vmul.f32 1.442695, %v4089_v58  ;;  %v2253_v28 = vmul.f32 %v2252_v44, %v7331_v18  ;;  %3073 = vmatmul.bf16.vlgmr.msra.gmra.mxu0 %v3029_v29  ;;  %v2311_v41 = vsub.f32 1.5, %v2310_v37 }
 0x218   : > { %3102 = vmatmul.bf16.vlgmr.msra.gmra.mxu1 %v3030_v63  ;;  %v2322_v23 = vmul.f32 0.5, %v2321_v51  ;;  %v2421_v16 = vmul.f32 1.442695, %v2401_v9  ;;  %3131 = vmatmul.bf16.vlgmr.msra.gmra.mxu2 %v3031_v35  ;;  %vm2314_vm14 = vcmp.eq.f32.partialorder %v7336_v60, inf  ;;  %vm2316_vm15 = vcmp.eq.f32.partialorder %v7336_v60, 0.0  ;;  %v1100_v51 = vpop.f32.mrf.mxu2  ;;  %v2587_v9 = vpop.permute.xlu2 %2586 }
 0x219   : > { %3160 = vmatmul.bf16.vlgmr.msra.gmra.mxu3 %v3032_v54  ;;  %v2317_v42 = vand.u32 2147483648, %v7336_v60  ;;  %4096 = vpow2.f32 %v2933_v30  ;;  %v2255_v58 = vsel %vm2254_vm11, %v7331_v18, %v2253_v28  ;;  %v2312_v53 = vmul.f32 %v7333_v24, %v2311_v41 }
 0x21a   : > { %v2323_v29 = vsub.f32 1.5, %v2322_v23  ;;  %v4093_v63 = vpop.eup %4092  ;;  %v6503_v19 = vmul.f32 %v4091_v1, %v5834_v20  ;;  %v2258_v43 = vsel %vm2256_vm12, %v2257_v57, %v2255_v58  ;;  %4098 = vpow2.f32 %v2421_v16  ;;  %v1560_v58 = vpop.xlane.xlu1 %1559 }
 0x21b   : > { %v2781_v12 = vmul.f32 %v5893_v4, %v6253_v22  ;;  %v4095_v38 = vpop.eup %4094  ;;  %v2935_v15 = vmul.f32 1.442695, %v4093_v63  ;;  %v2384_v37 = vsub.f32 0.0, %v2258_v43  ;;  %v2313_v48 = vmul.f32 %v2312_v53, %v7336_v60 }
 0x21c   : > { %v2324_v27 = vmul.f32 %v7335_v32, %v2323_v29  ;;  %v6512_v24 = vmul.f32 %v4095_v38, %v5842_v31  ;;  %vm2326_vm0 = vcmp.eq.f32.partialorder %v7337_v56, inf  ;;  %vm2328_vm1 = vcmp.eq.f32.partialorder %v7337_v56, 0.0  ;;  %v1129_v32 = vpop.f32.mrf.mxu3 }
 0x21d   : > { %v2329_v18 = vand.u32 2147483648, %v7337_v56  ;;  %4100 = vpow2.f32 %v2935_v15  ;;  %v2402_v22 = vmul.f32 %v6218_v45, %v2384_v37  ;;  %v2315_v44 = vsel %vm2314_vm14, %v7336_v60, %v2313_v48  ;;  %v2032_v60 = vpop.xlane.xlu0 %2031  ;;  %v7339_v37 = vld [vmem:[#allocation45_spill] sm:$0xff] }
 0x21e   : > { %v2325_v57 = vmul.f32 %v2324_v27, %v7337_v56  ;;  %v2505_v35 = vadd.f32 %v6512_v24, %v6503_v19  ;;  %v2055_v54 = vsel %vm2047_vm13, %v6461_v59, 1.0  ;;  %v2318_v1 = vsel %vm2316_vm15, %v2317_v42, %v2315_v44  ;;  %v7338_v42 = vld [vmem:[#allocation44_spill] sm:$0xff] }
 0x21f   : > { %v2782_v30 = vmul.f32 0.5, %v2781_v12  ;;  %v4097_v28 = vpop.eup %4096  ;;  %4102 = vrcp.f32 %v6451_v8  ;;  %v2423_v41 = vmul.f32 1.442695, %v2402_v22  ;;  %v2389_v16 = vsub.f32 0.0, %v2318_v1 }
 0x220   : > { %v2327_v23 = vsel %vm2326_vm0, %v7337_v56, %v2325_v57  ;;  %v4099_v53 = vpop.eup %4098  ;;  %2506 = vadd.xlane.f32.xlu0 %v2505_v35  ;;  %v2625_v59 = vmul.f32 2.0, %v1100_v51  ;;  %v2626_v63 = vmul.f32 2.0, %v1129_v32  ;;  %v2609_v43 = vadd.f32 %v7338_v42, %v2587_v9 }
 0x221   : > { %v2330_v29 = vsel %vm2328_vm1, %v2329_v18, %v2327_v23  ;;  %4104 = vpow2.f32 %v2423_v41  ;;  %v2453_v12 = vmul.f32 1.442695, %v4099_v53  ;;  %v2407_v38 = vmul.f32 %v6218_v45, %v2389_v16 }
 0x222   : > { %v2390_v8 = vsub.f32 0.0, %v2330_v29  ;;  %v6538_v15 = vmul.f32 %v4097_v28, %v5834_v20  ;;  %v2610_v48 = vadd.f32 %v7339_v37, %v2587_v9  ;;  %vm1576_vm2 = vcmp.gt.f32.partialorder %v1560_v58, 0.0 }
 0x223   : > { %v2783_v27 = vsub.f32 1.5, %v2782_v30  ;;  %v4101_v22 = vpop.eup %4100  ;;  %v2433_v18 = vmul.f32 1.442695, %v2407_v38  ;;  %vm2048_vm3 = vcmp.gt.f32.partialorder %v2032_v60, 0.0  ;;  %v1584_v51 = vsel %vm1576_vm2, %v1560_v58, 1.0 }
 0x224   : > { %v2408_v56 = vmul.f32 %v6218_v45, %v2390_v8  ;;  %v6543_v44 = vmul.f32 %v4101_v22, %v5842_v31  ;;  %4106 = vpow2.f32 %v2453_v12  ;;  %v2641_v57 = vsub.f32 %v2609_v43, %v2625_v59 }
 0x225   : > { %vm2786_vm4 = vcmp.eq.f32.partialorder %v7276_v61, inf  ;;  %v4103_v32 = vpop.eup %4102  ;;  %4108 = vpow2.f32 %v2433_v18  ;;  %v2642_v35 = vsub.f32 %v2610_v48, %v2626_v63  ;;  %v2784_v9 = vmul.f32 %v5893_v4, %v2783_v27 }
 0x226   : > { %v2435_v20 = vmul.f32 1.442695, %v2408_v56  ;;  %v2977_v1 = vadd.f32 %v6543_v44, %v6538_v15  ;;  %v2056_v30 = vsel %vm2048_vm3, %v2032_v60, 1.0  ;;  %4110 = vrcp.f32 %v1584_v51  ;;  %v1069_v51 = vpop.f32.mrf.mxu1 }
 0x227   : > { %v2789_v28 = vand.u32 2147483648, %v7276_v61  ;;  %v4105_v41 = vpop.eup %4104  ;;  %v2785_v31 = vmul.f32 %v2784_v9, %v7276_v61  ;;  %vm2788_vm5 = vcmp.eq.f32.partialorder %v7276_v61, 0.0  ;;  %v2793_v23 = vmul.f32 %v7292_v47, %v6323_v17  ;;  %v7340_v9 = vld [vmem:[#allocation11_spill] sm:$0xff] }
 0x228   : > { %4112 = vpow2.f32 %v2435_v20  ;;  %2978 = vadd.xlane.f32.xlu2 %v2977_v1  ;;  %v2455_v16 = vmul.f32 1.442695, %v4105_v41  ;;  %v6554_v4 = vmax.f32 %v2641_v57, 0.0  ;;  %v6556_v58 = vmax.f32 %v2642_v35, 0.0  ;;  %v1040_v35 = vpop.f32.mrf.mxu0  ;;  %v7342_v41 = vld [vmem:[#allocation12_spill] sm:$0xff] }
 0x229   : > { %4114 = vrcp.f32 %v2055_v54  ;;  %v2787_v53 = vsel %vm2786_vm4, %v7276_v61, %v2785_v31  ;;  %v2794_v29 = vmul.f32 0.5, %v2793_v23  ;;  %vm2798_vm6 = vcmp.eq.f32.partialorder %v7291_v34, inf }
 0x22a   : > { %4116 = vrcp.f32 %v2056_v30  ;;  %v4107_v59 = vpop.eup %4106  ;;  %v2790_v63 = vsel %vm2788_vm5, %v2789_v28, %v2787_v53  ;;  %v2801_v22 = vand.u32 2147483648, %v7291_v34  ;;  %vm2800_vm7 = vcmp.eq.f32.partialorder %v7291_v34, 0.0  ;;  %v7341_v30 = vld [vmem:[#allocation83_spill] sm:$0xff] }
 0x22b   : > { %4118 = vpow2.f32 %v2455_v16  ;;  %v4109_v60 = vpop.eup %4108  ;;  %v2795_v43 = vsub.f32 1.5, %v2794_v29  ;;  %v2861_v12 = vsub.f32 0.0, %v2790_v63  ;;  %v6568_v18 = vmul.f32 %v4107_v59, %v7278_v26  ;;  %v7343_v16 = vld [vmem:[#allocation85_spill] sm:$0xff]  ;;  %v2583_v29 = vpop.permute.xlu0 %2582 }
 0x22c   : > { %v4111_v17 = vpop.eup %4110  ;;  %v2465_v8 = vmul.f32 1.442695, %v4109_v60  ;;  %4120 = vrsqrt.f32 %v6554_v4  ;;  %v1601_v1 = vmul.f32 %v4103_v32, %v7340_v9  ;;  %v1602_v31 = vmul.f32 %v4103_v32, %v7342_v41 }
 0x22d   : > { %4122 = vrsqrt.f32 %v6556_v58  ;;  %v2796_v38 = vmul.f32 %v7292_v47, %v2795_v43  ;;  %v2879_v48 = vmul.f32 %v6075_v6, %v2861_v12  ;;  %v1603_v28 = vmul.f32 %v4111_v17, %v7341_v30  ;;  %v7344_v43 = vld [vmem:[#allocation28_spill] sm:$0xff] }
 0x22e   : > { %v4113_v54 = vpop.eup %4112  ;;  %4124 = vpow2.f32 %v2465_v8  ;;  %v1604_v53 = vmul.f32 %v4111_v17, %v7343_v16  ;;  %v2623_v9 = vmul.f32 2.0, %v6470_v13  ;;  %vm2834_vm8 = vcmp.eq.f32.partialorder %v6554_v4, inf }
 0x22f   : > { %v4115_v27 = vpop.eup %4114  ;;  %v2467_v61 = vmul.f32 1.442695, %v4113_v54  ;;  %v2797_v57 = vmul.f32 %v2796_v38, %v7291_v34  ;;  %v2905_v20 = vmul.f32 1.442695, %v2879_v48  ;;  %v3037_v60 = vpack.c.bf16 %v1603_v28, %v1601_v1  ;;  %v7345_v38 = vld [vmem:[#allocation75_spill] sm:$0xff] }
 0x230   : > { %v4117_v56 = vpop.eup %4116  ;;  %v2073_v12 = vmul.f32 %v4115_v27, %v7344_v43  ;;  %vm2846_vm9 = vcmp.eq.f32.partialorder %v6556_v58, inf  ;;  %vm2836_vm10 = vcmp.eq.f32.partialorder %v6554_v4, 0.0  ;;  %vm2848_vm11 = vcmp.eq.f32.partialorder %v6556_v58, 0.0 }
 0x231   : > { %v4119_v47 = vpop.eup %4118  ;;  %4126 = vpow2.f32 %v2467_v61  ;;  %v2799_v26 = vsel %vm2798_vm6, %v7291_v34, %v2797_v57  ;;  %v2075_v48 = vmul.f32 %v4117_v56, %v7345_v38  ;;  %3078 = vmatmul.bf16.gmra.mxu0 %v3037_v60  ;;  %v7346_v61 = vld [vmem:[#allocation16_spill] sm:$0xff]  ;;  %v7347_v57 = vld [vmem:[#allocation79_spill] sm:$0xff] }
 0x232   : > { %v6576_v23 = vmul.f32 %v4119_v47, %v7281_v40  ;;  %4128 = vpow2.f32 %v2905_v20  ;;  %v6580_v59 = vpop.eup %4120  ;;  %v2802_v63 = vsel %vm2800_vm7, %v2801_v22, %v2799_v26  ;;  %v3038_v40 = vpack.c.bf16 %v1604_v53, %v1602_v31  ;;  %v2111_v47 = vpop.permute.xlu1 %2110 }
 0x233   : > { %v6583_v8 = vpop.eup %4122  ;;  %v2862_v54 = vsub.f32 0.0, %v2802_v63  ;;  %v2074_v17 = vmul.f32 %v4115_v27, %v7346_v61  ;;  %v2076_v20 = vmul.f32 %v4117_v56, %v7347_v57  ;;  %v2607_v22 = vadd.f32 %v7338_v42, %v2583_v29  ;;  %v7348_v63 = vld [vmem:[#allocation56_spill] sm:$0xff] }
 0x234   : > { %v2499_v32 = vadd.f32 %v6576_v23, %v6568_v18  ;;  %v4125_v34 = vpop.eup %4124  ;;  %3107 = vmatmul.bf16.gmra.mxu1 %v3038_v40  ;;  %v3039_v28 = vpack.c.bf16 %v2075_v48, %v2073_v12  ;;  %v2624_v31 = vmul.f32 2.0, %v6476_v10  ;;  %v2828_v27 = vmul.f32 %v6580_v59, %v6554_v4  ;;  %v7349_v40 = vld [vmem:[#allocation57_spill] sm:$0xff] }
 0x235   : > { %v6593_v1 = vmul.f32 %v4125_v34, %v5947_v0  ;;  %v2880_v30 = vmul.f32 %v6075_v6, %v2862_v54  ;;  %v3040_v56 = vpack.c.bf16 %v2076_v20, %v2074_v17  ;;  %v2608_v42 = vadd.f32 %v7339_v37, %v2583_v29  ;;  %v1071_v37 = vpop.f32.mrf.mxu1  ;;  %v2115_v29 = vpop.permute.xlu2 %2114 }
 0x236   : > { %2500 = vadd.xlane.f32.xlu1 %v2499_v32  ;;  %3136 = vmatmul.bf16.gmra.mxu2 %v3039_v28  ;;  %v2639_v53 = vsub.f32 %v2607_v22, %v2623_v9  ;;  %v2135_v60 = vadd.f32 %v7348_v63, %v2111_v47  ;;  %v2840_v43 = vmul.f32 %v6583_v8, %v6556_v58  ;;  %v2151_v12 = vmul.f32 2.0, %v1040_v35  ;;  %v1042_v34 = vpop.f32.mrf.mxu0 }
 0x237   : > { %v4127_v41 = vpop.eup %4126  ;;  %v2907_v16 = vmul.f32 1.442695, %v2880_v30  ;;  %3165 = vmatmul.bf16.gmra.mxu3 %v3040_v56  ;;  %v2640_v10 = vsub.f32 %v2608_v42, %v2624_v31  ;;  %v2136_v38 = vadd.f32 %v7349_v40, %v2111_v47  ;;  %v2152_v17 = vmul.f32 2.0, %v1069_v51 }
 0x238   : > { %v4129_v26 = vpop.eup %4128  ;;  %v6601_v13 = vmul.f32 %v4127_v41, %v5969_v39  ;;  %v6608_v54 = vmax.f32 %v2639_v53, 0.0  ;;  %v2167_v35 = vsub.f32 %v2135_v60, %v2151_v12  ;;  %v2829_v57 = vmul.f32 %v6580_v59, %v2828_v27 }
 0x239   : > { %4130 = vpow2.f32 %v2907_v16  ;;  %v2937_v48 = vmul.f32 1.442695, %v4129_v26  ;;  %v6611_v61 = vmax.f32 %v2640_v10, 0.0  ;;  %v2154_v20 = vmul.f32 2.0, %v1071_v37 }
 0x23a   : > { %v2508_v32 = vadd.f32 %v6601_v13, %v6593_v1  ;;  %4132 = vrsqrt.f32 %v6608_v54  ;;  %v2137_v22 = vadd.f32 %v7348_v63, %v2115_v29  ;;  %v2138_v9 = vadd.f32 %v7349_v40, %v2115_v29 }
 0x23b   : > { %v2841_v30 = vmul.f32 %v6583_v8, %v2840_v43  ;;  %v2153_v28 = vmul.f32 2.0, %v1042_v34  ;;  %4134 = vrsqrt.f32 %v6611_v61  ;;  %v2168_v47 = vsub.f32 %v2136_v38, %v2152_v17 }
 0x23c   : > { %2509 = vadd.xlane.f32.xlu2 %v2508_v32  ;;  %v2830_v41 = vmul.f32 0.5, %v2829_v57  ;;  %4136 = vpow2.f32 %v2937_v48  ;;  %v6619_v56 = vmax.f32 %v2167_v35, 0.0  ;;  %v2170_v27 = vsub.f32 %v2138_v9, %v2154_v20  ;;  %v1563_v32 = vpop.xlane.xlu0 %1562 }
 0x23d   : > { %v2842_v31 = vmul.f32 0.5, %v2841_v30  ;;  %v2169_v63 = vsub.f32 %v2137_v22, %v2153_v28  ;;  %v6621_v60 = vmax.f32 %v2168_v47, 0.0  ;;  %v2837_v12 = vand.u32 2147483648, %v6554_v4  ;;  %v2038_v28 = vpop.xlane.xlu2 %2037 }
 0x23e   : > { %v2831_v42 = vsub.f32 1.5, %v2830_v41  ;;  %v2849_v38 = vand.u32 2147483648, %v6556_v58  ;;  %v6632_v48 = vmax.f32 %v2170_v27, 0.0  ;;  %vm1577_vm12 = vcmp.gt.f32.partialorder %v1563_v32, 0.0 }
 0x23f   : > { %v4131_v51 = vpop.eup %4130  ;;  %v2843_v16 = vsub.f32 1.5, %v2842_v31  ;;  %v6635_v17 = vmax.f32 %v2169_v63, 0.0  ;;  %v2035_v31 = vpop.xlane.xlu1 %2034  ;;  %vm2050_vm13 = vcmp.gt.f32.partialorder %v2038_v28, 0.0  ;;  %vm2810_vm0 = vcmp.eq.f32.partialorder %v6608_v54, inf }
 0x240   : > { %v2939_v26 = vmul.f32 1.442695, %v4131_v51  ;;  %v4133_v53 = vpop.eup %4132  ;;  %v2832_v43 = vmul.f32 %v6580_v59, %v2831_v42  ;;  %vm2049_vm14 = vcmp.gt.f32.partialorder %v2035_v31, 0.0  ;;  %vm2812_vm1 = vcmp.eq.f32.partialorder %v6608_v54, 0.0 }
 0x241   : > { %v2844_v10 = vmul.f32 %v6583_v8, %v2843_v16  ;;  %v4135_v37 = vpop.eup %4134  ;;  %v2804_v29 = vmul.f32 %v4133_v53, %v6608_v54  ;;  %vm2822_vm2 = vcmp.eq.f32.partialorder %v6611_v61, inf  ;;  %vm2824_vm3 = vcmp.eq.f32.partialorder %v6611_v61, 0.0 }
 0x242   : > { %4138 = vpow2.f32 %v2939_v26  ;;  %v2833_v40 = vmul.f32 %v2832_v43, %v6554_v4  ;;  %v4137_v59 = vpop.eup %4136  ;;  %v2816_v8 = vmul.f32 %v4135_v37, %v6611_v61  ;;  %v1585_v43 = vsel %vm1577_vm12, %v1563_v32, 1.0 }
 0x243   : > { %4140 = vrsqrt.f32 %v6619_v56  ;;  %v2845_v34 = vmul.f32 %v2844_v10, %v6556_v58  ;;  %v6648_v22 = vmul.f32 %v4137_v59, %v5947_v0  ;;  %v2805_v47 = vmul.f32 %v4133_v53, %v2804_v29 }
 0x244   : > { %v2835_v35 = vsel %vm2834_vm8, %v6554_v4, %v2833_v40  ;;  %4142 = vrsqrt.f32 %v6621_v60  ;;  %v2817_v0 = vmul.f32 %v4135_v37, %v2816_v8  ;;  %v2058_v8 = vsel %vm2050_vm13, %v2038_v28, 1.0 }
 0x245   : > { %v2838_v57 = vsel %vm2836_vm10, %v2837_v12, %v2835_v35  ;;  %v2847_v20 = vsel %vm2846_vm9, %v6556_v58, %v2845_v34  ;;  %4144 = vrsqrt.f32 %v6632_v48  ;;  %v2806_v26 = vmul.f32 0.5, %v2805_v47  ;;  %v1569_v12 = vpop.xlane.xlu0 %1568 }
 0x246   : > { %v2850_v9 = vsel %vm2848_vm11, %v2849_v38, %v2847_v20  ;;  %v2865_v30 = vsub.f32 0.0, %v2838_v57  ;;  %4146 = vrsqrt.f32 %v6635_v17  ;;  %v2818_v38 = vmul.f32 0.5, %v2817_v0 }
 0x247   : > { %v2866_v4 = vsub.f32 0.0, %v2850_v9  ;;  %v2807_v10 = vsub.f32 1.5, %v2806_v26  ;;  %vm1579_vm15 = vcmp.gt.f32.partialorder %v1569_v12, 0.0  ;;  %v2057_v35 = vsel %vm2049_vm14, %v2035_v31, 1.0  ;;  %v1566_v26 = vpop.xlane.xlu1 %1565 }
 0x248   : > { %v4139_v41 = vpop.eup %4138  ;;  %v2883_v58 = vmul.f32 %v6075_v6, %v2865_v30  ;;  %v2819_v32 = vsub.f32 1.5, %v2818_v38  ;;  %v1587_v28 = vsel %vm1579_vm15, %v1569_v12, 1.0  ;;  %vm1578_vm5 = vcmp.gt.f32.partialorder %v1566_v26, 0.0 }
 0x249   : > { %v6651_v51 = vpop.eup %4140  ;;  %v6654_v42 = vmul.f32 %v4139_v41, %v5969_v39  ;;  %v2884_v27 = vmul.f32 %v6075_v6, %v2866_v4  ;;  %v2808_v59 = vmul.f32 %v4133_v53, %v2807_v10  ;;  %v2813_v53 = vand.u32 2147483648, %v6608_v54  ;;  %v2041_v4 = vpop.xlane.xlu2 %2040 }
 0x24a   : > { %v2913_v63 = vmul.f32 1.442695, %v2883_v58  ;;  %v6661_v29 = vpop.eup %4142  ;;  %v2332_v39 = vmul.f32 %v6651_v51, %v6619_v56  ;;  %v2820_v30 = vmul.f32 %v4135_v37, %v2819_v32  ;;  %v2825_v37 = vand.u32 2147483648, %v6611_v61 }
 0x24b   : > { %v2980_v16 = vadd.f32 %v6654_v42, %v6648_v22  ;;  %v2915_v40 = vmul.f32 1.442695, %v2884_v27  ;;  %v6665_v34 = vpop.eup %4144  ;;  %v2809_v57 = vmul.f32 %v2808_v59, %v6608_v54  ;;  %v2344_v9 = vmul.f32 %v6661_v29, %v6621_v60 }
 0x24c   : > { %4148 = vpow2.f32 %v2913_v63  ;;  %v6670_v20 = vpop.eup %4146  ;;  %v2333_v47 = vmul.f32 %v6651_v51, %v2332_v39  ;;  %v2821_v58 = vmul.f32 %v2820_v30, %v6611_v61  ;;  %vm2051_vm4 = vcmp.gt.f32.partialorder %v2041_v4, 0.0 }
 0x24d   : > { %2981 = vadd.xlane.f32.xlu1 %v2980_v16  ;;  %4150 = vpow2.f32 %v2915_v40  ;;  %v2811_v41 = vsel %vm2810_vm0, %v6608_v54, %v2809_v57  ;;  %vm2338_vm6 = vcmp.eq.f32.partialorder %v6619_v56, inf  ;;  %vm2340_vm7 = vcmp.eq.f32.partialorder %v6619_v56, 0.0 }
 0x24e   : > { %4152 = vrcp.f32 %v1585_v43  ;;  %v2814_v31 = vsel %vm2812_vm1, %v2813_v53, %v2811_v41  ;;  %v2334_v16 = vmul.f32 0.5, %v2333_v47  ;;  %v2823_v54 = vsel %vm2822_vm2, %v6611_v61, %v2821_v58 }
 0x24f   : > { %4154 = vrcp.f32 %v2058_v8  ;;  %v2863_v27 = vsub.f32 0.0, %v2814_v31  ;;  %v2826_v39 = vsel %vm2824_vm3, %v2825_v37, %v2823_v54  ;;  %v2345_v8 = vmul.f32 %v6661_v29, %v2344_v9 }
 0x250   : > { %4156 = vrcp.f32 %v2057_v35  ;;  %v2864_v38 = vsub.f32 0.0, %v2826_v39  ;;  %v2335_v59 = vsub.f32 1.5, %v2334_v16  ;;  %v2356_v35 = vmul.f32 %v6670_v20, %v6635_v17 }
 0x251   : > { %4158 = vrcp.f32 %v1587_v28  ;;  %v2881_v40 = vmul.f32 %v6075_v6, %v2863_v27  ;;  %v2059_v61 = vsel %vm2051_vm4, %v2041_v4, 1.0  ;;  %v1586_v47 = vsel %vm1578_vm5, %v1566_v26, 1.0 }
 0x252   : > { %v4149_v0 = vpop.eup %4148  ;;  %v2882_v30 = vmul.f32 %v6075_v6, %v2864_v38  ;;  %v2336_v28 = vmul.f32 %v6651_v51, %v2335_v59  ;;  %v2346_v41 = vmul.f32 0.5, %v2345_v8  ;;  %v2368_v31 = vmul.f32 %v6665_v34, %v6632_v48 }
 0x253   : > { %v4151_v63 = vpop.eup %4150  ;;  %v2945_v43 = vmul.f32 1.442695, %v4149_v0  ;;  %v2909_v57 = vmul.f32 1.442695, %v2881_v40  ;;  %v2341_v6 = vand.u32 2147483648, %v6619_v56  ;;  %v2357_v51 = vmul.f32 %v6670_v20, %v2356_v35 }
 0x254   : > { %v6683_v12 = vpop.eup %4152  ;;  %v2947_v10 = vmul.f32 1.442695, %v4151_v63  ;;  %v2911_v58 = vmul.f32 1.442695, %v2882_v30  ;;  %v2337_v0 = vmul.f32 %v2336_v28, %v6619_v56  ;;  %v2347_v4 = vsub.f32 1.5, %v2346_v41 }
 0x255   : > { %4160 = vpow2.f32 %v2945_v43  ;;  %v4155_v32 = vpop.eup %4154  ;;  %vm2350_vm8 = vcmp.eq.f32.partialorder %v6621_v60, inf  ;;  %v2353_v27 = vand.u32 2147483648, %v6621_v60  ;;  %vm2352_vm9 = vcmp.eq.f32.partialorder %v6621_v60, 0.0 }
 0x256   : > { %4162 = vpow2.f32 %v2947_v10  ;;  %v4157_v53 = vpop.eup %4156  ;;  %v2339_v37 = vsel %vm2338_vm6, %v6619_v56, %v2337_v0  ;;  %v2348_v54 = vmul.f32 %v6661_v29, %v2347_v4  ;;  %v2079_v38 = vmul.f32 %v4155_v32, %v5990_v62 }
 0x257   : > { %4164 = vpow2.f32 %v2909_v57  ;;  %v6694_v9 = vpop.eup %4158  ;;  %v2342_v43 = vsel %vm2340_vm7, %v2341_v6, %v2339_v37  ;;  %v2077_v10 = vmul.f32 %v4157_v53, %v6020_v52  ;;  %v2078_v56 = vmul.f32 %v4157_v53, %v6035_v21 }
 0x258   : > { %4166 = vrcp.f32 %v2059_v61  ;;  %v2391_v40 = vsub.f32 0.0, %v2342_v43  ;;  %v2349_v8 = vmul.f32 %v2348_v54, %v6621_v60  ;;  %v2080_v35 = vmul.f32 %v4155_v32, %v5999_v11  ;;  %v1572_v43 = vpop.xlane.xlu2 %1571  ;;  %v2044_v54 = vpop.xlane.xlu1 %2043 }
 0x259   : > { %4168 = vrcp.f32 %v1586_v47  ;;  %v2358_v57 = vmul.f32 0.5, %v2357_v51  ;;  %v2369_v61 = vmul.f32 %v6665_v34, %v2368_v31  ;;  %v3047_v28 = vpack.c.bf16 %v2079_v38, %v2077_v10 }
 0x25a   : > { %4170 = vpow2.f32 %v2911_v58  ;;  %v2409_v47 = vmul.f32 %v6218_v45, %v2391_v40  ;;  %v2351_v21 = vsel %vm2350_vm8, %v6621_v60, %v2349_v8  ;;  %v3048_v11 = vpack.c.bf16 %v2080_v35, %v2078_v56 }
 0x25b   : > { %v4161_v26 = vpop.eup %4160  ;;  %v2359_v32 = vsub.f32 1.5, %v2358_v57  ;;  %v2354_v41 = vsel %vm2352_vm9, %v2353_v27, %v2351_v21  ;;  %3141 = vmatmul.bf16.gmra.mxu2 %v3047_v28  ;;  %v2370_v6 = vmul.f32 0.5, %v2369_v61  ;;  %vm2362_vm10 = vcmp.eq.f32.partialorder %v6635_v17, inf }
 0x25c   : > { %v4163_v16 = vpop.eup %4162  ;;  %v6704_v63 = vmul.f32 %v4161_v26, %v6154_v7  ;;  %v2437_v31 = vmul.f32 1.442695, %v2409_v47  ;;  %v2392_v0 = vsub.f32 0.0, %v2354_v41  ;;  %3170 = vmatmul.bf16.gmra.mxu3 %v3048_v11  ;;  %vm2364_vm11 = vcmp.eq.f32.partialorder %v6635_v17, 0.0 }
 0x25d   : > { %v6709_v39 = vmul.f32 %v4163_v16, %v6190_v3  ;;  %v4165_v59 = vpop.eup %4164  ;;  %v2360_v4 = vmul.f32 %v6670_v20, %v2359_v32  ;;  %v2371_v26 = vsub.f32 1.5, %v2370_v6  ;;  %v2365_v37 = vand.u32 2147483648, %v6635_v17 }
 0x25e   : > { %v6716_v30 = vpop.eup %4166  ;;  %v2941_v29 = vmul.f32 1.442695, %v4165_v59  ;;  %v2410_v51 = vmul.f32 %v6218_v45, %v2392_v0  ;;  %vm2374_vm12 = vcmp.eq.f32.partialorder %v6632_v48, inf  ;;  %v1605_v10 = vmul.f32 %v6683_v12, %v5980_v49 }
 0x25f   : > { %v2986_v52 = vadd.f32 %v6709_v39, %v6704_v63  ;;  %v4169_v62 = vpop.eup %4168  ;;  %v2361_v60 = vmul.f32 %v2360_v4, %v6635_v17  ;;  %v2372_v20 = vmul.f32 %v6665_v34, %v2371_v26  ;;  %vm1580_vm13 = vcmp.gt.f32.partialorder %v1572_v43, 0.0 }
 0x260   : > { %v4171_v53 = vpop.eup %4170  ;;  %4172 = vpow2.f32 %v2941_v29  ;;  %v2439_v27 = vmul.f32 1.442695, %v2410_v51  ;;  %vm2052_vm14 = vcmp.gt.f32.partialorder %v2044_v54, 0.0  ;;  %v1607_v56 = vmul.f32 %v4169_v62, %v6126_v50  ;;  %v2970_v51 = vpop.xlane.xlu0 %2969 }
 0x261   : > { %2987 = vadd.xlane.f32.xlu0 %v2986_v52  ;;  %v2943_v58 = vmul.f32 1.442695, %v4171_v53  ;;  %4174 = vpow2.f32 %v2437_v31  ;;  %v2363_v16 = vsel %vm2362_vm10, %v6635_v17, %v2361_v60  ;;  %v2373_v59 = vmul.f32 %v2372_v20, %v6632_v48 }
 0x262   : > { %v2366_v38 = vsel %vm2364_vm11, %v2365_v37, %v2363_v16  ;;  %v2377_v8 = vand.u32 2147483648, %v6632_v48  ;;  %v1588_v57 = vsel %vm1580_vm13, %v1572_v43, 1.0  ;;  %v2060_v61 = vsel %vm2052_vm14, %v2044_v54, 1.0 }
 0x263   : > { %4176 = vpow2.f32 %v2943_v58  ;;  %v2393_v35 = vsub.f32 0.0, %v2366_v38  ;;  %v3045_v52 = vpack.c.bf16 %v1607_v56, %v1605_v10  ;;  %v2375_v47 = vsel %vm2374_vm12, %v6632_v48, %v2373_v59  ;;  %v7352_v38 = vld [vmem:[#allocation40_spill] sm:$0xff] }
 0x264   : > { %4178 = vpow2.f32 %v2439_v27  ;;  %vm2376_vm15 = vcmp.eq.f32.partialorder %v6632_v48, 0.0  ;;  %v1606_v41 = vmul.f32 %v6683_v12, %v5983_v5  ;;  %v1608_v48 = vmul.f32 %v4169_v62, %v6138_v25  ;;  %v7350_v12 = vld [vmem:[#allocation17_spill] sm:$0xff] }
 0x265   : > { %v2411_v50 = vmul.f32 %v6218_v45, %v2393_v35  ;;  %v2378_v21 = vsel %vm2376_vm15, %v2377_v8, %v2375_v47  ;;  %4180 = vrcp.f32 %v2060_v61  ;;  %3083 = vmatmul.bf16.gmra.mxu0 %v3045_v52  ;;  %v2081_v37 = vmul.f32 %v6716_v30, %v6082_v2  ;;  %v7351_v62 = vld [vmem:[#allocation29_spill] sm:$0xff] }
 0x266   : > { %v4173_v40 = vpop.eup %4172  ;;  %v2394_v11 = vsub.f32 0.0, %v2378_v21  ;;  %4182 = vrcp.f32 %v1588_v57  ;;  %v3046_v6 = vpack.c.bf16 %v1608_v48, %v1606_v41  ;;  %vm2990_vm1 = vcmp.gt.f32.partialorder %v2970_v51, 0.0  ;;  %v7356_v41 = vld [vmem:[#allocation36_spill] sm:$0xff] }
 0x267   : > { %v4175_v17 = vpop.eup %4174  ;;  %v6740_v34 = vmul.f32 %v4173_v40, %v6001_v14  ;;  %v2441_v32 = vmul.f32 1.442695, %v2411_v50  ;;  %v2998_v59 = vsel %vm2990_vm1, %v2970_v51, 1.0  ;;  %v7355_v50 = vld [vmem:[#allocation24_spill] sm:$0xff] }
 0x268   : > { %v2469_v29 = vmul.f32 1.442695, %v4175_v17  ;;  %v2412_v58 = vmul.f32 %v6218_v45, %v2394_v11  ;;  %3112 = vmatmul.bf16.gmra.mxu1 %v3046_v6  ;;  %v2082_v45 = vmul.f32 %v6716_v30, %v7350_v12  ;;  %v7353_v30 = vld [vmem:[#allocation32_spill] sm:$0xff]  ;;  %v1610_v21 = vmul.f32 %v6694_v9, %v7355_v50 }
 0x269   : > { %v4177_v49 = vpop.eup %4176  ;;  %v1609_v8 = vmul.f32 %v6694_v9, %v7353_v30 }
 0x26a   : > { %v6748_v28 = vmul.f32 %v4177_v49, %v6003_v33  ;;  %4184 = vpow2.f32 %v2469_v29  ;;  %v4179_v31 = vpop.eup %4178  ;;  %v2443_v60 = vmul.f32 1.442695, %v2412_v58  ;;  %v7357_v58 = vld [vmem:[#allocation27_spill] sm:$0xff] }
 0x26b   : > { %4186 = vpow2.f32 %v2441_v32  ;;  %v2471_v4 = vmul.f32 1.442695, %v4179_v31  ;;  %v4181_v26 = vpop.eup %4180 }
 0x26c   : > { %v2983_v53 = vadd.f32 %v6748_v28, %v6740_v34  ;;  %v4183_v5 = vpop.eup %4182  ;;  %v2083_v25 = vmul.f32 %v4181_v26, %v6229_v46  ;;  %v2084_v27 = vmul.f32 %v4181_v26, %v7351_v62 }
 0x26d   : > { %4188 = vpow2.f32 %v2471_v4  ;;  %v1611_v56 = vmul.f32 %v4183_v5, %v7352_v38  ;;  %v7358_v4 = vld [vmem:[#allocation38_spill] sm:$0xff] }
 0x26e   : > { %v2967_v0 = vpop.xlane.xlu1 %2966  ;;  %2984 = vadd.xlane.f32.xlu1 %v2983_v53  ;;  %4190 = vpow2.f32 %v2443_v60  ;;  %v3055_v54 = vpack.c.bf16 %v2083_v25, %v2081_v37  ;;  %v3056_v10 = vpack.c.bf16 %v2084_v27, %v2082_v45  ;;  %v2495_v53 = vpop.xlane.xlu2 %2494  ;;  %v7359_v60 = vld [vmem:[#allocation18_spill] sm:$0xff] }
 0x26f   : > { %vm2989_vm0 = vcmp.gt.f32.partialorder %v2967_v0, 0.0  ;;  %v3053_v61 = vpack.c.bf16 %v1611_v56, %v1609_v8  ;;  %vm2517_vm2 = vcmp.gt.f32.partialorder %v2495_v53, 0.0  ;;  %v2973_v45 = vpop.xlane.xlu0 %2972 }
 0x270   : > { %v4185_v16 = vpop.eup %4184  ;;  %v2997_v20 = vsel %vm2989_vm0, %v2967_v0, 1.0  ;;  %3146 = vmatmul.bf16.gmra.mxu2 %v3055_v54  ;;  %3175 = vmatmul.bf16.gmra.mxu3 %v3056_v10  ;;  %vm2991_vm4 = vcmp.gt.f32.partialorder %v2973_v45, 0.0 }
 0x271   : > { %v4187_v43 = vpop.eup %4186  ;;  %v6764_v2 = vmul.f32 %v4185_v16, %v6001_v14  ;;  %4192 = vrcp.f32 %v2997_v20  ;;  %v7354_v14 = vld [vmem:[#allocation26_spill] sm:$0xff]  ;;  %v7360_v16 = vld [vmem:[#allocation35_spill] sm:$0xff] }
 0x272   : > { %v2473_v40 = vmul.f32 1.442695, %v4187_v43  ;;  %v1612_v49 = vmul.f32 %v4183_v5, %v7354_v14  ;;  %v2525_v5 = vsel %vm2517_vm2, %v2495_v53, 1.0  ;;  %v7361_v43 = vld [vmem:[#allocation25_spill] sm:$0xff] }
 0x273   : > { %v4189_v46 = vpop.eup %4188 }
 0x274   : > { %4194 = vpow2.f32 %v2473_v40  ;;  %v4191_v35 = vpop.eup %4190  ;;  %v6769_v17 = vmul.f32 %v4189_v46, %v6003_v33  ;;  %v3054_v32 = vpack.c.bf16 %v1612_v49, %v1610_v21  ;;  %v7364_v49 = vld [vmem:[#allocation49_spill] sm:$0xff] }
 0x275   : > { %4196 = vrcp.f32 %v2998_v59  ;;  %v2475_v57 = vmul.f32 1.442695, %v4191_v35  ;;  %3088 = vmatmul.bf16.gmra.mxu0 %v3053_v61  ;;  %v2999_v59 = vsel %vm2991_vm4, %v2973_v45, 1.0 }
 0x276   : > { %v2511_v52 = vadd.f32 %v6769_v17, %v6764_v2 }
 0x277   : > { %4198 = vpow2.f32 %v2475_v57  ;;  %v4193_v29 = vpop.eup %4192  ;;  %v2504_v8 = vpop.xlane.xlu0 %2503 }
 0x278   : > { %2512 = vadd.xlane.f32.xlu2 %v2511_v52  ;;  %v3013_v48 = vmul.f32 %v4193_v29, %v7356_v41  ;;  %v3014_v0 = vmul.f32 %v4193_v29, %v7357_v58  ;;  %3117 = vmatmul.bf16.gmra.mxu1 %v3054_v32  ;;  %4200 = vrcp.f32 %v2525_v5  ;;  %vm2520_vm6 = vcmp.gt.f32.partialorder %v2504_v8, 0.0  ;;  %v6815_v5 = vld [vmem:[%s6886_s6] ss:$0 sm:$0xff] }
 0x279   : > { %v2528_v53 = vsel %vm2520_vm6, %v2504_v8, 1.0 }
 0x27a   : > { %v4195_v47 = vpop.eup %4194 }
 0x27b   : > { %v4197_v11 = vpop.eup %4196  ;;  %v6777_v33 = vmul.f32 %v4195_v47, %v6154_v7  ;;  %v7365_v47 = vld [vmem:[#allocation46_spill] sm:$0xff] }
 0x27c   : > { %v3015_v6 = vmul.f32 %v4197_v11, %v7358_v4  ;;  %v3016_v26 = vmul.f32 %v4197_v11, %v7359_v60 }
 0x27d   : > { %v4199_v31 = vpop.eup %4198 }
 0x27e   : > { %v6783_v51 = vmul.f32 %v4199_v31, %v6190_v3  ;;  %v3035_v7 = vpack.c.bf16 %v3015_v6, %v3013_v48  ;;  %v3036_v37 = vpack.c.bf16 %v3016_v26, %v3014_v0  ;;  %v4201_v3 = vpop.eup %4200 }
 0x27f   : > { %v2976_v62 = vpop.xlane.xlu2 %2975  ;;  %v2541_v20 = vmul.f32 %v4201_v3, %v7360_v16  ;;  %v2542_v54 = vmul.f32 %v4201_v3, %v7361_v43 }
 0x280   : > { %v2514_v9 = vadd.f32 %v6783_v51, %v6777_v33  ;;  %3247 = vmatmul.bf16.vlgmr.msrb.gmra.mxu2 %v3035_v7  ;;  %3276 = vmatmul.bf16.vlgmr.msrb.gmra.mxu3 %v3036_v37  ;;  %vm2992_vm5 = vcmp.gt.f32.partialorder %v2976_v62, 0.0 }
 0x281   : > { %v3000_v46 = vsel %vm2992_vm5, %v2976_v62, 1.0  ;;  %v7367_v62 = vld [vmem:[#allocation20_spill] sm:$0xff] }
 0x282   : > { %2515 = vadd.xlane.f32.xlu1 %v2514_v9 }
 0x289   : > { %v2498_v25 = vpop.xlane.xlu1 %2497 }
 0x28a   : > { %vm2518_vm3 = vcmp.gt.f32.partialorder %v2498_v25, 0.0 }
 0x28b   : > { %v2526_v12 = vsel %vm2518_vm3, %v2498_v25, 1.0 }
 0x28c   : > { %4202 = vrcp.f32 %v2526_v12  ;;  %v7366_v12 = vld [vmem:[#allocation19_spill] sm:$0xff] }
 0x28d   : > { %4204 = vrcp.f32 %v2999_v59 }
 0x28e   : > { %4206 = vrcp.f32 %v3000_v46 }
 0x28f   : > { %4208 = vrcp.f32 %v2528_v53 }
 0x292   : > { %v4203_v27 = vpop.eup %4202 }
 0x293   : > { %v2543_v10 = vmul.f32 %v4203_v27, %v6458_v55  ;;  %v2544_v40 = vmul.f32 %v4203_v27, %v6468_v36  ;;  %v4205_v30 = vpop.eup %4204  ;;  %v7362_v55 = vld [vmem:[#allocation8_spill] sm:$0xff]  ;;  %v2507_v26 = vpop.xlane.xlu0 %2506 }
 0x294   : > { %v4207_v35 = vpop.eup %4206  ;;  %v6792_v57 = vpop.f32.mrf.mxu0  ;;  %v3017_v52 = vmul.f32 %v4205_v30, %v7362_v55  ;;  %v7363_v36 = vld [vmem:[#allocation48_spill] sm:$0xff]  ;;  %v3018_v29 = vmul.f32 %v4205_v30, %v7364_v49  ;;  %vm2521_vm9 = vcmp.gt.f32.partialorder %v2507_v26, 0.0 }
 0x295   : > { %v3033_v38 = vpack.c.bf16 %v2543_v10, %v2541_v20  ;;  %v3034_v56 = vpack.c.bf16 %v2544_v40, %v2542_v54  ;;  %v6794_v61 = vpop.f32.mrf.mxu1  ;;  %v3019_v14 = vmul.f32 %v4207_v35, %v7363_v36  ;;  %v3020_v50 = vmul.f32 %v4207_v35, %v7365_v47  ;;  %v4209_v60 = vpop.eup %4208 }
 0x296   : > { %v2547_v45 = vmul.f32 %v4209_v60, %v7366_v12  ;;  %v2548_v27 = vmul.f32 %v4209_v60, %v7367_v62 }
 0x297   : > { %3189 = vmatmul.bf16.vlgmr.msrb.gmra.mxu0 %v3033_v38  ;;  %3218 = vmatmul.bf16.vlgmr.msrb.gmra.mxu1 %v3034_v56  ;;  %v3043_v11 = vpack.c.bf16 %v3019_v14, %v3017_v52  ;;  %v3044_v32 = vpack.c.bf16 %v3020_v50, %v3018_v29  ;;  %v2529_v38 = vsel %vm2521_vm9, %v2507_v26, 1.0 }
 0x299   : > { %3252 = vmatmul.bf16.gmra.mxu2 %v3043_v11  ;;  %3281 = vmatmul.bf16.gmra.mxu3 %v3044_v32 }
 0x29b   : > { %v2979_v21 = vpop.xlane.xlu2 %2978  ;;  %v6800_v41 = vpop.f32.mrf.mxu2 }
 0x29c   : > { %v6802_v48 = vpop.f32.mrf.mxu3  ;;  %v6804_v0 = vpop.f32.mrf.mxu0  ;;  %vm2993_vm10 = vcmp.gt.f32.partialorder %v2979_v21, 0.0 }
 0x29d   : > { %v6806_v4 = vpop.f32.mrf.mxu1  ;;  %v3001_v52 = vsel %vm2993_vm10, %v2979_v21, 1.0 }
 0x2a3   : > { %v6808_v9 = vpop.f32.mrf.mxu2 }
 0x2a4   : > { %v6810_v37 = vpop.f32.mrf.mxu3 }
 0x2a9   : > { %v2501_v31 = vpop.xlane.xlu1 %2500 }
 0x2aa   : > { %vm2519_vm7 = vcmp.gt.f32.partialorder %v2501_v31, 0.0 }
 0x2ab   : > { %v2527_v58 = vsel %vm2519_vm7, %v2501_v31, 1.0 }
 0x2ac   : > { %4210 = vrcp.f32 %v2527_v58 }
 0x2ae   : > { %v3079_v16 = vpop.f32.mrf.mxu0 }
 0x2af   : > { %v2510_v6 = vpop.xlane.xlu2 %2509  ;;  %v3080_v40 = vadd.f32 %v6815_v5, %v3079_v16 }
 0x2b0   : > { %vm2522_vm8 = vcmp.gt.f32.partialorder %v2510_v6, 0.0 }
 0x2b1   : > { %v3108_v20 = vpop.f32.mrf.mxu1  ;;  %v2530_v43 = vsel %vm2522_vm8, %v2510_v6, 1.0 }
 0x2b2   : > { %v4211_v7 = vpop.eup %4210  ;;  %v3109_v56 = vadd.f32 %v3108_v20, %v3080_v40  ;;  %4212 = vrcp.f32 %v2530_v43 }
 0x2b3   : > { %v2545_v25 = vmul.f32 %v4211_v7, %v6568_v18  ;;  %v2546_v3 = vmul.f32 %v4211_v7, %v6576_v23  ;;  %4214 = vrcp.f32 %v2529_v38 }
 0x2b4   : > { %4216 = vrcp.f32 %v3001_v52 }
 0x2b5   : > { %v3041_v54 = vpack.c.bf16 %v2547_v45, %v2545_v25  ;;  %v3042_v10 = vpack.c.bf16 %v2548_v27, %v2546_v3 }
 0x2b6   : > { %v3081_v46 = vpop.f32.mrf.mxu0 }
 0x2b7   : > { %3194 = vmatmul.bf16.gmra.mxu0 %v3041_v54  ;;  %3223 = vmatmul.bf16.gmra.mxu1 %v3042_v10  ;;  %v3082_v30 = vadd.f32 %v6815_v5, %v3081_v46 }
 0x2b8   : > { %v4213_v8 = vpop.eup %4212 }
 0x2b9   : > { %v3137_v18 = vpop.f32.mrf.mxu2  ;;  %v3110_v55 = vpop.f32.mrf.mxu1  ;;  %v2551_v29 = vmul.f32 %v4213_v8, %v6593_v1  ;;  %v2552_v47 = vmul.f32 %v4213_v8, %v6601_v13 }
 0x2ba   : > { %v3138_v59 = vadd.f32 %v3137_v18, %v3109_v56  ;;  %v3166_v23 = vpop.f32.mrf.mxu3  ;;  %v3111_v36 = vadd.f32 %v3110_v55, %v3082_v30  ;;  %v4215_v14 = vpop.eup %4214 }
 0x2bb   : > { %v2549_v32 = vmul.f32 %v4215_v14, %v6503_v19  ;;  %v2550_v53 = vmul.f32 %v4215_v14, %v6512_v24  ;;  %v4217_v1 = vpop.eup %4216 }
 0x2bc   : > { %v6823_v35 = vadd.f32 %v3166_v23, %v3138_v59  ;;  %v3021_v13 = vmul.f32 %v4217_v1, %v6538_v15  ;;  %v3022_v25 = vmul.f32 %v4217_v1, %v6543_v44 }
 0x2bd   : > { %v3049_v6 = vpack.c.bf16 %v2551_v29, %v2549_v32  ;;  %v3050_v21 = vpack.c.bf16 %v2552_v47, %v2550_v53 }
 0x2c0   : > { %v2982_v49 = vpop.xlane.xlu1 %2981 }
 0x2c1   : > { %vm2994_vm11 = vcmp.gt.f32.partialorder %v2982_v49, 0.0  ;;  %v3139_v11 = vpop.f32.mrf.mxu2 }
 0x2c2   : > { %v3002_v50 = vsel %vm2994_vm11, %v2982_v49, 1.0  ;;  %v3140_v31 = vadd.f32 %v3139_v11, %v3111_v36  ;;  %v3168_v58 = vpop.f32.mrf.mxu3 }
 0x2c3   : > { %4218 = vrcp.f32 %v3002_v50 }
 0x2c4   : > { %v6829_v60 = vadd.f32 %v3168_v58, %v3140_v31 }
 0x2c7   : > { %3199 = vmatmul.bf16.gmra.mxu0 %v3049_v6  ;;  %3228 = vmatmul.bf16.gmra.mxu1 %v3050_v21 }
 0x2c9   : > { %v4219_v26 = vpop.eup %4218 }
 0x2ca   : > { %v3023_v7 = vmul.f32 %v4219_v26, %v6648_v22  ;;  %v3024_v19 = vmul.f32 %v4219_v26, %v6654_v42 }
 0x2cc   : > { %v3051_v24 = vpack.c.bf16 %v3023_v7, %v3021_v13  ;;  %v3052_v12 = vpack.c.bf16 %v3024_v19, %v3022_v25 }
 0x2ce   : > { %3257 = vmatmul.bf16.gmra.mxu2 %v3051_v24  ;;  %3286 = vmatmul.bf16.gmra.mxu3 %v3052_v12 }
 0x2d4   : > { %v2988_v45 = vpop.xlane.xlu0 %2987 }
 0x2d5   : > { %vm2996_vm12 = vcmp.gt.f32.partialorder %v2988_v45, 0.0 }
 0x2d6   : > { %v3004_v3 = vsel %vm2996_vm12, %v2988_v45, 1.0  ;;  %v3075_v45 = vadd.f32 %v6815_v5, %v6792_v57 }
 0x2d7   : > { %4220 = vrcp.f32 %v3004_v3 }
 0x2dd   : > { %v4221_v15 = vpop.eup %4220 }
 0x2de   : > { %v3142_v20 = vpop.f32.mrf.mxu2  ;;  %v3027_v43 = vmul.f32 %v4221_v15, %v6704_v63  ;;  %v3028_v10 = vmul.f32 %v4221_v15, %v6709_v39 }
 0x2df   : > { %v6840_v18 = vpop.f32.mrf.mxu3 }
 0x2e1   : > { %v2985_v62 = vpop.xlane.xlu1 %2984 }
 0x2e2   : > { %vm2995_vm13 = vcmp.gt.f32.partialorder %v2985_v62, 0.0  ;;  %v3084_v16 = vpop.f32.mrf.mxu0 }
 0x2e3   : > { %v3003_v27 = vsel %vm2995_vm13, %v2985_v62, 1.0  ;;  %v3085_v44 = vadd.f32 %v6815_v5, %v3084_v16  ;;  %v3077_v62 = vadd.f32 %v6815_v5, %v6804_v0 }
 0x2e4   : > { %4222 = vrcp.f32 %v3003_v27 }
 0x2e5   : > { %v3113_v56 = vpop.f32.mrf.mxu1 }
 0x2e6   : > { %v3114_v59 = vadd.f32 %v3113_v56, %v3085_v44  ;;  %v3144_v8 = vpop.f32.mrf.mxu2 }
 0x2e7   : > { %v3173_v36 = vpop.f32.mrf.mxu3 }
 0x2e8   : > { %v3143_v30 = vadd.f32 %v3142_v20, %v3114_v59  ;;  %v3106_v20 = vadd.f32 %v6806_v4, %v3077_v62 }
 0x2ea   : > { %v4223_v22 = vpop.eup %4222  ;;  %v3086_v46 = vpop.f32.mrf.mxu0  ;;  %v3135_v57 = vadd.f32 %v6808_v9, %v3106_v20  ;;  %v3172_v9 = vadd.f32 %v6840_v18, %v3143_v30 }
 0x2eb   : > { %v3025_v42 = vmul.f32 %v4223_v22, %v6740_v34  ;;  %v3026_v54 = vmul.f32 %v4223_v22, %v6748_v28  ;;  %v2513_v23 = vpop.xlane.xlu2 %2512  ;;  %v3087_v34 = vadd.f32 %v6815_v5, %v3086_v46 }
 0x2ec   : > { %vm2523_vm14 = vcmp.gt.f32.partialorder %v2513_v23, 0.0 }
 0x2ed   : > { %v3059_v40 = vpack.c.bf16 %v3027_v43, %v3025_v42  ;;  %v3060_v38 = vpack.c.bf16 %v3028_v10, %v3026_v54  ;;  %v2531_v63 = vsel %vm2523_vm14, %v2513_v23, 1.0  ;;  %v3115_v55 = vpop.f32.mrf.mxu1 }
 0x2ee   : > { %v3116_v28 = vadd.f32 %v3115_v55, %v3087_v34  ;;  %4224 = vrcp.f32 %v2531_v63 }
 0x2ef   : > { %3262 = vmatmul.bf16.gmra.mxu2 %v3059_v40  ;;  %3291 = vmatmul.bf16.gmra.mxu3 %v3060_v38 }
 0x2f0   : > { %v3145_v14 = vadd.f32 %v3144_v8, %v3116_v28 }
 0x2f2   : > { %v3089_v52 = vpop.f32.mrf.mxu0  ;;  %v3174_v59 = vadd.f32 %v3173_v36, %v3145_v14 }
 0x2f3   : > { %v3090_v29 = vadd.f32 %v6815_v5, %v3089_v52  ;;  %v3147_v47 = vpop.f32.mrf.mxu2  ;;  %v3176_v13 = vpop.f32.mrf.mxu3 }
 0x2f4   : > { %v4225_v11 = vpop.eup %4224 }
 0x2f5   : > { %v2516_v39 = vpop.xlane.xlu1 %2515  ;;  %v3118_v50 = vpop.f32.mrf.mxu1  ;;  %v2553_v6 = vmul.f32 %v4225_v11, %v6764_v2  ;;  %v2554_v1 = vmul.f32 %v4225_v11, %v6769_v17 }
 0x2f6   : > { %vm2524_vm15 = vcmp.gt.f32.partialorder %v2516_v39, 0.0  ;;  %v3119_v32 = vadd.f32 %v3118_v50, %v3090_v29 }
 0x2f7   : > { %v2532_v49 = vsel %vm2524_vm15, %v2516_v39, 1.0 }
 0x2f8   : > { %4226 = vrcp.f32 %v2532_v49  ;;  %v3148_v31 = vadd.f32 %v3147_v47, %v3119_v32 }
 0x2fa   : > { %v3091_v53 = vpop.f32.mrf.mxu0  ;;  %v3177_v23 = vadd.f32 %v3176_v13, %v3148_v31 }
 0x2fb   : > { %v3092_v7 = vadd.f32 %v6815_v5, %v3091_v53  ;;  %v3149_v3 = vpop.f32.mrf.mxu2  ;;  %v3178_v17 = vpop.f32.mrf.mxu3 }
 0x2fd   : > { %v3120_v24 = vpop.f32.mrf.mxu1 }
 0x2fe   : > { %v4227_v58 = vpop.eup %4226  ;;  %v3121_v12 = vadd.f32 %v3120_v24, %v3092_v7 }
 0x2ff   : > { %v2555_v21 = vmul.f32 %v4227_v58, %v6777_v33  ;;  %v2556_v26 = vmul.f32 %v4227_v58, %v6783_v51  ;;  %v3104_v33 = vadd.f32 %v6794_v61, %v3075_v45  ;;  %v3164_v61 = vadd.f32 %v6810_v37, %v3135_v57 }
 0x300   : > { %v3150_v2 = vadd.f32 %v3149_v3, %v3121_v12 }
 0x301   : > { %v3057_v25 = vpack.c.bf16 %v2555_v21, %v2553_v6  ;;  %v3058_v19 = vpack.c.bf16 %v2556_v26, %v2554_v1  ;;  %v3133_v51 = vadd.f32 %v6800_v41, %v3104_v33 }
 0x302   : > { %v3179_v28 = vadd.f32 %v3178_v17, %v3150_v2 }
 0x303   : > { %3204 = vmatmul.bf16.gmra.mxu0 %v3057_v25  ;;  %3233 = vmatmul.bf16.gmra.mxu1 %v3058_v19  ;;  %v3162_v27 = vadd.f32 %v6802_v48, %v3133_v51  ;;  %v3248_v44 = vpop.f32.mrf.mxu2  ;;  %v3277_v43 = vpop.f32.mrf.mxu3 }
 0x30b   : > { %v3250_v10 = vpop.f32.mrf.mxu2  ;;  %v3279_v38 = vpop.f32.mrf.mxu3 }
 0x314   : > { %v3190_v16 = vpop.f32.mrf.mxu0  ;;  %v3219_v15 = vpop.f32.mrf.mxu1 }
 0x315   : > { %v3191_v22 = vadd.f32 %v3190_v16, %v3162_v27 }
 0x317   : > { %v3220_v42 = vadd.f32 %v3219_v15, %v3191_v22 }
 0x319   : > { %v3249_v54 = vadd.f32 %v3248_v44, %v3220_v42 }
 0x31b   : > { %v3278_v41 = vadd.f32 %v3277_v43, %v3249_v54 }
 0x31c   : > { %v3192_v48 = vpop.f32.mrf.mxu0  ;;  %v3221_v4 = vpop.f32.mrf.mxu1 }
 0x31d   : > { %3297 = vst [vmem:[%s6863_s25] sm:$0xff] %v3278_v41  ;;  %v3193_v0 = vadd.f32 %v3192_v48, %v3164_v61  ;;  %v3253_v8 = vpop.f32.mrf.mxu2  ;;  %v3282_v55 = vpop.f32.mrf.mxu3 }
 0x31f   : > { %v3222_v5 = vadd.f32 %v3221_v4, %v3193_v0 }
 0x321   : > { %v3251_v40 = vadd.f32 %v3250_v10, %v3222_v5 }
 0x323   : > { %v3280_v56 = vadd.f32 %v3279_v38, %v3251_v40 }
 0x325   : > { %3298 = vst [vmem:[%s6863_s25 + $0x8] sm:$0xff] %v3280_v56  ;;  %v3255_v47 = vpop.f32.mrf.mxu2  ;;  %v3284_v14 = vpop.f32.mrf.mxu3 }
 0x334   : > { %v3195_v46 = vpop.f32.mrf.mxu0  ;;  %v3224_v34 = vpop.f32.mrf.mxu1 }
 0x335   : > { %v3196_v37 = vadd.f32 %v3195_v46, %v6823_v35 }
 0x337   : > { %v3225_v63 = vadd.f32 %v3224_v34, %v3196_v37 }
 0x339   : > { %v3254_v52 = vadd.f32 %v3253_v8, %v3225_v63 }
 0x33b   : > { %v3283_v39 = vadd.f32 %v3282_v55, %v3254_v52 }
 0x33c   : > { %v3197_v18 = vpop.f32.mrf.mxu0  ;;  %v3226_v49 = vpop.f32.mrf.mxu1 }
 0x33d   : > { %3299 = vst [vmem:[%s6863_s25 + $0x10] sm:$0xff] %v3283_v39  ;;  %v3198_v30 = vadd.f32 %v3197_v18, %v6829_v60 }
 0x33f   : > { %v3227_v29 = vadd.f32 %v3226_v49, %v3198_v30 }
 0x341   : > { %v3256_v36 = vadd.f32 %v3255_v47, %v3227_v29 }
 0x343   : > { %v3285_v50 = vadd.f32 %v3284_v14, %v3256_v36 }
 0x344   : > { %v3200_v35 = vpop.f32.mrf.mxu0  ;;  %v3229_v32 = vpop.f32.mrf.mxu1 }
 0x345   : > { %3300 = vst [vmem:[%s6863_s25 + $0x18] sm:$0xff] %v3285_v50  ;;  %v3201_v11 = vadd.f32 %v3200_v35, %v3172_v9 }
 0x347   : > { %v3230_v53 = vadd.f32 %v3229_v32, %v3201_v11 }
 0x34c   : > { %v3202_v31 = vpop.f32.mrf.mxu0  ;;  %v3231_v60 = vpop.f32.mrf.mxu1 }
 0x34d   : > { %v3203_v1 = vadd.f32 %v3202_v31, %v3174_v59 }
 0x34f   : > { %v3232_v13 = vadd.f32 %v3231_v60, %v3203_v1 }
 0x351   : > { %v3258_v58 = vpop.f32.mrf.mxu2  ;;  %v3287_v6 = vpop.f32.mrf.mxu3 }
 0x352   : > { %v3259_v21 = vadd.f32 %v3258_v58, %v3230_v53 }
 0x354   : > { %v3288_v26 = vadd.f32 %v3287_v6, %v3259_v21 }
 0x356   : > { %3301 = vst [vmem:[%s6863_s25 + $0x20] sm:$0xff] %v3288_v26 }
 0x359   : > { %v3260_v7 = vpop.f32.mrf.mxu2  ;;  %v3289_v19 = vpop.f32.mrf.mxu3 }
 0x35a   : > { %v3261_v25 = vadd.f32 %v3260_v7, %v3232_v13 }
 0x35c   : > { %v3290_v24 = vadd.f32 %v3289_v19, %v3261_v25 }
 0x35e   : > { %3302 = vst [vmem:[%s6863_s25 + $0x28] sm:$0xff] %v3290_v24 }
 0x372   : > { %v3263_v2 = vpop.f32.mrf.mxu2  ;;  %v3292_v17 = vpop.f32.mrf.mxu3 }
 0x37a   : > { %v3265_v22 = vpop.f32.mrf.mxu2  ;;  %v3294_v57 = vpop.f32.mrf.mxu3 }
 0x380   : > { %v3205_v12 = vpop.f32.mrf.mxu0  ;;  %v3234_v45 = vpop.f32.mrf.mxu1 }
 0x381   : > { %v3206_v3 = vadd.f32 %v3205_v12, %v3177_v23 }
 0x383   : > { %v3235_v33 = vadd.f32 %v3234_v45, %v3206_v3 }
 0x385   : > { %v3264_v51 = vadd.f32 %v3263_v2, %v3235_v33 }
 0x387   : > { %v3293_v62 = vadd.f32 %v3292_v17, %v3264_v51 }
 0x388   : > { %v3207_v27 = vpop.f32.mrf.mxu0  ;;  %v3236_v15 = vpop.f32.mrf.mxu1 }
 0x389   : > { %3303 = vst [vmem:[%s6863_s25 + $0x30] sm:$0xff] %v3293_v62  ;;  %v3208_v16 = vadd.f32 %v3207_v27, %v3179_v28 }
 0x38b   : > { %v3237_v20 = vadd.f32 %v3236_v15, %v3208_v16 }
 0x38d   : > { %v3266_v44 = vadd.f32 %v3265_v22, %v3237_v20 }
 0x38f   : > { %v3295_v42 = vadd.f32 %v3294_v57, %v3266_v44 }
 0x391   : > { %3304 = vst [vmem:[%s6863_s25 + $0x38] sm:$0xff] %v3295_v42 }
 0x392 PF: > { %s25_s28 = sadd.s32 1, %s4252_s28  }
 0x393   : > { %p22_p5 = scmp.ge.s32.totalorder %s25_s28, 6  }
 0x395   :  { %24 = sbr.rel (!%p22_p5) target bundleno = 7 (0x7), region = 80 }

</bundles_post_ra>
